<compile_context>
chip_gen: v5e
topology: v5e:2x2
jax: 0.10.0
libtpu: 0.0.40
codegen_flags: <defaults>
</compile_context>

<pallas_src>
import jax
import jax.numpy as jnp
from jax import lax
from jax.experimental import pallas as pl
from jax.experimental.pallas import tpu as pltpu


# Operand dtype for the MXU dots (accumulation is always f32 via
# preferred_element_type).  jnp.float32 keeps exact module semantics.
DOT_DTYPE = jnp.float32


# ----------------------------- in-kernel helpers ------------------------------
def _conv_relu_pool_first(x_ref, w_ref, sel_ref, out_ref, *, k, cout, unroll):
    """7x7 conv (1 -> cout) + ReLU + 2x2 max-pool on a single-channel image.

    x_ref  : (1, H, Wpad)       input image, W lane-padded to 128.
    w_ref  : (2*cout, k*(k+1))  pair-fused weights, column index j*(k+1)+i.
    sel_ref: (OW-1, PW)         0/1 even-column picker for the W-pool.
    out_ref: (PH*cout, PW)      pooled output, row index = p*cout + c.
    """
    ow = sel_ref.shape[0] + 1
    ph = out_ref.shape[0] // cout

    def body(p, carry):
        r = pl.multiple_of(2 * p, 2)
        xb = x_ref[0, pl.ds(r, k + 1), :]                               # (k+1, Wpad)
        # im2col slab for BOTH conv rows r and r+1: slab row index = j*(k+1)+i.
        slab = jnp.concatenate([xb[:, j:j + ow] for j in range(k)], axis=0)
        m = jnp.dot(w_ref[...], slab.astype(DOT_DTYPE),
                    preferred_element_type=jnp.float32)                 # (2*cout, OW)
        a = jnp.maximum(jnp.maximum(m[:cout], m[cout:]), 0.0)           # ReLU + H-pool
        b = jnp.maximum(a[:, :ow - 1], a[:, 1:ow])                      # shifted max
        out_ref[pl.ds(pl.multiple_of(p * cout, cout), cout), :] = jnp.dot(
            b, sel_ref[...], preferred_element_type=jnp.float32)        # W-pool (even pick)
        return carry

    lax.fori_loop(0, ph, body, 0, unroll=unroll)


def _conv_relu_pool(in_ref, w_ref, sel_ref, out_ref, *, k, cin, cout, unroll):
    """3x3 conv (cin -> cout) + ReLU + 2x2 max-pool; activations in (H*C, W)."""
    ow = sel_ref.shape[0] + 1
    ph = out_ref.shape[0] // cout

    def body(p, carry):
        row0 = pl.multiple_of(2 * p * cin, 2 * cin)
        blk = in_ref[pl.ds(row0, (k + 1) * cin), :]                     # ((k+1)*cin, Win)
        # slab row index = (j*(k+1) + i)*cin + c (matches host weight layout).
        slab = jnp.concatenate([blk[:, j:j + ow] for j in range(k)], axis=0)
        m = jnp.dot(w_ref[...], slab.astype(DOT_DTYPE),
                    preferred_element_type=jnp.float32)                 # (2*cout, OW)
        a = jnp.maximum(jnp.maximum(m[:cout], m[cout:]), 0.0)           # ReLU + H-pool
        b = jnp.maximum(a[:, :ow - 1], a[:, 1:ow])                      # shifted max
        out_ref[pl.ds(pl.multiple_of(p * cout, cout), cout), :] = jnp.dot(
            b, sel_ref[...], preferred_element_type=jnp.float32)        # W-pool (even pick)
        return carry

    lax.fori_loop(0, ph, body, 0, unroll=unroll)


def _disc_kernel(x_ref, w1_ref, w2_ref, w3_ref, w4_ref, w5_ref,
                 sel1_ref, sel2_ref, sel3_ref, sel4_ref, o_ref,
                 a1_ref, a2_ref, a3_ref, a4_ref):
    _conv_relu_pool_first(x_ref, w1_ref, sel1_ref, a1_ref, k=7, cout=16, unroll=False)
    _conv_relu_pool(a1_ref, w2_ref, sel2_ref, a2_ref, k=3, cin=16, cout=32, unroll=False)
    _conv_relu_pool(a2_ref, w3_ref, sel3_ref, a3_ref, k=3, cin=32, cout=32, unroll=True)
    _conv_relu_pool(a3_ref, w4_ref, sel4_ref, a4_ref, k=3, cin=32, cout=32, unroll=True)
    # Final 3x3 conv (32 -> 1) on the 3x3 pooled map, then sigmoid.
    # a4 rows are (i*32 + c), columns are j; w5_ref uses the matching layout.
    s = jnp.sum(a4_ref[...] * w5_ref[...], keepdims=True)               # (1, 1)
    o_ref[...] = jax.nn.sigmoid(s).reshape(1, 1, 1)


# ----------------------------- host-side precompute ---------------------------
def _make_pair_weights_first(w):
    """w: (k, k, 1, cout) HWIO -> (2*cout, k*(k+1)) pair-fused matrix.

    Column index j*(k+1)+i matches the in-kernel slab row order.  Rows [0:cout]
    produce conv row r (taps i=0..k-1), rows [cout:] produce conv row r+1
    (taps i=1..k); unused taps are zero.
    """
    k = w.shape[0]
    cout = w.shape[3]
    wt = jnp.transpose(w[:, :, 0, :], (2, 1, 0)).astype(jnp.float32)     # (cout, j, i)
    top = jnp.zeros((cout, k, k + 1), jnp.float32).at[:, :, :k].set(wt)
    bot = jnp.zeros((cout, k, k + 1), jnp.float32).at[:, :, 1:].set(wt)
    kk = k * (k + 1)
    return jnp.concatenate([top.reshape(cout, kk), bot.reshape(cout, kk)], axis=0)


def _make_pair_weights(w):
    """w: (k, k, cin, cout) HWIO -> (2*cout, k*(k+1)*cin) pair-fused matrix.

    Column index (j*(k+1) + i)*cin + c matches the in-kernel slab row order.
    """
    k, _, cin, cout = w.shape
    wt = jnp.transpose(w, (3, 1, 0, 2)).astype(jnp.float32)              # (cout, j, i, c)
    top = jnp.zeros((cout, k, k + 1, cin), jnp.float32).at[:, :, :k, :].set(wt)
    bot = jnp.zeros((cout, k, k + 1, cin), jnp.float32).at[:, :, 1:, :].set(wt)
    kk = k * (k + 1) * cin
    return jnp.concatenate([top.reshape(cout, kk), bot.reshape(cout, kk)], axis=0)


def _make_even_sel(ow):
    """(ow-1, ow//2) 0/1 matrix picking even columns: out[:, p] = b[:, 2p]."""
    pw = ow // 2
    rows = jnp.arange(ow - 1)[:, None]
    cols = jnp.arange(pw)[None, :]
    return (rows == 2 * cols).astype(jnp.float32)


# --------------------------------- wrapper ------------------------------------
def discriminator_forward(x_nchw, params):
    """x_nchw: (N, 1, H, W) float32; params: HWIO weights of the 5 convs."""
    w1, w2, w3, w4, w5 = params
    n, cin0, h0, w0 = x_nchw.shape
    assert cin0 == 1

    def co(s, k):
        return s - k + 1

    ow1 = co(w0, 7)
    h1, pw1 = co(h0, 7) // 2, ow1 // 2
    ow2 = co(pw1, 3)
    h2, pw2 = co(h1, 3) // 2, ow2 // 2
    ow3 = co(pw2, 3)
    h3, pw3 = co(h2, 3) // 2, ow3 // 2
    ow4 = co(pw3, 3)
    h4, pw4 = co(h3, 3) // 2, ow4 // 2
    assert h4 == 3 and pw4 == 3, (
        "kernel supports the canonical input size (final pooled map must be 3x3)")

    # Lane-pad the input width to a multiple of 128: full-lane layer-1 row loads.
    wpad = ((w0 + 127) // 128) * 128
    x = jnp.pad(x_nchw.reshape(n, h0, w0).astype(jnp.float32),
                ((0, 0), (0, 0), (0, wpad - w0)))

    # Pair-fused weight matrices + pooling selectors (host-side, once).
    w1p = _make_pair_weights_first(w1).astype(DOT_DTYPE)   # (32, 56)
    w2p = _make_pair_weights(w2).astype(DOT_DTYPE)         # (64, 192)
    w3p = _make_pair_weights(w3).astype(DOT_DTYPE)         # (64, 384)
    w4p = _make_pair_weights(w4).astype(DOT_DTYPE)         # (64, 384)
    w5m = jnp.transpose(w5[:, :, :, 0], (0, 2, 1)).reshape(3 * 32, 3)   # row i*32+c, col j
    w5m = w5m.astype(jnp.float32)
    sel1 = _make_even_sel(ow1)                             # (89, 45)
    sel2 = _make_even_sel(ow2)                             # (42, 21)
    sel3 = _make_even_sel(ow3)                             # (18, 9)
    sel4 = _make_even_sel(ow4)                             # (6, 3)

    # TODO(synk): for large batches, tile B_TILE>1 images per grid step and
    # concatenate them on the lane axis in layers 3-5 to fill the 256-wide MXU.
    out = pl.pallas_call(
        _disc_kernel,
        out_shape=jax.ShapeDtypeStruct((n, 1, 1), jnp.float32),
        grid=(n,),
        in_specs=[
            pl.BlockSpec((1, h0, wpad), lambda b: (b, 0, 0)),
            # Weights & selectors: constant block index -> stay VMEM-resident.
            pl.BlockSpec(w1p.shape, lambda b: (0, 0)),
            pl.BlockSpec(w2p.shape, lambda b: (0, 0)),
            pl.BlockSpec(w3p.shape, lambda b: (0, 0)),
            pl.BlockSpec(w4p.shape, lambda b: (0, 0)),
            pl.BlockSpec(w5m.shape, lambda b: (0, 0)),
            pl.BlockSpec(sel1.shape, lambda b: (0, 0)),
            pl.BlockSpec(sel2.shape, lambda b: (0, 0)),
            pl.BlockSpec(sel3.shape, lambda b: (0, 0)),
            pl.BlockSpec(sel4.shape, lambda b: (0, 0)),
        ],
        out_specs=pl.BlockSpec((1, 1, 1), lambda b: (b, 0, 0)),
        scratch_shapes=[
            pltpu.VMEM((h1 * 16, pw1), jnp.float32),   # layer-1 pooled activations
            pltpu.VMEM((h2 * 32, pw2), jnp.float32),   # layer-2 pooled activations
            pltpu.VMEM((h3 * 32, pw3), jnp.float32),   # layer-3 pooled activations
            pltpu.VMEM((h4 * 32, pw4), jnp.float32),   # layer-4 pooled activations
        ],
        compiler_params=pltpu.CompilerParams(
            dimension_semantics=("parallel",)),        # batch across TCs on v7x
    )(x, w1p, w2p, w3p, w4p, w5m, sel1, sel2, sel3, sel4)
    return out.reshape(n, 1, 1, 1)


# ------------------------------ params & reference ----------------------------
def init_params(key):
    shapes = [(7, 7, 1, 16), (3, 3, 16, 32), (3, 3, 32, 32),
              (3, 3, 32, 32), (3, 3, 32, 1)]  # HWIO
    keys = jax.random.split(key, len(shapes))
    params = []
    for k, s in zip(keys, shapes):
        fan_in = s[0] * s[1] * s[2]
        params.append(jax.random.normal(k, s, jnp.float32) * (2.0 / fan_in) ** 0.5)
    return params


def reference_forward(x_nchw, params):
    x = x_nchw.astype(jnp.float32)
    for idx, w in enumerate(params):
        x = lax.conv_general_dilated(
            x, w, window_strides=(1, 1), padding="VALID",
            dimension_numbers=("NCHW", "HWIO", "NCHW"))
        if idx < len(params) - 1:
            x = jnp.maximum(x, 0.0)
            x = lax.reduce_window(x, -jnp.inf, lax.max,
                                  (1, 1, 2, 2), (1, 1, 2, 2), "VALID")
        else:
            x = jax.nn.sigmoid(x)
    return x


if __name__ == "__main__":
    key = jax.random.PRNGKey(0)
    kx, kp = jax.random.split(key)
    # Smallest-practical input for this architecture family; 96x96 -> (N,1,1,1).
    x = jax.random.normal(kx, (2, 1, 96, 96), jnp.float32)
    params = init_params(kp)

    out = jax.block_until_ready(discriminator_forward(x, params))
    ref = jax.block_until_ready(reference_forward(x, params))

    assert out.shape == (2, 1, 1, 1), out.shape
    if not jnp.allclose(out, ref, atol=1e-3, rtol=1e-3):
        raise AssertionError(f"mismatch: pallas={out.ravel()} ref={ref.ravel()}")
    print("KERNEL_OK")
</pallas_src>

<mosaic_0001>
module attributes {stable_mosaic.version = 11 : i64} {
  func.func @_disc_kernel(%arg0: i32, %arg1: memref<1x96x128xf32, #tpu.memory_space<vmem>>, %arg2: memref<32x56xf32, #tpu.memory_space<vmem>>, %arg3: memref<64x192xf32, #tpu.memory_space<vmem>>, %arg4: memref<64x384xf32, #tpu.memory_space<vmem>>, %arg5: memref<64x384xf32, #tpu.memory_space<vmem>>, %arg6: memref<96x3xf32, #tpu.memory_space<vmem>>, %arg7: memref<89x45xf32, #tpu.memory_space<vmem>>, %arg8: memref<42x21xf32, #tpu.memory_space<vmem>>, %arg9: memref<18x9xf32, #tpu.memory_space<vmem>>, %arg10: memref<6x3xf32, #tpu.memory_space<vmem>>, %arg11: memref<1x1x1xf32, #tpu.memory_space<vmem>>, %arg12: memref<720x45xf32, #tpu.memory_space<vmem>>, %arg13: memref<672x21xf32, #tpu.memory_space<vmem>>, %arg14: memref<288x9xf32, #tpu.memory_space<vmem>>, %arg15: memref<96x3xf32, #tpu.memory_space<vmem>>) attributes {dimension_semantics = [#tpu.dimension_semantics<parallel>], iteration_bounds = array<i64: 2>, scalar_prefetch = 0 : i64, scratch_operands = 4 : i64, tpu.core_type = #tpu.core_type<tc>, window_params = [{transform_indices = @transform_0, window_bounds = array<i64: 1, 96, 128>}, {pipeline_mode = #tpu.pipeline_mode<synchronous>, transform_indices = @transform_1, window_bounds = array<i64: 32, 56>}, {pipeline_mode = #tpu.pipeline_mode<synchronous>, transform_indices = @transform_2, window_bounds = array<i64: 64, 192>}, {pipeline_mode = #tpu.pipeline_mode<synchronous>, transform_indices = @transform_3, window_bounds = array<i64: 64, 384>}, {pipeline_mode = #tpu.pipeline_mode<synchronous>, transform_indices = @transform_4, window_bounds = array<i64: 64, 384>}, {pipeline_mode = #tpu.pipeline_mode<synchronous>, transform_indices = @transform_5, window_bounds = array<i64: 96, 3>}, {pipeline_mode = #tpu.pipeline_mode<synchronous>, transform_indices = @transform_6, window_bounds = array<i64: 89, 45>}, {pipeline_mode = #tpu.pipeline_mode<synchronous>, transform_indices = @transform_7, window_bounds = array<i64: 42, 21>}, {pipeline_mode = #tpu.pipeline_mode<synchronous>, transform_indices = @transform_8, window_bounds = array<i64: 18, 9>}, {pipeline_mode = #tpu.pipeline_mode<synchronous>, transform_indices = @transform_9, window_bounds = array<i64: 6, 3>}, {transform_indices = @transform_10, window_bounds = array<i64: 1, 1, 1>}]} {
    %c0_i32 = arith.constant 0 : i32
    %c45_i32 = arith.constant 45 : i32
    %0 = arith.addi %c0_i32, %c45_i32 : i32
    %c1_i32 = arith.constant 1 : i32
    scf.for %arg16 = %c0_i32 to %0 step %c1_i32  : i32 {
      %c2_i32_160 = arith.constant 2 : i32
      %317 = arith.muli %c2_i32_160, %arg16 : i32
      %318 = tpu.assume_multiple %317, 2 : i32
      %c0_161 = arith.constant 0 : index
      %319 = arith.index_cast %318 : i32 to index
      %c0_162 = arith.constant 0 : index
      %320 = vector.load %arg1[%c0_161, %319, %c0_162] : memref<1x96x128xf32, #tpu.memory_space<vmem>>, vector<1x8x128xf32>
      %321 = vector.shape_cast %320 : vector<1x8x128xf32> to vector<8x128xf32>
      %322 = vector.extract_strided_slice %321 {offsets = [0, 0], sizes = [8, 90], strides = [1, 1]} : vector<8x128xf32> to vector<8x90xf32>
      %323 = vector.extract_strided_slice %321 {offsets = [0, 1], sizes = [8, 90], strides = [1, 1]} : vector<8x128xf32> to vector<8x90xf32>
      %324 = vector.extract_strided_slice %321 {offsets = [0, 2], sizes = [8, 90], strides = [1, 1]} : vector<8x128xf32> to vector<8x90xf32>
      %325 = vector.extract_strided_slice %321 {offsets = [0, 3], sizes = [8, 90], strides = [1, 1]} : vector<8x128xf32> to vector<8x90xf32>
      %326 = vector.extract_strided_slice %321 {offsets = [0, 4], sizes = [8, 90], strides = [1, 1]} : vector<8x128xf32> to vector<8x90xf32>
      %327 = vector.extract_strided_slice %321 {offsets = [0, 5], sizes = [8, 90], strides = [1, 1]} : vector<8x128xf32> to vector<8x90xf32>
      %328 = vector.extract_strided_slice %321 {offsets = [0, 6], sizes = [8, 90], strides = [1, 1]} : vector<8x128xf32> to vector<8x90xf32>
      %329 = tpu.concatenate %322, %323, %324, %325, %326, %327, %328 in 0 : vector<8x90xf32>, vector<8x90xf32>, vector<8x90xf32>, vector<8x90xf32>, vector<8x90xf32>, vector<8x90xf32>, vector<8x90xf32> -> vector<56x90xf32>
      %c0_163 = arith.constant 0 : index
      %c0_164 = arith.constant 0 : index
      %330 = vector.load %arg2[%c0_163, %c0_164] : memref<32x56xf32, #tpu.memory_space<vmem>>, vector<32x56xf32>
      %cst_165 = arith.constant dense<0.000000e+00> : vector<32x90xf32>
      %331 = tpu.matmul %330, %329, %cst_165 {dimension_numbers = #tpu.dot_dimension_numbers<[1], [0], [0], [1], [0, 0, 1, 1], [], []>} : vector<32x56xf32>, vector<56x90xf32>, vector<32x90xf32> -> vector<32x90xf32>
      %332 = vector.extract_strided_slice %331 {offsets = [0, 0], sizes = [16, 90], strides = [1, 1]} : vector<32x90xf32> to vector<16x90xf32>
      %333 = vector.extract_strided_slice %331 {offsets = [16, 0], sizes = [16, 90], strides = [1, 1]} : vector<32x90xf32> to vector<16x90xf32>
      %334 = arith.maximumf %332, %333 : vector<16x90xf32>
      %cst_166 = arith.constant 0.000000e+00 : f32
      %335 = vector.broadcast %cst_166 : f32 to vector<16x90xf32>
      %336 = arith.maximumf %334, %335 : vector<16x90xf32>
      %337 = vector.extract_strided_slice %336 {offsets = [0, 0], sizes = [16, 89], strides = [1, 1]} : vector<16x90xf32> to vector<16x89xf32>
      %338 = vector.extract_strided_slice %336 {offsets = [0, 1], sizes = [16, 89], strides = [1, 1]} : vector<16x90xf32> to vector<16x89xf32>
      %339 = arith.maximumf %337, %338 : vector<16x89xf32>
      %c0_167 = arith.constant 0 : index
      %c0_168 = arith.constant 0 : index
      %340 = vector.load %arg7[%c0_167, %c0_168] : memref<89x45xf32, #tpu.memory_space<vmem>>, vector<89x45xf32>
      %cst_169 = arith.constant dense<0.000000e+00> : vector<16x45xf32>
      %341 = tpu.matmul %339, %340, %cst_169 {dimension_numbers = #tpu.dot_dimension_numbers<[1], [0], [0], [1], [0, 0, 1, 1], [], []>} : vector<16x89xf32>, vector<89x45xf32>, vector<16x45xf32> -> vector<16x45xf32>
      %c16_i32 = arith.constant 16 : i32
      %342 = arith.muli %arg16, %c16_i32 : i32
      %343 = tpu.assume_multiple %342, 16 : i32
      %344 = arith.index_cast %343 : i32 to index
      %c0_170 = arith.constant 0 : index
      %345 = vector.load %arg12[%344, %c0_170] : memref<720x45xf32, #tpu.memory_space<vmem>>, vector<16x45xf32>
      tpu.vector_store %arg12[%344, %c0_170], %341 {strides = array<i32>} : memref<720x45xf32, #tpu.memory_space<vmem>>, vector<16x45xf32>,
    }
    %c45_i32_0 = arith.constant 45 : i32
    %c0_i32_1 = arith.constant 0 : i32
    %c21_i32 = arith.constant 21 : i32
    %1 = arith.addi %c0_i32_1, %c21_i32 : i32
    %c1_i32_2 = arith.constant 1 : i32
    scf.for %arg16 = %c0_i32_1 to %1 step %c1_i32_2  : i32 {
      %c2_i32_160 = arith.constant 2 : i32
      %317 = arith.muli %c2_i32_160, %arg16 : i32
      %c16_i32 = arith.constant 16 : i32
      %318 = arith.muli %317, %c16_i32 : i32
      %319 = tpu.assume_multiple %318, 32 : i32
      %320 = arith.index_cast %319 : i32 to index
      %c0_161 = arith.constant 0 : index
      %321 = vector.load %arg12[%320, %c0_161] : memref<720x45xf32, #tpu.memory_space<vmem>>, vector<64x45xf32>
      %322 = vector.extract_strided_slice %321 {offsets = [0, 0], sizes = [64, 43], strides = [1, 1]} : vector<64x45xf32> to vector<64x43xf32>
      %323 = vector.extract_strided_slice %321 {offsets = [0, 1], sizes = [64, 43], strides = [1, 1]} : vector<64x45xf32> to vector<64x43xf32>
      %324 = vector.extract_strided_slice %321 {offsets = [0, 2], sizes = [64, 43], strides = [1, 1]} : vector<64x45xf32> to vector<64x43xf32>
      %325 = tpu.concatenate %322, %323, %324 in 0 : vector<64x43xf32>, vector<64x43xf32>, vector<64x43xf32> -> vector<192x43xf32>
      %c0_162 = arith.constant 0 : index
      %c0_163 = arith.constant 0 : index
      %326 = vector.load %arg3[%c0_162, %c0_163] : memref<64x192xf32, #tpu.memory_space<vmem>>, vector<64x192xf32>
      %cst_164 = arith.constant dense<0.000000e+00> : vector<64x43xf32>
      %327 = tpu.matmul %326, %325, %cst_164 {dimension_numbers = #tpu.dot_dimension_numbers<[1], [0], [0], [1], [0, 0, 1, 1], [], []>} : vector<64x192xf32>, vector<192x43xf32>, vector<64x43xf32> -> vector<64x43xf32>
      %328 = vector.extract_strided_slice %327 {offsets = [0, 0], sizes = [32, 43], strides = [1, 1]} : vector<64x43xf32> to vector<32x43xf32>
      %329 = vector.extract_strided_slice %327 {offsets = [32, 0], sizes = [32, 43], strides = [1, 1]} : vector<64x43xf32> to vector<32x43xf32>
      %330 = arith.maximumf %328, %329 : vector<32x43xf32>
      %cst_165 = arith.constant 0.000000e+00 : f32
      %331 = vector.broadcast %cst_165 : f32 to vector<32x43xf32>
      %332 = arith.maximumf %330, %331 : vector<32x43xf32>
      %333 = vector.extract_strided_slice %332 {offsets = [0, 0], sizes = [32, 42], strides = [1, 1]} : vector<32x43xf32> to vector<32x42xf32>
      %334 = vector.extract_strided_slice %332 {offsets = [0, 1], sizes = [32, 42], strides = [1, 1]} : vector<32x43xf32> to vector<32x42xf32>
      %335 = arith.maximumf %333, %334 : vector<32x42xf32>
      %c0_166 = arith.constant 0 : index
      %c0_167 = arith.constant 0 : index
      %336 = vector.load %arg8[%c0_166, %c0_167] : memref<42x21xf32, #tpu.memory_space<vmem>>, vector<42x21xf32>
      %cst_168 = arith.constant dense<0.000000e+00> : vector<32x21xf32>
      %337 = tpu.matmul %335, %336, %cst_168 {dimension_numbers = #tpu.dot_dimension_numbers<[1], [0], [0], [1], [0, 0, 1, 1], [], []>} : vector<32x42xf32>, vector<42x21xf32>, vector<32x21xf32> -> vector<32x21xf32>
      %c32_i32_169 = arith.constant 32 : i32
      %338 = arith.muli %arg16, %c32_i32_169 : i32
      %339 = tpu.assume_multiple %338, 32 : i32
      %340 = arith.index_cast %339 : i32 to index
      %c0_170 = arith.constant 0 : index
      %341 = vector.load %arg13[%340, %c0_170] : memref<672x21xf32, #tpu.memory_space<vmem>>, vector<32x21xf32>
      tpu.vector_store %arg13[%340, %c0_170], %337 {strides = array<i32>} : memref<672x21xf32, #tpu.memory_space<vmem>>, vector<32x21xf32>,
    }
    %c21_i32_3 = arith.constant 21 : i32
    %c0_i32_4 = arith.constant 0 : i32
    %c2_i32 = arith.constant 2 : i32
    %2 = arith.muli %c2_i32, %c0_i32_4 : i32
    %c32_i32 = arith.constant 32 : i32
    %3 = arith.muli %2, %c32_i32 : i32
    %4 = tpu.assume_multiple %3, 64 : i32
    %5 = arith.index_cast %4 : i32 to index
    %c0 = arith.constant 0 : index
    %6 = vector.load %arg13[%5, %c0] : memref<672x21xf32, #tpu.memory_space<vmem>>, vector<128x21xf32>
    %7 = vector.extract_strided_slice %6 {offsets = [0, 0], sizes = [128, 19], strides = [1, 1]} : vector<128x21xf32> to vector<128x19xf32>
    %8 = vector.extract_strided_slice %6 {offsets = [0, 1], sizes = [128, 19], strides = [1, 1]} : vector<128x21xf32> to vector<128x19xf32>
    %9 = vector.extract_strided_slice %6 {offsets = [0, 2], sizes = [128, 19], strides = [1, 1]} : vector<128x21xf32> to vector<128x19xf32>
    %10 = tpu.concatenate %7, %8, %9 in 0 : vector<128x19xf32>, vector<128x19xf32>, vector<128x19xf32> -> vector<384x19xf32>
    %c0_5 = arith.constant 0 : index
    %c0_6 = arith.constant 0 : index
    %11 = vector.load %arg4[%c0_5, %c0_6] : memref<64x384xf32, #tpu.memory_space<vmem>>, vector<64x384xf32>
    %cst = arith.constant dense<0.000000e+00> : vector<64x19xf32>
    %12 = tpu.matmul %11, %10, %cst {dimension_numbers = #tpu.dot_dimension_numbers<[1], [0], [0], [1], [0, 0, 1, 1], [], []>} : vector<64x384xf32>, vector<384x19xf32>, vector<64x19xf32> -> vector<64x19xf32>
    %13 = vector.extract_strided_slice %12 {offsets = [0, 0], sizes = [32, 19], strides = [1, 1]} : vector<64x19xf32> to vector<32x19xf32>
    %14 = vector.extract_strided_slice %12 {offsets = [32, 0], sizes = [32, 19], strides = [1, 1]} : vector<64x19xf32> to vector<32x19xf32>
    %15 = arith.maximumf %13, %14 : vector<32x19xf32>
    %cst_7 = arith.constant 0.000000e+00 : f32
    %16 = vector.broadcast %cst_7 : f32 to vector<32x19xf32>
    %17 = arith.maximumf %15, %16 : vector<32x19xf32>
    %18 = vector.extract_strided_slice %17 {offsets = [0, 0], sizes = [32, 18], strides = [1, 1]} : vector<32x19xf32> to vector<32x18xf32>
    %19 = vector.extract_strided_slice %17 {offsets = [0, 1], sizes = [32, 18], strides = [1, 1]} : vector<32x19xf32> to vector<32x18xf32>
    %20 = arith.maximumf %18, %19 : vector<32x18xf32>
    %c0_8 = arith.constant 0 : index
    %c0_9 = arith.constant 0 : index
    %21 = vector.load %arg9[%c0_8, %c0_9] : memref<18x9xf32, #tpu.memory_space<vmem>>, vector<18x9xf32>
    %cst_10 = arith.constant dense<0.000000e+00> : vector<32x9xf32>
    %22 = tpu.matmul %20, %21, %cst_10 {dimension_numbers = #tpu.dot_dimension_numbers<[1], [0], [0], [1], [0, 0, 1, 1], [], []>} : vector<32x18xf32>, vector<18x9xf32>, vector<32x9xf32> -> vector<32x9xf32>
    %c32_i32_11 = arith.constant 32 : i32
    %23 = arith.muli %c0_i32_4, %c32_i32_11 : i32
    %24 = tpu.assume_multiple %23, 32 : i32
    %25 = arith.index_cast %24 : i32 to index
    %c0_12 = arith.constant 0 : index
    %26 = vector.load %arg14[%25, %c0_12] : memref<288x9xf32, #tpu.memory_space<vmem>>, vector<32x9xf32>
    tpu.vector_store %arg14[%25, %c0_12], %22 {strides = array<i32>} : memref<288x9xf32, #tpu.memory_space<vmem>>, vector<32x9xf32>,
    %c1_i32_13 = arith.constant 1 : i32
    %c2_i32_14 = arith.constant 2 : i32
    %27 = arith.muli %c2_i32_14, %c1_i32_13 : i32
    %c32_i32_15 = arith.constant 32 : i32
    %28 = arith.muli %27, %c32_i32_15 : i32
    %29 = tpu.assume_multiple %28, 64 : i32
    %30 = arith.index_cast %29 : i32 to index
    %c0_16 = arith.constant 0 : index
    %31 = vector.load %arg13[%30, %c0_16] : memref<672x21xf32, #tpu.memory_space<vmem>>, vector<128x21xf32>
    %32 = vector.extract_strided_slice %31 {offsets = [0, 0], sizes = [128, 19], strides = [1, 1]} : vector<128x21xf32> to vector<128x19xf32>
    %33 = vector.extract_strided_slice %31 {offsets = [0, 1], sizes = [128, 19], strides = [1, 1]} : vector<128x21xf32> to vector<128x19xf32>
    %34 = vector.extract_strided_slice %31 {offsets = [0, 2], sizes = [128, 19], strides = [1, 1]} : vector<128x21xf32> to vector<128x19xf32>
    %35 = tpu.concatenate %32, %33, %34 in 0 : vector<128x19xf32>, vector<128x19xf32>, vector<128x19xf32> -> vector<384x19xf32>
    %c0_17 = arith.constant 0 : index
    %c0_18 = arith.constant 0 : index
    %36 = vector.load %arg4[%c0_17, %c0_18] : memref<64x384xf32, #tpu.memory_space<vmem>>, vector<64x384xf32>
    %cst_19 = arith.constant dense<0.000000e+00> : vector<64x19xf32>
    %37 = tpu.matmul %36, %35, %cst_19 {dimension_numbers = #tpu.dot_dimension_numbers<[1], [0], [0], [1], [0, 0, 1, 1], [], []>} : vector<64x384xf32>, vector<384x19xf32>, vector<64x19xf32> -> vector<64x19xf32>
    %38 = vector.extract_strided_slice %37 {offsets = [0, 0], sizes = [32, 19], strides = [1, 1]} : vector<64x19xf32> to vector<32x19xf32>
    %39 = vector.extract_strided_slice %37 {offsets = [32, 0], sizes = [32, 19], strides = [1, 1]} : vector<64x19xf32> to vector<32x19xf32>
    %40 = arith.maximumf %38, %39 : vector<32x19xf32>
    %cst_20 = arith.constant 0.000000e+00 : f32
    %41 = vector.broadcast %cst_20 : f32 to vector<32x19xf32>
    %42 = arith.maximumf %40, %41 : vector<32x19xf32>
    %43 = vector.extract_strided_slice %42 {offsets = [0, 0], sizes = [32, 18], strides = [1, 1]} : vector<32x19xf32> to vector<32x18xf32>
    %44 = vector.extract_strided_slice %42 {offsets = [0, 1], sizes = [32, 18], strides = [1, 1]} : vector<32x19xf32> to vector<32x18xf32>
    %45 = arith.maximumf %43, %44 : vector<32x18xf32>
    %c0_21 = arith.constant 0 : index
    %c0_22 = arith.constant 0 : index
    %46 = vector.load %arg9[%c0_21, %c0_22] : memref<18x9xf32, #tpu.memory_space<vmem>>, vector<18x9xf32>
    %cst_23 = arith.constant dense<0.000000e+00> : vector<32x9xf32>
    %47 = tpu.matmul %45, %46, %cst_23 {dimension_numbers = #tpu.dot_dimension_numbers<[1], [0], [0], [1], [0, 0, 1, 1], [], []>} : vector<32x18xf32>, vector<18x9xf32>, vector<32x9xf32> -> vector<32x9xf32>
    %c32_i32_24 = arith.constant 32 : i32
    %48 = arith.muli %c1_i32_13, %c32_i32_24 : i32
    %49 = tpu.assume_multiple %48, 32 : i32
    %50 = arith.index_cast %49 : i32 to index
    %c0_25 = arith.constant 0 : index
    %51 = vector.load %arg14[%50, %c0_25] : memref<288x9xf32, #tpu.memory_space<vmem>>, vector<32x9xf32>
    tpu.vector_store %arg14[%50, %c0_25], %47 {strides = array<i32>} : memref<288x9xf32, #tpu.memory_space<vmem>>, vector<32x9xf32>,
    %c2_i32_26 = arith.constant 2 : i32
    %c2_i32_27 = arith.constant 2 : i32
    %52 = arith.muli %c2_i32_27, %c2_i32_26 : i32
    %c32_i32_28 = arith.constant 32 : i32
    %53 = arith.muli %52, %c32_i32_28 : i32
    %54 = tpu.assume_multiple %53, 64 : i32
    %55 = arith.index_cast %54 : i32 to index
    %c0_29 = arith.constant 0 : index
    %56 = vector.load %arg13[%55, %c0_29] : memref<672x21xf32, #tpu.memory_space<vmem>>, vector<128x21xf32>
    %57 = vector.extract_strided_slice %56 {offsets = [0, 0], sizes = [128, 19], strides = [1, 1]} : vector<128x21xf32> to vector<128x19xf32>
    %58 = vector.extract_strided_slice %56 {offsets = [0, 1], sizes = [128, 19], strides = [1, 1]} : vector<128x21xf32> to vector<128x19xf32>
    %59 = vector.extract_strided_slice %56 {offsets = [0, 2], sizes = [128, 19], strides = [1, 1]} : vector<128x21xf32> to vector<128x19xf32>
    %60 = tpu.concatenate %57, %58, %59 in 0 : vector<128x19xf32>, vector<128x19xf32>, vector<128x19xf32> -> vector<384x19xf32>
    %c0_30 = arith.constant 0 : index
    %c0_31 = arith.constant 0 : index
    %61 = vector.load %arg4[%c0_30, %c0_31] : memref<64x384xf32, #tpu.memory_space<vmem>>, vector<64x384xf32>
    %cst_32 = arith.constant dense<0.000000e+00> : vector<64x19xf32>
    %62 = tpu.matmul %61, %60, %cst_32 {dimension_numbers = #tpu.dot_dimension_numbers<[1], [0], [0], [1], [0, 0, 1, 1], [], []>} : vector<64x384xf32>, vector<384x19xf32>, vector<64x19xf32> -> vector<64x19xf32>
    %63 = vector.extract_strided_slice %62 {offsets = [0, 0], sizes = [32, 19], strides = [1, 1]} : vector<64x19xf32> to vector<32x19xf32>
    %64 = vector.extract_strided_slice %62 {offsets = [32, 0], sizes = [32, 19], strides = [1, 1]} : vector<64x19xf32> to vector<32x19xf32>
    %65 = arith.maximumf %63, %64 : vector<32x19xf32>
    %cst_33 = arith.constant 0.000000e+00 : f32
    %66 = vector.broadcast %cst_33 : f32 to vector<32x19xf32>
    %67 = arith.maximumf %65, %66 : vector<32x19xf32>
    %68 = vector.extract_strided_slice %67 {offsets = [0, 0], sizes = [32, 18], strides = [1, 1]} : vector<32x19xf32> to vector<32x18xf32>
    %69 = vector.extract_strided_slice %67 {offsets = [0, 1], sizes = [32, 18], strides = [1, 1]} : vector<32x19xf32> to vector<32x18xf32>
    %70 = arith.maximumf %68, %69 : vector<32x18xf32>
    %c0_34 = arith.constant 0 : index
    %c0_35 = arith.constant 0 : index
    %71 = vector.load %arg9[%c0_34, %c0_35] : memref<18x9xf32, #tpu.memory_space<vmem>>, vector<18x9xf32>
    %cst_36 = arith.constant dense<0.000000e+00> : vector<32x9xf32>
    %72 = tpu.matmul %70, %71, %cst_36 {dimension_numbers = #tpu.dot_dimension_numbers<[1], [0], [0], [1], [0, 0, 1, 1], [], []>} : vector<32x18xf32>, vector<18x9xf32>, vector<32x9xf32> -> vector<32x9xf32>
    %c32_i32_37 = arith.constant 32 : i32
    %73 = arith.muli %c2_i32_26, %c32_i32_37 : i32
    %74 = tpu.assume_multiple %73, 32 : i32
    %75 = arith.index_cast %74 : i32 to index
    %c0_38 = arith.constant 0 : index
    %76 = vector.load %arg14[%75, %c0_38] : memref<288x9xf32, #tpu.memory_space<vmem>>, vector<32x9xf32>
    tpu.vector_store %arg14[%75, %c0_38], %72 {strides = array<i32>} : memref<288x9xf32, #tpu.memory_space<vmem>>, vector<32x9xf32>,
    %c3_i32 = arith.constant 3 : i32
    %c2_i32_39 = arith.constant 2 : i32
    %77 = arith.muli %c2_i32_39, %c3_i32 : i32
    %c32_i32_40 = arith.constant 32 : i32
    %78 = arith.muli %77, %c32_i32_40 : i32
    %79 = tpu.assume_multiple %78, 64 : i32
    %80 = arith.index_cast %79 : i32 to index
    %c0_41 = arith.constant 0 : index
    %81 = vector.load %arg13[%80, %c0_41] : memref<672x21xf32, #tpu.memory_space<vmem>>, vector<128x21xf32>
    %82 = vector.extract_strided_slice %81 {offsets = [0, 0], sizes = [128, 19], strides = [1, 1]} : vector<128x21xf32> to vector<128x19xf32>
    %83 = vector.extract_strided_slice %81 {offsets = [0, 1], sizes = [128, 19], strides = [1, 1]} : vector<128x21xf32> to vector<128x19xf32>
    %84 = vector.extract_strided_slice %81 {offsets = [0, 2], sizes = [128, 19], strides = [1, 1]} : vector<128x21xf32> to vector<128x19xf32>
    %85 = tpu.concatenate %82, %83, %84 in 0 : vector<128x19xf32>, vector<128x19xf32>, vector<128x19xf32> -> vector<384x19xf32>
    %c0_42 = arith.constant 0 : index
    %c0_43 = arith.constant 0 : index
    %86 = vector.load %arg4[%c0_42, %c0_43] : memref<64x384xf32, #tpu.memory_space<vmem>>, vector<64x384xf32>
    %cst_44 = arith.constant dense<0.000000e+00> : vector<64x19xf32>
    %87 = tpu.matmul %86, %85, %cst_44 {dimension_numbers = #tpu.dot_dimension_numbers<[1], [0], [0], [1], [0, 0, 1, 1], [], []>} : vector<64x384xf32>, vector<384x19xf32>, vector<64x19xf32> -> vector<64x19xf32>
    %88 = vector.extract_strided_slice %87 {offsets = [0, 0], sizes = [32, 19], strides = [1, 1]} : vector<64x19xf32> to vector<32x19xf32>
    %89 = vector.extract_strided_slice %87 {offsets = [32, 0], sizes = [32, 19], strides = [1, 1]} : vector<64x19xf32> to vector<32x19xf32>
    %90 = arith.maximumf %88, %89 : vector<32x19xf32>
    %cst_45 = arith.constant 0.000000e+00 : f32
    %91 = vector.broadcast %cst_45 : f32 to vector<32x19xf32>
    %92 = arith.maximumf %90, %91 : vector<32x19xf32>
    %93 = vector.extract_strided_slice %92 {offsets = [0, 0], sizes = [32, 18], strides = [1, 1]} : vector<32x19xf32> to vector<32x18xf32>
    %94 = vector.extract_strided_slice %92 {offsets = [0, 1], sizes = [32, 18], strides = [1, 1]} : vector<32x19xf32> to vector<32x18xf32>
    %95 = arith.maximumf %93, %94 : vector<32x18xf32>
    %c0_46 = arith.constant 0 : index
    %c0_47 = arith.constant 0 : index
    %96 = vector.load %arg9[%c0_46, %c0_47] : memref<18x9xf32, #tpu.memory_space<vmem>>, vector<18x9xf32>
    %cst_48 = arith.constant dense<0.000000e+00> : vector<32x9xf32>
    %97 = tpu.matmul %95, %96, %cst_48 {dimension_numbers = #tpu.dot_dimension_numbers<[1], [0], [0], [1], [0, 0, 1, 1], [], []>} : vector<32x18xf32>, vector<18x9xf32>, vector<32x9xf32> -> vector<32x9xf32>
    %c32_i32_49 = arith.constant 32 : i32
    %98 = arith.muli %c3_i32, %c32_i32_49 : i32
    %99 = tpu.assume_multiple %98, 32 : i32
    %100 = arith.index_cast %99 : i32 to index
    %c0_50 = arith.constant 0 : index
    %101 = vector.load %arg14[%100, %c0_50] : memref<288x9xf32, #tpu.memory_space<vmem>>, vector<32x9xf32>
    tpu.vector_store %arg14[%100, %c0_50], %97 {strides = array<i32>} : memref<288x9xf32, #tpu.memory_space<vmem>>, vector<32x9xf32>,
    %c4_i32 = arith.constant 4 : i32
    %c2_i32_51 = arith.constant 2 : i32
    %102 = arith.muli %c2_i32_51, %c4_i32 : i32
    %c32_i32_52 = arith.constant 32 : i32
    %103 = arith.muli %102, %c32_i32_52 : i32
    %104 = tpu.assume_multiple %103, 64 : i32
    %105 = arith.index_cast %104 : i32 to index
    %c0_53 = arith.constant 0 : index
    %106 = vector.load %arg13[%105, %c0_53] : memref<672x21xf32, #tpu.memory_space<vmem>>, vector<128x21xf32>
    %107 = vector.extract_strided_slice %106 {offsets = [0, 0], sizes = [128, 19], strides = [1, 1]} : vector<128x21xf32> to vector<128x19xf32>
    %108 = vector.extract_strided_slice %106 {offsets = [0, 1], sizes = [128, 19], strides = [1, 1]} : vector<128x21xf32> to vector<128x19xf32>
    %109 = vector.extract_strided_slice %106 {offsets = [0, 2], sizes = [128, 19], strides = [1, 1]} : vector<128x21xf32> to vector<128x19xf32>
    %110 = tpu.concatenate %107, %108, %109 in 0 : vector<128x19xf32>, vector<128x19xf32>, vector<128x19xf32> -> vector<384x19xf32>
    %c0_54 = arith.constant 0 : index
    %c0_55 = arith.constant 0 : index
    %111 = vector.load %arg4[%c0_54, %c0_55] : memref<64x384xf32, #tpu.memory_space<vmem>>, vector<64x384xf32>
    %cst_56 = arith.constant dense<0.000000e+00> : vector<64x19xf32>
    %112 = tpu.matmul %111, %110, %cst_56 {dimension_numbers = #tpu.dot_dimension_numbers<[1], [0], [0], [1], [0, 0, 1, 1], [], []>} : vector<64x384xf32>, vector<384x19xf32>, vector<64x19xf32> -> vector<64x19xf32>
    %113 = vector.extract_strided_slice %112 {offsets = [0, 0], sizes = [32, 19], strides = [1, 1]} : vector<64x19xf32> to vector<32x19xf32>
    %114 = vector.extract_strided_slice %112 {offsets = [32, 0], sizes = [32, 19], strides = [1, 1]} : vector<64x19xf32> to vector<32x19xf32>
    %115 = arith.maximumf %113, %114 : vector<32x19xf32>
    %cst_57 = arith.constant 0.000000e+00 : f32
    %116 = vector.broadcast %cst_57 : f32 to vector<32x19xf32>
    %117 = arith.maximumf %115, %116 : vector<32x19xf32>
    %118 = vector.extract_strided_slice %117 {offsets = [0, 0], sizes = [32, 18], strides = [1, 1]} : vector<32x19xf32> to vector<32x18xf32>
    %119 = vector.extract_strided_slice %117 {offsets = [0, 1], sizes = [32, 18], strides = [1, 1]} : vector<32x19xf32> to vector<32x18xf32>
    %120 = arith.maximumf %118, %119 : vector<32x18xf32>
    %c0_58 = arith.constant 0 : index
    %c0_59 = arith.constant 0 : index
    %121 = vector.load %arg9[%c0_58, %c0_59] : memref<18x9xf32, #tpu.memory_space<vmem>>, vector<18x9xf32>
    %cst_60 = arith.constant dense<0.000000e+00> : vector<32x9xf32>
    %122 = tpu.matmul %120, %121, %cst_60 {dimension_numbers = #tpu.dot_dimension_numbers<[1], [0], [0], [1], [0, 0, 1, 1], [], []>} : vector<32x18xf32>, vector<18x9xf32>, vector<32x9xf32> -> vector<32x9xf32>
    %c32_i32_61 = arith.constant 32 : i32
    %123 = arith.muli %c4_i32, %c32_i32_61 : i32
    %124 = tpu.assume_multiple %123, 32 : i32
    %125 = arith.index_cast %124 : i32 to index
    %c0_62 = arith.constant 0 : index
    %126 = vector.load %arg14[%125, %c0_62] : memref<288x9xf32, #tpu.memory_space<vmem>>, vector<32x9xf32>
    tpu.vector_store %arg14[%125, %c0_62], %122 {strides = array<i32>} : memref<288x9xf32, #tpu.memory_space<vmem>>, vector<32x9xf32>,
    %c5_i32 = arith.constant 5 : i32
    %c2_i32_63 = arith.constant 2 : i32
    %127 = arith.muli %c2_i32_63, %c5_i32 : i32
    %c32_i32_64 = arith.constant 32 : i32
    %128 = arith.muli %127, %c32_i32_64 : i32
    %129 = tpu.assume_multiple %128, 64 : i32
    %130 = arith.index_cast %129 : i32 to index
    %c0_65 = arith.constant 0 : index
    %131 = vector.load %arg13[%130, %c0_65] : memref<672x21xf32, #tpu.memory_space<vmem>>, vector<128x21xf32>
    %132 = vector.extract_strided_slice %131 {offsets = [0, 0], sizes = [128, 19], strides = [1, 1]} : vector<128x21xf32> to vector<128x19xf32>
    %133 = vector.extract_strided_slice %131 {offsets = [0, 1], sizes = [128, 19], strides = [1, 1]} : vector<128x21xf32> to vector<128x19xf32>
    %134 = vector.extract_strided_slice %131 {offsets = [0, 2], sizes = [128, 19], strides = [1, 1]} : vector<128x21xf32> to vector<128x19xf32>
    %135 = tpu.concatenate %132, %133, %134 in 0 : vector<128x19xf32>, vector<128x19xf32>, vector<128x19xf32> -> vector<384x19xf32>
    %c0_66 = arith.constant 0 : index
    %c0_67 = arith.constant 0 : index
    %136 = vector.load %arg4[%c0_66, %c0_67] : memref<64x384xf32, #tpu.memory_space<vmem>>, vector<64x384xf32>
    %cst_68 = arith.constant dense<0.000000e+00> : vector<64x19xf32>
    %137 = tpu.matmul %136, %135, %cst_68 {dimension_numbers = #tpu.dot_dimension_numbers<[1], [0], [0], [1], [0, 0, 1, 1], [], []>} : vector<64x384xf32>, vector<384x19xf32>, vector<64x19xf32> -> vector<64x19xf32>
    %138 = vector.extract_strided_slice %137 {offsets = [0, 0], sizes = [32, 19], strides = [1, 1]} : vector<64x19xf32> to vector<32x19xf32>
    %139 = vector.extract_strided_slice %137 {offsets = [32, 0], sizes = [32, 19], strides = [1, 1]} : vector<64x19xf32> to vector<32x19xf32>
    %140 = arith.maximumf %138, %139 : vector<32x19xf32>
    %cst_69 = arith.constant 0.000000e+00 : f32
    %141 = vector.broadcast %cst_69 : f32 to vector<32x19xf32>
    %142 = arith.maximumf %140, %141 : vector<32x19xf32>
    %143 = vector.extract_strided_slice %142 {offsets = [0, 0], sizes = [32, 18], strides = [1, 1]} : vector<32x19xf32> to vector<32x18xf32>
    %144 = vector.extract_strided_slice %142 {offsets = [0, 1], sizes = [32, 18], strides = [1, 1]} : vector<32x19xf32> to vector<32x18xf32>
    %145 = arith.maximumf %143, %144 : vector<32x18xf32>
    %c0_70 = arith.constant 0 : index
    %c0_71 = arith.constant 0 : index
    %146 = vector.load %arg9[%c0_70, %c0_71] : memref<18x9xf32, #tpu.memory_space<vmem>>, vector<18x9xf32>
    %cst_72 = arith.constant dense<0.000000e+00> : vector<32x9xf32>
    %147 = tpu.matmul %145, %146, %cst_72 {dimension_numbers = #tpu.dot_dimension_numbers<[1], [0], [0], [1], [0, 0, 1, 1], [], []>} : vector<32x18xf32>, vector<18x9xf32>, vector<32x9xf32> -> vector<32x9xf32>
    %c32_i32_73 = arith.constant 32 : i32
    %148 = arith.muli %c5_i32, %c32_i32_73 : i32
    %149 = tpu.assume_multiple %148, 32 : i32
    %150 = arith.index_cast %149 : i32 to index
    %c0_74 = arith.constant 0 : index
    %151 = vector.load %arg14[%150, %c0_74] : memref<288x9xf32, #tpu.memory_space<vmem>>, vector<32x9xf32>
    tpu.vector_store %arg14[%150, %c0_74], %147 {strides = array<i32>} : memref<288x9xf32, #tpu.memory_space<vmem>>, vector<32x9xf32>,
    %c6_i32 = arith.constant 6 : i32
    %c2_i32_75 = arith.constant 2 : i32
    %152 = arith.muli %c2_i32_75, %c6_i32 : i32
    %c32_i32_76 = arith.constant 32 : i32
    %153 = arith.muli %152, %c32_i32_76 : i32
    %154 = tpu.assume_multiple %153, 64 : i32
    %155 = arith.index_cast %154 : i32 to index
    %c0_77 = arith.constant 0 : index
    %156 = vector.load %arg13[%155, %c0_77] : memref<672x21xf32, #tpu.memory_space<vmem>>, vector<128x21xf32>
    %157 = vector.extract_strided_slice %156 {offsets = [0, 0], sizes = [128, 19], strides = [1, 1]} : vector<128x21xf32> to vector<128x19xf32>
    %158 = vector.extract_strided_slice %156 {offsets = [0, 1], sizes = [128, 19], strides = [1, 1]} : vector<128x21xf32> to vector<128x19xf32>
    %159 = vector.extract_strided_slice %156 {offsets = [0, 2], sizes = [128, 19], strides = [1, 1]} : vector<128x21xf32> to vector<128x19xf32>
    %160 = tpu.concatenate %157, %158, %159 in 0 : vector<128x19xf32>, vector<128x19xf32>, vector<128x19xf32> -> vector<384x19xf32>
    %c0_78 = arith.constant 0 : index
    %c0_79 = arith.constant 0 : index
    %161 = vector.load %arg4[%c0_78, %c0_79] : memref<64x384xf32, #tpu.memory_space<vmem>>, vector<64x384xf32>
    %cst_80 = arith.constant dense<0.000000e+00> : vector<64x19xf32>
    %162 = tpu.matmul %161, %160, %cst_80 {dimension_numbers = #tpu.dot_dimension_numbers<[1], [0], [0], [1], [0, 0, 1, 1], [], []>} : vector<64x384xf32>, vector<384x19xf32>, vector<64x19xf32> -> vector<64x19xf32>
    %163 = vector.extract_strided_slice %162 {offsets = [0, 0], sizes = [32, 19], strides = [1, 1]} : vector<64x19xf32> to vector<32x19xf32>
    %164 = vector.extract_strided_slice %162 {offsets = [32, 0], sizes = [32, 19], strides = [1, 1]} : vector<64x19xf32> to vector<32x19xf32>
    %165 = arith.maximumf %163, %164 : vector<32x19xf32>
    %cst_81 = arith.constant 0.000000e+00 : f32
    %166 = vector.broadcast %cst_81 : f32 to vector<32x19xf32>
    %167 = arith.maximumf %165, %166 : vector<32x19xf32>
    %168 = vector.extract_strided_slice %167 {offsets = [0, 0], sizes = [32, 18], strides = [1, 1]} : vector<32x19xf32> to vector<32x18xf32>
    %169 = vector.extract_strided_slice %167 {offsets = [0, 1], sizes = [32, 18], strides = [1, 1]} : vector<32x19xf32> to vector<32x18xf32>
    %170 = arith.maximumf %168, %169 : vector<32x18xf32>
    %c0_82 = arith.constant 0 : index
    %c0_83 = arith.constant 0 : index
    %171 = vector.load %arg9[%c0_82, %c0_83] : memref<18x9xf32, #tpu.memory_space<vmem>>, vector<18x9xf32>
    %cst_84 = arith.constant dense<0.000000e+00> : vector<32x9xf32>
    %172 = tpu.matmul %170, %171, %cst_84 {dimension_numbers = #tpu.dot_dimension_numbers<[1], [0], [0], [1], [0, 0, 1, 1], [], []>} : vector<32x18xf32>, vector<18x9xf32>, vector<32x9xf32> -> vector<32x9xf32>
    %c32_i32_85 = arith.constant 32 : i32
    %173 = arith.muli %c6_i32, %c32_i32_85 : i32
    %174 = tpu.assume_multiple %173, 32 : i32
    %175 = arith.index_cast %174 : i32 to index
    %c0_86 = arith.constant 0 : index
    %176 = vector.load %arg14[%175, %c0_86] : memref<288x9xf32, #tpu.memory_space<vmem>>, vector<32x9xf32>
    tpu.vector_store %arg14[%175, %c0_86], %172 {strides = array<i32>} : memref<288x9xf32, #tpu.memory_space<vmem>>, vector<32x9xf32>,
    %c7_i32 = arith.constant 7 : i32
    %c2_i32_87 = arith.constant 2 : i32
    %177 = arith.muli %c2_i32_87, %c7_i32 : i32
    %c32_i32_88 = arith.constant 32 : i32
    %178 = arith.muli %177, %c32_i32_88 : i32
    %179 = tpu.assume_multiple %178, 64 : i32
    %180 = arith.index_cast %179 : i32 to index
    %c0_89 = arith.constant 0 : index
    %181 = vector.load %arg13[%180, %c0_89] : memref<672x21xf32, #tpu.memory_space<vmem>>, vector<128x21xf32>
    %182 = vector.extract_strided_slice %181 {offsets = [0, 0], sizes = [128, 19], strides = [1, 1]} : vector<128x21xf32> to vector<128x19xf32>
    %183 = vector.extract_strided_slice %181 {offsets = [0, 1], sizes = [128, 19], strides = [1, 1]} : vector<128x21xf32> to vector<128x19xf32>
    %184 = vector.extract_strided_slice %181 {offsets = [0, 2], sizes = [128, 19], strides = [1, 1]} : vector<128x21xf32> to vector<128x19xf32>
    %185 = tpu.concatenate %182, %183, %184 in 0 : vector<128x19xf32>, vector<128x19xf32>, vector<128x19xf32> -> vector<384x19xf32>
    %c0_90 = arith.constant 0 : index
    %c0_91 = arith.constant 0 : index
    %186 = vector.load %arg4[%c0_90, %c0_91] : memref<64x384xf32, #tpu.memory_space<vmem>>, vector<64x384xf32>
    %cst_92 = arith.constant dense<0.000000e+00> : vector<64x19xf32>
    %187 = tpu.matmul %186, %185, %cst_92 {dimension_numbers = #tpu.dot_dimension_numbers<[1], [0], [0], [1], [0, 0, 1, 1], [], []>} : vector<64x384xf32>, vector<384x19xf32>, vector<64x19xf32> -> vector<64x19xf32>
    %188 = vector.extract_strided_slice %187 {offsets = [0, 0], sizes = [32, 19], strides = [1, 1]} : vector<64x19xf32> to vector<32x19xf32>
    %189 = vector.extract_strided_slice %187 {offsets = [32, 0], sizes = [32, 19], strides = [1, 1]} : vector<64x19xf32> to vector<32x19xf32>
    %190 = arith.maximumf %188, %189 : vector<32x19xf32>
    %cst_93 = arith.constant 0.000000e+00 : f32
    %191 = vector.broadcast %cst_93 : f32 to vector<32x19xf32>
    %192 = arith.maximumf %190, %191 : vector<32x19xf32>
    %193 = vector.extract_strided_slice %192 {offsets = [0, 0], sizes = [32, 18], strides = [1, 1]} : vector<32x19xf32> to vector<32x18xf32>
    %194 = vector.extract_strided_slice %192 {offsets = [0, 1], sizes = [32, 18], strides = [1, 1]} : vector<32x19xf32> to vector<32x18xf32>
    %195 = arith.maximumf %193, %194 : vector<32x18xf32>
    %c0_94 = arith.constant 0 : index
    %c0_95 = arith.constant 0 : index
    %196 = vector.load %arg9[%c0_94, %c0_95] : memref<18x9xf32, #tpu.memory_space<vmem>>, vector<18x9xf32>
    %cst_96 = arith.constant dense<0.000000e+00> : vector<32x9xf32>
    %197 = tpu.matmul %195, %196, %cst_96 {dimension_numbers = #tpu.dot_dimension_numbers<[1], [0], [0], [1], [0, 0, 1, 1], [], []>} : vector<32x18xf32>, vector<18x9xf32>, vector<32x9xf32> -> vector<32x9xf32>
    %c32_i32_97 = arith.constant 32 : i32
    %198 = arith.muli %c7_i32, %c32_i32_97 : i32
    %199 = tpu.assume_multiple %198, 32 : i32
    %200 = arith.index_cast %199 : i32 to index
    %c0_98 = arith.constant 0 : index
    %201 = vector.load %arg14[%200, %c0_98] : memref<288x9xf32, #tpu.memory_space<vmem>>, vector<32x9xf32>
    tpu.vector_store %arg14[%200, %c0_98], %197 {strides = array<i32>} : memref<288x9xf32, #tpu.memory_space<vmem>>, vector<32x9xf32>,
    %c8_i32 = arith.constant 8 : i32
    %c2_i32_99 = arith.constant 2 : i32
    %202 = arith.muli %c2_i32_99, %c8_i32 : i32
    %c32_i32_100 = arith.constant 32 : i32
    %203 = arith.muli %202, %c32_i32_100 : i32
    %204 = tpu.assume_multiple %203, 64 : i32
    %205 = arith.index_cast %204 : i32 to index
    %c0_101 = arith.constant 0 : index
    %206 = vector.load %arg13[%205, %c0_101] : memref<672x21xf32, #tpu.memory_space<vmem>>, vector<128x21xf32>
    %207 = vector.extract_strided_slice %206 {offsets = [0, 0], sizes = [128, 19], strides = [1, 1]} : vector<128x21xf32> to vector<128x19xf32>
    %208 = vector.extract_strided_slice %206 {offsets = [0, 1], sizes = [128, 19], strides = [1, 1]} : vector<128x21xf32> to vector<128x19xf32>
    %209 = vector.extract_strided_slice %206 {offsets = [0, 2], sizes = [128, 19], strides = [1, 1]} : vector<128x21xf32> to vector<128x19xf32>
    %210 = tpu.concatenate %207, %208, %209 in 0 : vector<128x19xf32>, vector<128x19xf32>, vector<128x19xf32> -> vector<384x19xf32>
    %c0_102 = arith.constant 0 : index
    %c0_103 = arith.constant 0 : index
    %211 = vector.load %arg4[%c0_102, %c0_103] : memref<64x384xf32, #tpu.memory_space<vmem>>, vector<64x384xf32>
    %cst_104 = arith.constant dense<0.000000e+00> : vector<64x19xf32>
    %212 = tpu.matmul %211, %210, %cst_104 {dimension_numbers = #tpu.dot_dimension_numbers<[1], [0], [0], [1], [0, 0, 1, 1], [], []>} : vector<64x384xf32>, vector<384x19xf32>, vector<64x19xf32> -> vector<64x19xf32>
    %213 = vector.extract_strided_slice %212 {offsets = [0, 0], sizes = [32, 19], strides = [1, 1]} : vector<64x19xf32> to vector<32x19xf32>
    %214 = vector.extract_strided_slice %212 {offsets = [32, 0], sizes = [32, 19], strides = [1, 1]} : vector<64x19xf32> to vector<32x19xf32>
    %215 = arith.maximumf %213, %214 : vector<32x19xf32>
    %cst_105 = arith.constant 0.000000e+00 : f32
    %216 = vector.broadcast %cst_105 : f32 to vector<32x19xf32>
    %217 = arith.maximumf %215, %216 : vector<32x19xf32>
    %218 = vector.extract_strided_slice %217 {offsets = [0, 0], sizes = [32, 18], strides = [1, 1]} : vector<32x19xf32> to vector<32x18xf32>
    %219 = vector.extract_strided_slice %217 {offsets = [0, 1], sizes = [32, 18], strides = [1, 1]} : vector<32x19xf32> to vector<32x18xf32>
    %220 = arith.maximumf %218, %219 : vector<32x18xf32>
    %c0_106 = arith.constant 0 : index
    %c0_107 = arith.constant 0 : index
    %221 = vector.load %arg9[%c0_106, %c0_107] : memref<18x9xf32, #tpu.memory_space<vmem>>, vector<18x9xf32>
    %cst_108 = arith.constant dense<0.000000e+00> : vector<32x9xf32>
    %222 = tpu.matmul %220, %221, %cst_108 {dimension_numbers = #tpu.dot_dimension_numbers<[1], [0], [0], [1], [0, 0, 1, 1], [], []>} : vector<32x18xf32>, vector<18x9xf32>, vector<32x9xf32> -> vector<32x9xf32>
    %c32_i32_109 = arith.constant 32 : i32
    %223 = arith.muli %c8_i32, %c32_i32_109 : i32
    %224 = tpu.assume_multiple %223, 32 : i32
    %225 = arith.index_cast %224 : i32 to index
    %c0_110 = arith.constant 0 : index
    %226 = vector.load %arg14[%225, %c0_110] : memref<288x9xf32, #tpu.memory_space<vmem>>, vector<32x9xf32>
    tpu.vector_store %arg14[%225, %c0_110], %222 {strides = array<i32>} : memref<288x9xf32, #tpu.memory_space<vmem>>, vector<32x9xf32>,
    %c9_i32 = arith.constant 9 : i32
    %c0_i32_111 = arith.constant 0 : i32
    %c2_i32_112 = arith.constant 2 : i32
    %227 = arith.muli %c2_i32_112, %c0_i32_111 : i32
    %c32_i32_113 = arith.constant 32 : i32
    %228 = arith.muli %227, %c32_i32_113 : i32
    %229 = tpu.assume_multiple %228, 64 : i32
    %230 = arith.index_cast %229 : i32 to index
    %c0_114 = arith.constant 0 : index
    %231 = vector.load %arg14[%230, %c0_114] : memref<288x9xf32, #tpu.memory_space<vmem>>, vector<128x9xf32>
    %232 = vector.extract_strided_slice %231 {offsets = [0, 0], sizes = [128, 7], strides = [1, 1]} : vector<128x9xf32> to vector<128x7xf32>
    %233 = vector.extract_strided_slice %231 {offsets = [0, 1], sizes = [128, 7], strides = [1, 1]} : vector<128x9xf32> to vector<128x7xf32>
    %234 = vector.extract_strided_slice %231 {offsets = [0, 2], sizes = [128, 7], strides = [1, 1]} : vector<128x9xf32> to vector<128x7xf32>
    %235 = tpu.concatenate %232, %233, %234 in 0 : vector<128x7xf32>, vector<128x7xf32>, vector<128x7xf32> -> vector<384x7xf32>
    %c0_115 = arith.constant 0 : index
    %c0_116 = arith.constant 0 : index
    %236 = vector.load %arg5[%c0_115, %c0_116] : memref<64x384xf32, #tpu.memory_space<vmem>>, vector<64x384xf32>
    %cst_117 = arith.constant dense<0.000000e+00> : vector<64x7xf32>
    %237 = tpu.matmul %236, %235, %cst_117 {dimension_numbers = #tpu.dot_dimension_numbers<[1], [0], [0], [1], [0, 0, 1, 1], [], []>} : vector<64x384xf32>, vector<384x7xf32>, vector<64x7xf32> -> vector<64x7xf32>
    %238 = vector.extract_strided_slice %237 {offsets = [0, 0], sizes = [32, 7], strides = [1, 1]} : vector<64x7xf32> to vector<32x7xf32>
    %239 = vector.extract_strided_slice %237 {offsets = [32, 0], sizes = [32, 7], strides = [1, 1]} : vector<64x7xf32> to vector<32x7xf32>
    %240 = arith.maximumf %238, %239 : vector<32x7xf32>
    %cst_118 = arith.constant 0.000000e+00 : f32
    %241 = vector.broadcast %cst_118 : f32 to vector<32x7xf32>
    %242 = arith.maximumf %240, %241 : vector<32x7xf32>
    %243 = vector.extract_strided_slice %242 {offsets = [0, 0], sizes = [32, 6], strides = [1, 1]} : vector<32x7xf32> to vector<32x6xf32>
    %244 = vector.extract_strided_slice %242 {offsets = [0, 1], sizes = [32, 6], strides = [1, 1]} : vector<32x7xf32> to vector<32x6xf32>
    %245 = arith.maximumf %243, %244 : vector<32x6xf32>
    %c0_119 = arith.constant 0 : index
    %c0_120 = arith.constant 0 : index
    %246 = vector.load %arg10[%c0_119, %c0_120] : memref<6x3xf32, #tpu.memory_space<vmem>>, vector<6x3xf32>
    %cst_121 = arith.constant dense<0.000000e+00> : vector<32x3xf32>
    %247 = tpu.matmul %245, %246, %cst_121 {dimension_numbers = #tpu.dot_dimension_numbers<[1], [0], [0], [1], [0, 0, 1, 1], [], []>} : vector<32x6xf32>, vector<6x3xf32>, vector<32x3xf32> -> vector<32x3xf32>
    %c32_i32_122 = arith.constant 32 : i32
    %248 = arith.muli %c0_i32_111, %c32_i32_122 : i32
    %249 = tpu.assume_multiple %248, 32 : i32
    %250 = arith.index_cast %249 : i32 to index
    %c0_123 = arith.constant 0 : index
    %251 = vector.load %arg15[%250, %c0_123] : memref<96x3xf32, #tpu.memory_space<vmem>>, vector<32x3xf32>
    tpu.vector_store %arg15[%250, %c0_123], %247 {strides = array<i32>} : memref<96x3xf32, #tpu.memory_space<vmem>>, vector<32x3xf32>,
    %c1_i32_124 = arith.constant 1 : i32
    %c2_i32_125 = arith.constant 2 : i32
    %252 = arith.muli %c2_i32_125, %c1_i32_124 : i32
    %c32_i32_126 = arith.constant 32 : i32
    %253 = arith.muli %252, %c32_i32_126 : i32
    %254 = tpu.assume_multiple %253, 64 : i32
    %255 = arith.index_cast %254 : i32 to index
    %c0_127 = arith.constant 0 : index
    %256 = vector.load %arg14[%255, %c0_127] : memref<288x9xf32, #tpu.memory_space<vmem>>, vector<128x9xf32>
    %257 = vector.extract_strided_slice %256 {offsets = [0, 0], sizes = [128, 7], strides = [1, 1]} : vector<128x9xf32> to vector<128x7xf32>
    %258 = vector.extract_strided_slice %256 {offsets = [0, 1], sizes = [128, 7], strides = [1, 1]} : vector<128x9xf32> to vector<128x7xf32>
    %259 = vector.extract_strided_slice %256 {offsets = [0, 2], sizes = [128, 7], strides = [1, 1]} : vector<128x9xf32> to vector<128x7xf32>
    %260 = tpu.concatenate %257, %258, %259 in 0 : vector<128x7xf32>, vector<128x7xf32>, vector<128x7xf32> -> vector<384x7xf32>
    %c0_128 = arith.constant 0 : index
    %c0_129 = arith.constant 0 : index
    %261 = vector.load %arg5[%c0_128, %c0_129] : memref<64x384xf32, #tpu.memory_space<vmem>>, vector<64x384xf32>
    %cst_130 = arith.constant dense<0.000000e+00> : vector<64x7xf32>
    %262 = tpu.matmul %261, %260, %cst_130 {dimension_numbers = #tpu.dot_dimension_numbers<[1], [0], [0], [1], [0, 0, 1, 1], [], []>} : vector<64x384xf32>, vector<384x7xf32>, vector<64x7xf32> -> vector<64x7xf32>
    %263 = vector.extract_strided_slice %262 {offsets = [0, 0], sizes = [32, 7], strides = [1, 1]} : vector<64x7xf32> to vector<32x7xf32>
    %264 = vector.extract_strided_slice %262 {offsets = [32, 0], sizes = [32, 7], strides = [1, 1]} : vector<64x7xf32> to vector<32x7xf32>
    %265 = arith.maximumf %263, %264 : vector<32x7xf32>
    %cst_131 = arith.constant 0.000000e+00 : f32
    %266 = vector.broadcast %cst_131 : f32 to vector<32x7xf32>
    %267 = arith.maximumf %265, %266 : vector<32x7xf32>
    %268 = vector.extract_strided_slice %267 {offsets = [0, 0], sizes = [32, 6], strides = [1, 1]} : vector<32x7xf32> to vector<32x6xf32>
    %269 = vector.extract_strided_slice %267 {offsets = [0, 1], sizes = [32, 6], strides = [1, 1]} : vector<32x7xf32> to vector<32x6xf32>
    %270 = arith.maximumf %268, %269 : vector<32x6xf32>
    %c0_132 = arith.constant 0 : index
    %c0_133 = arith.constant 0 : index
    %271 = vector.load %arg10[%c0_132, %c0_133] : memref<6x3xf32, #tpu.memory_space<vmem>>, vector<6x3xf32>
    %cst_134 = arith.constant dense<0.000000e+00> : vector<32x3xf32>
    %272 = tpu.matmul %270, %271, %cst_134 {dimension_numbers = #tpu.dot_dimension_numbers<[1], [0], [0], [1], [0, 0, 1, 1], [], []>} : vector<32x6xf32>, vector<6x3xf32>, vector<32x3xf32> -> vector<32x3xf32>
    %c32_i32_135 = arith.constant 32 : i32
    %273 = arith.muli %c1_i32_124, %c32_i32_135 : i32
    %274 = tpu.assume_multiple %273, 32 : i32
    %275 = arith.index_cast %274 : i32 to index
    %c0_136 = arith.constant 0 : index
    %276 = vector.load %arg15[%275, %c0_136] : memref<96x3xf32, #tpu.memory_space<vmem>>, vector<32x3xf32>
    tpu.vector_store %arg15[%275, %c0_136], %272 {strides = array<i32>} : memref<96x3xf32, #tpu.memory_space<vmem>>, vector<32x3xf32>,
    %c2_i32_137 = arith.constant 2 : i32
    %c2_i32_138 = arith.constant 2 : i32
    %277 = arith.muli %c2_i32_138, %c2_i32_137 : i32
    %c32_i32_139 = arith.constant 32 : i32
    %278 = arith.muli %277, %c32_i32_139 : i32
    %279 = tpu.assume_multiple %278, 64 : i32
    %280 = arith.index_cast %279 : i32 to index
    %c0_140 = arith.constant 0 : index
    %281 = vector.load %arg14[%280, %c0_140] : memref<288x9xf32, #tpu.memory_space<vmem>>, vector<128x9xf32>
    %282 = vector.extract_strided_slice %281 {offsets = [0, 0], sizes = [128, 7], strides = [1, 1]} : vector<128x9xf32> to vector<128x7xf32>
    %283 = vector.extract_strided_slice %281 {offsets = [0, 1], sizes = [128, 7], strides = [1, 1]} : vector<128x9xf32> to vector<128x7xf32>
    %284 = vector.extract_strided_slice %281 {offsets = [0, 2], sizes = [128, 7], strides = [1, 1]} : vector<128x9xf32> to vector<128x7xf32>
    %285 = tpu.concatenate %282, %283, %284 in 0 : vector<128x7xf32>, vector<128x7xf32>, vector<128x7xf32> -> vector<384x7xf32>
    %c0_141 = arith.constant 0 : index
    %c0_142 = arith.constant 0 : index
    %286 = vector.load %arg5[%c0_141, %c0_142] : memref<64x384xf32, #tpu.memory_space<vmem>>, vector<64x384xf32>
    %cst_143 = arith.constant dense<0.000000e+00> : vector<64x7xf32>
    %287 = tpu.matmul %286, %285, %cst_143 {dimension_numbers = #tpu.dot_dimension_numbers<[1], [0], [0], [1], [0, 0, 1, 1], [], []>} : vector<64x384xf32>, vector<384x7xf32>, vector<64x7xf32> -> vector<64x7xf32>
    %288 = vector.extract_strided_slice %287 {offsets = [0, 0], sizes = [32, 7], strides = [1, 1]} : vector<64x7xf32> to vector<32x7xf32>
    %289 = vector.extract_strided_slice %287 {offsets = [32, 0], sizes = [32, 7], strides = [1, 1]} : vector<64x7xf32> to vector<32x7xf32>
    %290 = arith.maximumf %288, %289 : vector<32x7xf32>
    %cst_144 = arith.constant 0.000000e+00 : f32
    %291 = vector.broadcast %cst_144 : f32 to vector<32x7xf32>
    %292 = arith.maximumf %290, %291 : vector<32x7xf32>
    %293 = vector.extract_strided_slice %292 {offsets = [0, 0], sizes = [32, 6], strides = [1, 1]} : vector<32x7xf32> to vector<32x6xf32>
    %294 = vector.extract_strided_slice %292 {offsets = [0, 1], sizes = [32, 6], strides = [1, 1]} : vector<32x7xf32> to vector<32x6xf32>
    %295 = arith.maximumf %293, %294 : vector<32x6xf32>
    %c0_145 = arith.constant 0 : index
    %c0_146 = arith.constant 0 : index
    %296 = vector.load %arg10[%c0_145, %c0_146] : memref<6x3xf32, #tpu.memory_space<vmem>>, vector<6x3xf32>
    %cst_147 = arith.constant dense<0.000000e+00> : vector<32x3xf32>
    %297 = tpu.matmul %295, %296, %cst_147 {dimension_numbers = #tpu.dot_dimension_numbers<[1], [0], [0], [1], [0, 0, 1, 1], [], []>} : vector<32x6xf32>, vector<6x3xf32>, vector<32x3xf32> -> vector<32x3xf32>
    %c32_i32_148 = arith.constant 32 : i32
    %298 = arith.muli %c2_i32_137, %c32_i32_148 : i32
    %299 = tpu.assume_multiple %298, 32 : i32
    %300 = arith.index_cast %299 : i32 to index
    %c0_149 = arith.constant 0 : index
    %301 = vector.load %arg15[%300, %c0_149] : memref<96x3xf32, #tpu.memory_space<vmem>>, vector<32x3xf32>
    tpu.vector_store %arg15[%300, %c0_149], %297 {strides = array<i32>} : memref<96x3xf32, #tpu.memory_space<vmem>>, vector<32x3xf32>,
    %c3_i32_150 = arith.constant 3 : i32
    %c0_151 = arith.constant 0 : index
    %c0_152 = arith.constant 0 : index
    %302 = vector.load %arg15[%c0_151, %c0_152] : memref<96x3xf32, #tpu.memory_space<vmem>>, vector<96x3xf32>
    %c0_153 = arith.constant 0 : index
    %c0_154 = arith.constant 0 : index
    %303 = vector.load %arg6[%c0_153, %c0_154] : memref<96x3xf32, #tpu.memory_space<vmem>>, vector<96x3xf32>
    %304 = arith.mulf %302, %303 : vector<96x3xf32>
    %305 = vector.shape_cast %304 : vector<96x3xf32> to vector<1x96x3xf32>
    %cst_155 = arith.constant dense<0.000000e+00> : vector<1xf32>
    %306 = vector.multi_reduction <add>, %305, %cst_155 [1, 2] : vector<1x96x3xf32> to vector<1xf32>
    %307 = vector.shape_cast %306 : vector<1xf32> to vector<1x1x1xf32>
    %308 = vector.extract %307[0, 0, 0] : f32 from vector<1x1x1xf32>
    %309 = vector.broadcast %308 : f32 to vector<1x1xf32>
    %310 = arith.negf %309 : vector<1x1xf32>
    %311 = math.exp %310 : vector<1x1xf32>
    %cst_156 = arith.constant 1.000000e+00 : f32
    %312 = vector.broadcast %cst_156 : f32 to vector<1x1xf32>
    %313 = arith.addf %312, %311 : vector<1x1xf32>
    %314 = arith.divf %312, %313 : vector<1x1xf32>
    %315 = vector.shape_cast %314 : vector<1x1xf32> to vector<1x1x1xf32>
    %c0_157 = arith.constant 0 : index
    %c0_158 = arith.constant 0 : index
    %c0_159 = arith.constant 0 : index
    %316 = vector.load %arg11[%c0_157, %c0_158, %c0_159] : memref<1x1x1xf32, #tpu.memory_space<vmem>>, vector<1x1x1xf32>
    tpu.vector_store %arg11[%c0_157, %c0_158, %c0_159], %315 {strides = array<i32>} : memref<1x1x1xf32, #tpu.memory_space<vmem>>, vector<1x1x1xf32>,
    return
  }
  func.func @transform_0(%arg0: i32) -> (i32, i32, i32) {
    %c0_i32 = arith.constant 0 : i32
    %c0_i32_0 = arith.constant 0 : i32
    %c0_i32_1 = arith.constant 0 : i32
    return %arg0, %c0_i32, %c0_i32_0 : i32, i32, i32
  }
  func.func @transform_1(%arg0: i32) -> (i32, i32) {
    %c0_i32 = arith.constant 0 : i32
    %c0_i32_0 = arith.constant 0 : i32
    %c0_i32_1 = arith.constant 0 : i32
    return %c0_i32, %c0_i32_0 : i32, i32
  }
  func.func @transform_2(%arg0: i32) -> (i32, i32) {
    %c0_i32 = arith.constant 0 : i32
    %c0_i32_0 = arith.constant 0 : i32
    %c0_i32_1 = arith.constant 0 : i32
    return %c0_i32, %c0_i32_0 : i32, i32
  }
  func.func @transform_3(%arg0: i32) -> (i32, i32) {
    %c0_i32 = arith.constant 0 : i32
    %c0_i32_0 = arith.constant 0 : i32
    %c0_i32_1 = arith.constant 0 : i32
    return %c0_i32, %c0_i32_0 : i32, i32
  }
  func.func @transform_4(%arg0: i32) -> (i32, i32) {
    %c0_i32 = arith.constant 0 : i32
    %c0_i32_0 = arith.constant 0 : i32
    %c0_i32_1 = arith.constant 0 : i32
    return %c0_i32, %c0_i32_0 : i32, i32
  }
  func.func @transform_5(%arg0: i32) -> (i32, i32) {
    %c0_i32 = arith.constant 0 : i32
    %c0_i32_0 = arith.constant 0 : i32
    %c0_i32_1 = arith.constant 0 : i32
    return %c0_i32, %c0_i32_0 : i32, i32
  }
  func.func @transform_6(%arg0: i32) -> (i32, i32) {
    %c0_i32 = arith.constant 0 : i32
    %c0_i32_0 = arith.constant 0 : i32
    %c0_i32_1 = arith.constant 0 : i32
    return %c0_i32, %c0_i32_0 : i32, i32
  }
  func.func @transform_7(%arg0: i32) -> (i32, i32) {
    %c0_i32 = arith.constant 0 : i32
    %c0_i32_0 = arith.constant 0 : i32
    %c0_i32_1 = arith.constant 0 : i32
    return %c0_i32, %c0_i32_0 : i32, i32
  }
  func.func @transform_8(%arg0: i32) -> (i32, i32) {
    %c0_i32 = arith.constant 0 : i32
    %c0_i32_0 = arith.constant 0 : i32
    %c0_i32_1 = arith.constant 0 : i32
    return %c0_i32, %c0_i32_0 : i32, i32
  }
  func.func @transform_9(%arg0: i32) -> (i32, i32) {
    %c0_i32 = arith.constant 0 : i32
    %c0_i32_0 = arith.constant 0 : i32
    %c0_i32_1 = arith.constant 0 : i32
    return %c0_i32, %c0_i32_0 : i32, i32
  }
  func.func @transform_10(%arg0: i32) -> (i32, i32, i32) {
    %c0_i32 = arith.constant 0 : i32
    %c0_i32_0 = arith.constant 0 : i32
    %c0_i32_1 = arith.constant 0 : i32
    return %arg0, %c0_i32, %c0_i32_0 : i32, i32, i32
  }
}

</mosaic_0001>

<bundles_post_ra>
// kernel: tpu_custom_call.1
= control target key start
LH: loop header
LB: loop body
LE: loop exit
PB: predicated region body
PF: predicated region fallthrough
CT: control target
= control target key end

     0   :  { %15 = vsyncpa [#allocation7], 0  ;;  %s8769_s0 = inlined_call_operand.vmem [shape: f32[2,96,128], index: 0, kind: input, shape index: {}]   ;;  %s8770_s1 = inlined_call_operand.vmem [shape: f32[32,56], index: 1, kind: input, shape index: {}]   ;;  %s8771_s2 = inlined_call_operand.hbm [shape: f32[64,192], index: 2, kind: input, shape index: {}]   ;;  %s8772_s3 = inlined_call_operand.hbm [shape: f32[64,384], index: 3, kind: input, shape index: {}]   ;;  %s8773_s4 = inlined_call_operand.hbm [shape: f32[64,384], index: 4, kind: input, shape index: {}]   ;;  %s8774_s5 = inlined_call_operand.vmem [shape: f32[96,3], index: 5, kind: input, shape index: {}]   ;;  %s8775_s6 = inlined_call_operand.vmem [shape: f32[89,45], index: 6, kind: input, shape index: {}]   ;;  %s8776_s7 = inlined_call_operand.vmem [shape: f32[42,21], index: 7, kind: input, shape index: {}]   ;;  %s8777_s8 = inlined_call_operand.vmem [shape: f32[18,9], index: 8, kind: input, shape index: {}]   ;;  %s8778_s9 = inlined_call_operand.vmem [shape: f32[6,3], index: 9, kind: input, shape index: {}]   ;;  %s8779_s10 = inlined_call_operand.vmem [shape: f32[2,1,1], index: 10, kind: output, shape index: {}]  }
   0x1   :  { %16 = vsyncpa [#allocation9], 0  ;;  %s6691_s13 = smov 0  }
   0x2 LB: > { %s296_s16 = sshll.u32 %s8772_s3, 4  ;;  %s6700_s17 = sadd.s32 4294967295, %s6609_s13   ;;  %s6609_s13 = sphi %s6691_s13, %s22_s13   ;;  %s297_s16 = int_to_ptr.hbm [resolvable:$true] %s296_s16 }
   0x3   : > { %p5282_p0 = scmp.ge.s32.totalorder %s6609_s13, 1  ;;  %p268_p1 = scmp.lt.s32.totalorder %s6609_s13, 3 }
   0x4   : > { %p5446_p2 = scmp.eq.s32.totalorder %s6700_s17, 0  ;;  %s6619_s19 = smov [#allocation8]  }
   0x5   : > { %p6705_p3 = pnand %p5282_p0, %p268_p1  ;;  %s298_s20 = sshll.u32 %s6619_s19, 4  ;;  %s299_s20 = int_to_ptr.vmem [resolvable:$true] %s298_s20 }
   0x6   : > { %s282_s23 = sshll.u32 %s8771_s2, 4  ;;  %s6620_s25 = smov [#allocation6]   ;;  %s283_s23 = int_to_ptr.hbm [resolvable:$true] %s282_s23 }
   0x7   : > { %p5436_p4 = pneg %p6705_p3  ;;  %s284_s26 = sshll.u32 %s6620_s25, 4  ;;  %s285_s26 = int_to_ptr.vmem [resolvable:$true] %s284_s26 }
   0x8   : > { %s6621_s27 = smov 384   ;;  %s6622_s28 = smov 24  }
   0x9   : > { %p6716_p5 = pnand %p5446_p2, %p5436_p4  ;;  %s310_s11 = sshll.u32 %s8773_s4, 4  ;;  %s311_s11 = int_to_ptr.hbm [resolvable:$true] %s310_s11 }
   0xa   : > { %s6623_s12 = smov 256   ;;  %s6624_s14 = smov 16  }
   0xb   : > { %5442 = dma.hbm_to_vmem [thread:$0]  (!%p6716_p5), %s297_s16, 3072, %s299_s20, [#allocation9], %s6621_s27, %s6621_s27, %s6622_s28  }
   0xc   : > { %5439 = dma.hbm_to_vmem [thread:$0]  (!%p6716_p5), %s283_s23, 2048, %s285_s26, [#allocation7], %s6623_s12, %s6623_s12, %s6624_s14  }
   0xd   : > { %s6625_s15 = smov [#allocation10]   ;;  %351 = sbr.rel (%p6705_p3) target bundleno = 5542 (0x15a6), region = 60 }
   0xe   : > { %s312_s19 = sshll.u32 %s6625_s15, 4  ;;  %s313_s19 = int_to_ptr.vmem [resolvable:$true] %s312_s19 }
   0xf   : > { %5445 = dma.hbm_to_vmem [thread:$0]  (!%p6716_p5), %s311_s11, 3072, %s313_s19, [#allocation9], %s6621_s27, %s6621_s27, %s6622_s28  }
  0x12   : > { %6600 = dma.done.wait (%p5446_p2), [#allocation7], 2048  }
  0x13   : > { %6602 = vsyncadd (%p5446_p2), [#allocation7], 4294965248 }
  0x14   : > { %6604 = dma.done.wait (%p5446_p2), [#allocation9], 6144  }
  0x15   : > { %6606 = vsyncadd (%p5446_p2), [#allocation9], 4294961152  ;;  %p398_p6 = scmp.lt.s32.totalorder %s6700_s17, 1  ;;  %s6753_s25 = smov 0  }
  0x17   : > { %s8944_s17 = smov (!%p398_p6, %s6700_s17), 1 }
  0x18   : > { %s5421_s16 = smul.u32 96, %s8944_s17  ;;  %s405_s21 = scalar_lea.vmem %s8779_s10, %s8944_s17 }
  0x1a   : > { %s6751_s24 = scalar_lea.vmem %s8769_s0, %s5421_s16 }
  0x1b LB: >> { %s5292_s26 = sshll.u32 %s6613_s25, 1  ;;  %s6626_s28 = smov 122   ;;  %v436_v7 = vld [vmem:[%s8770_s1 + $0x10] sm:$0xff]  ;;  %vm438_vm0 = vcmask 457728   ;;  %v434_v8 = vld [vmem:[%s8770_s1] sm:$0xff]  ;;  %v437_v9 = vld [vmem:[%s8770_s1 + $0x18] sm:$0xff]  ;;  %s6613_s25 = sphi %s6753_s25, %s411_s25  }
  0x1c   : >> { %s413_s27 = scalar_lea.vmem %s6751_s24, %s5292_s26  ;;  %s6627_s29 = smov 124   ;;  %v435_v10 = vld [vmem:[%s8770_s1 + $0x8] sm:$0xff]  ;;  %v505_v11 = vld [vmem:[%s8775_s6 + $0x58] sm:$0x1]  ;;  %vm513_vm1 = vcmask 1040384   ;;  %v504_v12 = vld [vmem:[%s8775_s6 + $0x50] sm:$0xff] }
  0x1d   : >> { %v414_v0 = vld [vmem:[%s413_s27] sm:$0xff]  ;;  %s6628_s30 = smov 126   ;;  %s6629_s11 = smov 123   ;;  %5297 = vmatpush.msk.msra.mxu1 %vm513_vm1, %v505_v11  ;;  %5385 = vmatpush.msk.msra.mxu3 %vm513_vm1, %v505_v11  ;;  %v503_v13 = vld [vmem:[%s8775_s6 + $0x48] sm:$0xff]  ;;  %v501_v15 = vld [vmem:[%s8775_s6 + $0x38] sm:$0xff]  ;;  %vm506_vm2 = vcmask 728064  }
  0x1e   : >> { %431 = vrot.lane.b32.xlu0 %v414_v0, %s6626_s28  ;;  %425 = vrot.lane.b32.xlu1 %v414_v0, %s6627_s29  ;;  %s6630_s12 = smov 125   ;;  %s6631_s14 = smov 127   ;;  %v502_v14 = vld [vmem:[%s8775_s6 + $0x40] sm:$0xff]  ;;  %v500_v16 = vld [vmem:[%s8775_s6 + $0x30] sm:$0xff]  ;;  %vm542_vm3 = vcmask 367616  }
  0x1f   : >> { %419 = vrot.lane.b32.xlu2 %v414_v0, %s6628_s30  ;;  %522 = vmatpush.msra.mxu1 %v504_v12  ;;  %v499_v17 = vld [vmem:[%s8775_s6 + $0x28] sm:$0xff]  ;;  %v498_v18 = vld [vmem:[%s8775_s6 + $0x20] sm:$0xff]  ;;  %v497_v19 = vld [vmem:[%s8775_s6 + $0x18] sm:$0xff]  ;;  %s5300_s20 = sshll.u32 %s6613_s25, 4  ;;  %s411_s25 = sadd.s32 1, %s6613_s25  }
  0x20   : >> { %5386 = vmatpush.msra.mxu3 %v504_v12  ;;  %v496_v21 = vld [vmem:[%s8775_s6 + $0x10] sm:$0xff]  ;;  %v495_v22 = vld [vmem:[%s8775_s6 + $0x8] sm:$0xff]  ;;  %v494_v30 = vld [vmem:[%s8775_s6] sm:$0xff]  ;;  %s541_s22 = scalar_lea.vmem [#allocation2], %s5300_s20  ;;  %p408_p7 = scmp.ge.s32.totalorder %s411_s25, 45  }
  0x21   : >> { %523 = vmatpush.msra.mxu1 %v503_v13 }
  0x22   : >> { %5387 = vmatpush.msra.mxu3 %v503_v13 }
  0x23   : >> { %524 = vmatpush.msra.mxu1 %v502_v14 }
  0x24   : >> { %5388 = vmatpush.msra.mxu3 %v502_v14 }
  0x25   : >> { %525 = vmatpush.msra.mxu1 %v501_v15 }
  0x26   : >> { %428 = vrot.lane.b32.xlu0 %v414_v0, %s6629_s11  ;;  %422 = vrot.lane.b32.xlu1 %v414_v0, %s6630_s12 }
  0x27   : >> { %416 = vrot.lane.b32.xlu2 %v414_v0, %s6631_s14  ;;  %5389 = vmatpush.msra.mxu3 %v501_v15 }
  0x28   : >> { %526 = vmatpush.msra.mxu1 %v500_v16 }
  0x29   : >> { %5390 = vmatpush.msra.mxu3 %v500_v16 }
  0x2a   : >> { %527 = vmatpush.msra.mxu1 %v499_v17 }
  0x2b   : >> { %5391 = vmatpush.msra.mxu3 %v499_v17 }
  0x2c   : >> { %528 = vmatpush.msra.mxu1 %v498_v18 }
  0x2d   : >> { %5392 = vmatpush.msra.mxu3 %v498_v18 }
  0x2e   : >> { %529 = vmatpush.msra.mxu1 %v497_v19 }
  0x2f   : >> { %5393 = vmatpush.msra.mxu3 %v497_v19 }
  0x30   : >> { %530 = vmatpush.msra.mxu1 %v496_v21 }
  0x31   : >> { %5394 = vmatpush.msra.mxu3 %v496_v21 }
  0x32   : >> { %531 = vmatpush.msra.mxu1 %v495_v22 }
  0x33   : >> { %5395 = vmatpush.msra.mxu3 %v495_v22 }
  0x34   : >> { %532 = vmatpush.msra.mxu1 %v494_v30 }
  0x35   : >> { %5396 = vmatpush.msra.mxu3 %v494_v30 }
  0x79   : >> { %v420_v3 = vpop.permute.xlu2 %419 }
  0x81   : >> { %v417_v6 = vpop.permute.xlu2 %416 }
  0x90   : >> { %v432_v1 = vpop.permute.xlu0 %431  ;;  %v426_v2 = vpop.permute.xlu1 %425 }
  0x91   : >> { %460 = vmatpush.msra.mxu0 %v432_v1  ;;  %5378 = vmatpush.msra.mxu2 %v432_v1 }
  0x98   : >> { %v429_v4 = vpop.permute.xlu0 %428  ;;  %v423_v5 = vpop.permute.xlu1 %422 }
  0x99   : >> { %461 = vmatpush.msra.mxu0 %v429_v4  ;;  %5379 = vmatpush.msra.mxu2 %v429_v4 }
  0x9b   : >> { %462 = vmatpush.msra.mxu0 %v426_v2  ;;  %5380 = vmatpush.msra.mxu2 %v426_v2 }
  0x9d   : >> { %463 = vmatpush.msra.mxu0 %v423_v5  ;;  %5381 = vmatpush.msra.mxu2 %v423_v5 }
  0x9f   : >> { %464 = vmatpush.msra.mxu0 %v420_v3  ;;  %5382 = vmatpush.msra.mxu2 %v420_v3 }
  0xa1   : >> { %465 = vmatpush.msra.mxu0 %v417_v6  ;;  %5383 = vmatpush.msra.mxu2 %v417_v6 }
  0xa3   : >> { %5384 = vmatpush.msra.mxu2 %v414_v0  ;;  %466 = vmatpush.msra.mxu0 %v414_v0 }
  0xa4   : >> { %5295 = vmatmul.msk.f32.vlgmr.msra.gmra.mxu2 %vm438_vm0, %v436_v7  ;;  %5293 = vmatmul.msk.f32.vlgmr.msra.gmra.mxu0 %vm438_vm0, %v434_v8 }
  0xac   : >> { %5296 = vmatmul.msk.f32.gmra.mxu2 %vm438_vm0, %v437_v9  ;;  %5294 = vmatmul.msk.f32.gmra.mxu0 %vm438_vm0, %v435_v10 }
 0x121   : >> { %v468_v20 = vpop.f32.mrf.mxu0 }
 0x127   : >> { %v474_v23 = vpop.f32.mrf.mxu2 }
 0x128   : >> { %v480_v24 = vmax.f32 %v468_v20, %v474_v23 }
 0x129   : >> { %v471_v26 = vpop.f32.mrf.mxu0 }
 0x12a   : >> { %v482_v25 = vmax.f32 %v480_v24, 0.0 }
 0x12c   : >> { %486 = vrot.lane.b32.xlu1 %v482_v25, %s6631_s14 }
 0x12f   : >> { %v477_v27 = vpop.f32.mrf.mxu2 }
 0x130   : >> { %v481_v28 = vmax.f32 %v471_v26, %v477_v27 }
 0x132   : >> { %v483_v29 = vmax.f32 %v481_v28, 0.0 }
 0x134   : >> { %488 = vrot.lane.b32.xlu0 %v483_v29, %s6631_s14  ;;  %s6815_s14 = smov (%p408_p7), 0  }
 0x19e   : >> { %v487_v31 = vpop.permute.xlu1 %486 }
 0x19f   : >> { %v492_v32 = vmax.f32 %v482_v25, %v487_v31 }
 0x1a1   : >> { %5298 = vmatmul.msk.f32.vlgmr.msra.gmra.mxu1 %vm506_vm2, %v492_v32 }
 0x1a6   : >> { %v489_v33 = vpop.permute.xlu0 %488 }
 0x1a7   : >> { %v493_v34 = vmax.f32 %v483_v29, %v489_v33 }
 0x1a9   : >> { %5299 = vmatmul.msk.f32.vlgmr.msra.gmra.mxu3 %vm506_vm2, %v493_v34 }
 0x21e   : >> { %v534_v35 = vpop.f32.mrf.mxu1 }
 0x21f   : >> { %543 = vst.msk [vmem:[%s541_s22] sm:$0xff] %vm542_vm3, %v534_v35 }
 0x229   : > { %410 = sbr.rel (!%p408_p7) target bundleno = 27 (0x1b), region = 141 }
 0x22c   : >> { %v537_v36 = vpop.f32.mrf.mxu3 }
 0x22d   : >> { %544 = vst.msk [vmem:[%s541_s22 + $0x8] sm:$0xff] %vm542_vm3, %v537_v36 }
 0x22e LB: >> { %s5301_s23 = sshll.u32 %s6617_s14, 5  ;;  %s6632_s24 = smov 126   ;;  %v618_v7 = vld [vmem:[#allocation6 + $0x8] sm:$0xff]  ;;  %vm633_vm4 = vcmask 523264   ;;  %v620_v11 = vld [vmem:[#allocation6 + $0x18] sm:$0xff]  ;;  %v617_v14 = vld [vmem:[#allocation6] sm:$0xff]  ;;  %s6617_s14 = sphi %s6815_s14, %s550_s14  }
 0x22f   : >> { %s552_s26 = scalar_lea.vmem [#allocation2], %s5301_s23  ;;  %s6633_s25 = smov 127   ;;  %v630_v10 = vld [vmem:[#allocation6 + $0x68] sm:$0xff]  ;;  %v632_v12 = vld [vmem:[#allocation6 + $0x78] sm:$0xff]  ;;  %v625_v15 = vld [vmem:[#allocation6 + $0x40] sm:$0xff]  ;;  %vm787_vm5 = vcmask 1041408  }
 0x230   : >> { %v622_v13 = vld [vmem:[#allocation6 + $0x28] sm:$0xff]  ;;  %v624_v16 = vld [vmem:[#allocation6 + $0x38] sm:$0xff]  ;;  %v619_v17 = vld [vmem:[#allocation6 + $0x10] sm:$0xff]  ;;  %vm774_vm6 = vcmask 343040   ;;  %vm821_vm7 = vcmask 171008   ;;  %s550_s14 = sadd.s32 1, %s6617_s14  }
 0x231   : >> { %v627_v18 = vld [vmem:[#allocation6 + $0x50] sm:$0xff]  ;;  %v626_v19 = vld [vmem:[#allocation6 + $0x48] sm:$0xff]  ;;  %v621_v20 = vld [vmem:[#allocation6 + $0x20] sm:$0xff]  ;;  %p547_p8 = scmp.ge.s32.totalorder %s550_s14, 21  }
 0x232   : >> { %v629_v21 = vld [vmem:[#allocation6 + $0x60] sm:$0xff]  ;;  %v628_v22 = vld [vmem:[#allocation6 + $0x58] sm:$0xff]  ;;  %v623_v23 = vld [vmem:[#allocation6 + $0x30] sm:$0xff]  ;;  %s6634_s14 = smov (%p547_p8), 126   ;;  %vm1132_vm8 = vcmask (%p547_p8), 146432   ;;  %vm1178_vm9 = vcmask (%p547_p8), 72704  }
 0x233   : >> { %v631_v24 = vld [vmem:[#allocation6 + $0x70] sm:$0xff]  ;;  %v773_v30 = vld [vmem:[%s8776_s7 + $0x28] sm:$0x3]  ;;  %v771_v33 = vld [vmem:[%s8776_s7 + $0x18] sm:$0xff]  ;;  %vm4348_vm10 = vcmask (%p547_p8), 1045504   ;;  %vm4335_vm11 = vcmask (%p547_p8), 48128  }
 0x234   : >> { %v6823_v37 = vld [vmem:[%s552_s26 + $0x30] sm:$0xff]  ;;  %v6825_v38 = vld [vmem:[%s552_s26 + $0x38] sm:$0xff]  ;;  %v6835_v43 = vld [vmem:[%s552_s26] sm:$0xff]  ;;  %vm4381_vm12 = vcmask (%p547_p8), 23552   ;;  %vm5182_vm0 = vcmask (%p547_p8), 0  }
 0x235   : >> { %v6827_v39 = vld [vmem:[%s552_s26 + $0x10] sm:$0xff]  ;;  %v5493_v40 = vpack.i.bf16 %v6823_v37, %v6825_v38  ;;  %v6831_v41 = vld [vmem:[%s552_s26 + $0x18] sm:$0xff]  ;;  %v6837_v44 = vld [vmem:[%s552_s26 + $0x8] sm:$0xff] }
 0x236   : >> { %v5503_v42 = vpack.i.bf16 %v6827_v39, %v6831_v41  ;;  %v5513_v45 = vpack.i.bf16 %v6835_v43, %v6837_v44  ;;  %v6841_v46 = vld [vmem:[%s552_s26 + $0x20] sm:$0xff]  ;;  %v6843_v47 = vld [vmem:[%s552_s26 + $0x28] sm:$0xff]  ;;  %v770_v35 = vld [vmem:[%s8776_s7 + $0x10] sm:$0xff]  ;;  %s820_s26 = scalar_lea.vmem [#allocation3], %s5301_s23  ;;  %s6635_s23 = smov (%p547_p8), 127  }
 0x237   : >> { %5494 = vrot.lane.b32.xlu0 %v5493_v40, %s6632_s24  ;;  %v5498_v48 = vpack.i.bf16 %v6841_v46, %v6843_v47  ;;  %v772_v31 = vld [vmem:[%s8776_s7 + $0x20] sm:$0xff]  ;;  %v769_v36 = vld [vmem:[%s8776_s7 + $0x8] sm:$0xff] }
 0x238   : >> { %5504 = vrot.lane.b32.xlu1 %v5503_v42, %s6632_s24  ;;  %5514 = vrot.lane.b32.xlu2 %v5513_v45, %s6632_s24 }
 0x23f   : >> { %5499 = vrot.lane.b32.xlu0 %v5498_v48, %s6632_s24 }
 0x240   : >> { %5509 = vrot.lane.b32.xlu1 %v5493_v40, %s6633_s25  ;;  %5519 = vrot.lane.b32.xlu2 %v5498_v48, %s6633_s25 }
 0x247   : >> { %5524 = vrot.lane.b32.xlu0 %v5503_v42, %s6633_s25 }
 0x248   : >> { %5529 = vrot.lane.b32.xlu1 %v5513_v45, %s6633_s25 }
 0x292   : >> { %v5515_v49 = vpop.permute.xlu2 %5514 }
 0x293   : >> { %v5516_v3 = vunpack.i.l.bf16 %v5515_v49  ;;  %v5517_v6 = vunpack.i.h.bf16 %v5515_v49 }
 0x29a   : >> { %v5520_v57 = vpop.permute.xlu2 %5519 }
 0x29b   : >> { %v5521_v61 = vunpack.i.l.bf16 %v5520_v57  ;;  %v5522_v63 = vunpack.i.h.bf16 %v5520_v57 }
 0x2a9   : >> { %v5495_v50 = vpop.permute.xlu0 %5494 }
 0x2aa   : >> { %v5505_v51 = vpop.permute.xlu1 %5504  ;;  %v5496_v52 = vunpack.i.l.bf16 %v5495_v50  ;;  %v5497_v53 = vunpack.i.h.bf16 %v5495_v50 }
 0x2ab   : >> { %v5506_v62 = vunpack.i.l.bf16 %v5505_v51  ;;  %v5507_v0 = vunpack.i.h.bf16 %v5505_v51 }
 0x2ac   : >> { %707 = vmatpush.msra.mxu1 %v5496_v52  ;;  %5413 = vmatpush.msra.mxu2 %v5496_v52 }
 0x2ae   : >> { %708 = vmatpush.msra.mxu1 %v5497_v53  ;;  %5414 = vmatpush.msra.mxu2 %v5497_v53 }
 0x2b1   : >> { %v5500_v54 = vpop.permute.xlu0 %5499 }
 0x2b2   : >> { %v5510_v55 = vpop.permute.xlu1 %5509  ;;  %v5501_v56 = vunpack.i.l.bf16 %v5500_v54  ;;  %v5502_v60 = vunpack.i.h.bf16 %v5500_v54 }
 0x2b3   : >> { %v5511_v58 = vunpack.i.l.bf16 %v5510_v55  ;;  %v5512_v59 = vunpack.i.h.bf16 %v5510_v55 }
 0x2b4   : >> { %709 = vmatpush.msra.mxu1 %v5501_v56  ;;  %5415 = vmatpush.msra.mxu2 %v5501_v56 }
 0x2b5   : >> { %658 = vmatpush.msra.mxu0 %v5511_v58  ;;  %5397 = vmatpush.msra.mxu3 %v5511_v58 }
 0x2b6   : >> { %710 = vmatpush.msra.mxu1 %v5502_v60  ;;  %5416 = vmatpush.msra.mxu2 %v5502_v60 }
 0x2b7   : >> { %659 = vmatpush.msra.mxu0 %v5512_v59  ;;  %5398 = vmatpush.msra.mxu3 %v5512_v59 }
 0x2b8   : >> { %711 = vmatpush.msra.mxu1 %v5506_v62  ;;  %5417 = vmatpush.msra.mxu2 %v5506_v62  ;;  %v768_v62 = vld [vmem:[%s8776_s7] sm:$0xff] }
 0x2b9   : >> { %660 = vmatpush.msra.mxu0 %v5521_v61  ;;  %5399 = vmatpush.msra.mxu3 %v5521_v61  ;;  %v5525_v1 = vpop.permute.xlu0 %5524 }
 0x2ba   : >> { %712 = vmatpush.msra.mxu1 %v5507_v0  ;;  %5418 = vmatpush.msra.mxu2 %v5507_v0  ;;  %v5526_v2 = vunpack.i.l.bf16 %v5525_v1  ;;  %v5530_v4 = vpop.permute.xlu1 %5529  ;;  %v5527_v5 = vunpack.i.h.bf16 %v5525_v1 }
 0x2bb   : >> { %661 = vmatpush.msra.mxu0 %v5522_v63  ;;  %5400 = vmatpush.msra.mxu3 %v5522_v63  ;;  %v5531_v8 = vunpack.i.l.bf16 %v5530_v4  ;;  %v5532_v9 = vunpack.i.h.bf16 %v5530_v4 }
 0x2bc   : >> { %713 = vmatpush.msra.mxu1 %v5516_v3  ;;  %5419 = vmatpush.msra.mxu2 %v5516_v3 }
 0x2bd   : >> { %662 = vmatpush.msra.mxu0 %v5526_v2  ;;  %5401 = vmatpush.msra.mxu3 %v5526_v2 }
 0x2be   : >> { %714 = vmatpush.msra.mxu1 %v5517_v6  ;;  %5420 = vmatpush.msra.mxu2 %v5517_v6 }
 0x2bf   : >> { %663 = vmatpush.msra.mxu0 %v5527_v5  ;;  %5402 = vmatpush.msra.mxu3 %v5527_v5 }
 0x2c0   : >> { %5302 = vmatmul.msk.f32.vlgmr.msra.gmra.mxu1 %vm633_vm4, %v618_v7  ;;  %5308 = vmatmul.msk.f32.vlgmr.msra.gmra.mxu2 %vm633_vm4, %v630_v10 }
 0x2c1   : >> { %664 = vmatpush.msra.mxu0 %v5531_v8  ;;  %5403 = vmatpush.msra.mxu3 %v5531_v8 }
 0x2c2   : >> { %5310 = vmatpush.msk.msrb.mxu2 %vm787_vm5, %v773_v30 }
 0x2c3   : >> { %665 = vmatpush.msra.mxu0 %v5532_v9  ;;  %5404 = vmatpush.msra.mxu3 %v5532_v9 }
 0x2c4   : >> { %802 = vmatpush.msrb.mxu2 %v772_v31 }
 0x2c5   : >> { %666 = vmatpush.msra.mxu0 %v6825_v38  ;;  %5405 = vmatpush.msra.mxu3 %v6825_v38 }
 0x2c6   : >> { %803 = vmatpush.msrb.mxu2 %v771_v33 }
 0x2c7   : >> { %667 = vmatpush.msra.mxu0 %v6823_v37  ;;  %5406 = vmatpush.msra.mxu3 %v6823_v37 }
 0x2c8   : >> { %5303 = vmatmul.msk.f32.gmra.mxu1 %vm633_vm4, %v620_v11  ;;  %5309 = vmatmul.msk.f32.gmra.mxu2 %vm633_vm4, %v632_v12 }
 0x2c9   : >> { %668 = vmatpush.msra.mxu0 %v6843_v47  ;;  %5407 = vmatpush.msra.mxu3 %v6843_v47 }
 0x2ca   : >> { %804 = vmatpush.msrb.mxu2 %v770_v35 }
 0x2cb   : >> { %669 = vmatpush.msra.mxu0 %v6841_v46  ;;  %5408 = vmatpush.msra.mxu3 %v6841_v46 }
 0x2cc   : >> { %805 = vmatpush.msrb.mxu2 %v769_v36 }
 0x2cd   : >> { %670 = vmatpush.msra.mxu0 %v6831_v41  ;;  %5409 = vmatpush.msra.mxu3 %v6831_v41 }
 0x2ce   : >> { %806 = vmatpush.msrb.mxu2 %v768_v62 }
 0x2cf   : >> { %671 = vmatpush.msra.mxu0 %v6827_v39  ;;  %5410 = vmatpush.msra.mxu3 %v6827_v39 }
 0x2d0   : >> { %5304 = vmatmul.msk.f32.gmra.mxu1 %vm633_vm4, %v622_v13 }
 0x2d1   : >> { %672 = vmatpush.msra.mxu0 %v6837_v44  ;;  %5411 = vmatpush.msra.mxu3 %v6837_v44 }
 0x2d3   : >> { %673 = vmatpush.msra.mxu0 %v6835_v43  ;;  %5412 = vmatpush.msra.mxu3 %v6835_v43 }
 0x2d4   : >> { %674 = vmatmul.f32.vlgmr.msra.gmra.mxu0 %v617_v14  ;;  %686 = vmatmul.f32.vlgmr.msra.gmra.mxu3 %v625_v15 }
 0x2d8   : >> { %5305 = vmatmul.msk.f32.gmra.mxu1 %vm633_vm4, %v624_v16 }
 0x2dc   : >> { %677 = vmatmul.f32.gmra.mxu0 %v619_v17  ;;  %689 = vmatmul.f32.gmra.mxu3 %v627_v18 }
 0x2e0   : >> { %5306 = vmatmul.msk.f32.gmra.mxu1 %vm633_vm4, %v626_v19 }
 0x2e4   : >> { %680 = vmatmul.f32.gmra.mxu0 %v621_v20  ;;  %692 = vmatmul.f32.gmra.mxu3 %v629_v21 }
 0x2e8   : >> { %5307 = vmatmul.msk.f32.gmra.mxu1 %vm633_vm4, %v628_v22 }
 0x2ec   : >> { %683 = vmatmul.f32.gmra.mxu0 %v623_v23  ;;  %695 = vmatmul.f32.gmra.mxu3 %v631_v24 }
 0x33d   : >> { %v716_v25 = vpop.f32.mrf.mxu1 }
 0x343   : >> { %v734_v44 = vpop.f32.mrf.mxu2 }
 0x345   : >> { %v719_v26 = vpop.f32.mrf.mxu1 }
 0x34b   : >> { %v737_v56 = vpop.f32.mrf.mxu2 }
 0x34d   : >> { %v722_v27 = vpop.f32.mrf.mxu1 }
 0x351   : >> { %v675_v28 = vpop.f32.mrf.mxu0 }
 0x352   : >> { %v717_v38 = vadd.f32 %v716_v25, %v675_v28 }
 0x355   : >> { %v725_v29 = vpop.f32.mrf.mxu1 }
 0x357   : >> { %v687_v32 = vpop.f32.mrf.mxu3 }
 0x359   : >> { %v678_v34 = vpop.f32.mrf.mxu0 }
 0x35a   : >> { %v720_v46 = vadd.f32 %v719_v26, %v678_v34 }
 0x35d   : >> { %v728_v37 = vpop.f32.mrf.mxu1 }
 0x35e   : >> { %v729_v39 = vadd.f32 %v728_v37, %v687_v32 }
 0x35f   : >> { %v690_v40 = vpop.f32.mrf.mxu3 }
 0x360   : >> { %v740_v41 = vmax.f32 %v717_v38, %v729_v39 }
 0x361   : >> { %v681_v43 = vpop.f32.mrf.mxu0 }
 0x362   : >> { %v744_v42 = vmax.f32 %v740_v41, 0.0  ;;  %v723_v49 = vadd.f32 %v722_v27, %v681_v43 }
 0x364   : >> { %752 = vrot.lane.b32.xlu2 %v744_v42, %s6633_s25 }
 0x365   : >> { %v731_v45 = vpop.f32.mrf.mxu1 }
 0x366   : >> { %v732_v47 = vadd.f32 %v731_v45, %v690_v40 }
 0x367   : >> { %v693_v48 = vpop.f32.mrf.mxu3 }
 0x368   : >> { %v741_v50 = vmax.f32 %v720_v46, %v732_v47  ;;  %v735_v51 = vadd.f32 %v734_v44, %v693_v48 }
 0x369   : >> { %v684_v55 = vpop.f32.mrf.mxu0 }
 0x36a   : >> { %v745_v52 = vmax.f32 %v741_v50, 0.0  ;;  %v742_v53 = vmax.f32 %v723_v49, %v735_v51  ;;  %v726_v58 = vadd.f32 %v725_v29, %v684_v55  ;;  %v6967_v51 = vld [vmem:[#allocation8] sm:$0xff] (%p547_p8) }
 0x36c   : >> { %v746_v54 = vmax.f32 %v742_v53, 0.0  ;;  %754 = vrot.lane.b32.xlu0 %v745_v52, %s6633_s25 }
 0x36e   : >> { %756 = vrot.lane.b32.xlu1 %v746_v54, %s6633_s25 }
 0x36f   : >> { %v696_v57 = vpop.f32.mrf.mxu3 }
 0x370   : >> { %v738_v59 = vadd.f32 %v737_v56, %v696_v57 }
 0x372   : >> { %v743_v60 = vmax.f32 %v726_v58, %v738_v59 }
 0x374   : >> { %v747_v61 = vmax.f32 %v743_v60, 0.0 }
 0x376   : >> { %758 = vrot.lane.b32.xlu2 %v747_v61, %s6633_s25 }
 0x3be   : >> { %v753_v63 = vpop.permute.xlu2 %752 }
 0x3bf   : >> { %v764_v0 = vmax.f32 %v744_v42, %v753_v63 }
 0x3c1   : >> { %5311 = vmatmul.msk.f32.vlgmr.msrb.gmra.mxu2 %vm774_vm6, %v764_v0 }
 0x3d0   : >> { %v759_v5 = vpop.permute.xlu2 %758 }
 0x3d1   : >> { %v767_v6 = vmax.f32 %v747_v61, %v759_v5  ;;  %v6970_v61 = vld [vmem:[#allocation8 + $0x18] sm:$0xff] (%p547_p8) }
 0x3de   : >> { %v755_v1 = vpop.permute.xlu0 %754 }
 0x3df   : >> { %v765_v2 = vmax.f32 %v745_v52, %v755_v1 }
 0x3e0   : >> { %v757_v3 = vpop.permute.xlu1 %756 }
 0x3e1   : >> { %5312 = vmatmul.msk.f32.gmra.mxu2 %vm774_vm6, %v765_v2  ;;  %v766_v4 = vmax.f32 %v746_v54, %v757_v3 }
 0x3e9   : >> { %5313 = vmatmul.msk.f32.gmra.mxu2 %vm774_vm6, %v766_v4 }
 0x3f1   : >> { %5314 = vmatmul.msk.f32.gmra.mxu2 %vm774_vm6, %v767_v6 }
 0x444   : >> { %v808_v7 = vpop.f32.mrf.mxu2 }
 0x445   : >> { %822 = vst.msk [vmem:[%s820_s26] sm:$0xff] %vm821_vm7, %v808_v7 }
 0x464   : >> { %v811_v8 = vpop.f32.mrf.mxu2 }
 0x465   : >> { %823 = vst.msk [vmem:[%s820_s26 + $0x8] sm:$0xff] %vm821_vm7, %v811_v8  ;;  %v6973_v8 = vld [vmem:[#allocation8 + $0x30] sm:$0xff] (%p547_p8) }
 0x46c   : >> { %v814_v9 = vpop.f32.mrf.mxu2 }
 0x46d   : >> { %824 = vst.msk [vmem:[%s820_s26 + $0x10] sm:$0xff] %vm821_vm7, %v814_v9 }
 0x471   : > { %549 = sbr.rel (!%p547_p8) target bundleno = 558 (0x22e), region = 152 }
 0x474   : >> { %v817_v10 = vpop.f32.mrf.mxu2 }
 0x475   : >> { %825 = vst.msk [vmem:[%s820_s26 + $0x18] sm:$0xff] %vm821_vm7, %v817_v10 }
 0x47c   : > { %v6903_v11 = vld [vmem:[#allocation3 + $0x70] sm:$0xff]  ;;  %v6905_v12 = vld [vmem:[#allocation3 + $0x78] sm:$0xff]  ;;  %v6907_v13 = vld [vmem:[#allocation3 + $0x60] sm:$0xff] }
 0x47d   : > { %v6911_v14 = vpack.i.bf16 %v6903_v11, %v6905_v12  ;;  %v6913_v15 = vld [vmem:[#allocation3 + $0x68] sm:$0xff]  ;;  %978 = vmatpush.msra.mxu0 %v6905_v12  ;;  %v6922_v17 = vld [vmem:[#allocation3 + $0x50] sm:$0xff]  ;;  %v6924_v18 = vld [vmem:[#allocation3 + $0x58] sm:$0xff] }
 0x47e   : > { %v6918_v16 = vpack.i.bf16 %v6907_v13, %v6913_v15  ;;  %v6931_v19 = vpack.i.bf16 %v6922_v17, %v6924_v18  ;;  %v6943_v20 = vld [vmem:[#allocation3 + $0x40] sm:$0xff]  ;;  %v6945_v21 = vld [vmem:[#allocation3 + $0x48] sm:$0xff]  ;;  %v833_v23 = vld [vmem:[#allocation3 + $0x38] sm:$0xff] }
 0x47f   : > { %5534 = vrot.lane.b32.xlu0 %v6911_v14, %s6634_s14  ;;  %979 = vmatpush.msra.mxu0 %v6903_v11  ;;  %v6952_v22 = vpack.i.bf16 %v6943_v20, %v6945_v21  ;;  %v832_v24 = vld [vmem:[#allocation3 + $0x30] sm:$0xff]  ;;  %v831_v26 = vld [vmem:[#allocation3 + $0x28] sm:$0xff]  ;;  %v830_v27 = vld [vmem:[#allocation3 + $0x20] sm:$0xff] }
 0x480   : > { %5544 = vrot.lane.b32.xlu1 %v6918_v16, %s6634_s14  ;;  %5554 = vrot.lane.b32.xlu2 %v6931_v19, %s6634_s14  ;;  %v5573_v25 = vpack.i.bf16 %v832_v24, %v833_v23  ;;  %v5583_v28 = vpack.i.bf16 %v830_v27, %v831_v26  ;;  %v829_v29 = vld [vmem:[#allocation3 + $0x18] sm:$0xff]  ;;  %v828_v30 = vld [vmem:[#allocation3 + $0x10] sm:$0xff]  ;;  %v827_v31 = vld [vmem:[#allocation3 + $0x8] sm:$0xff] }
 0x481   : > { %980 = vmatpush.msra.mxu0 %v6913_v15  ;;  %v826_v32 = vld [vmem:[#allocation3] sm:$0xff]  ;;  %v5593_v33 = vpack.i.bf16 %v828_v30, %v829_v29 }
 0x482   : > { %v5603_v34 = vpack.i.bf16 %v826_v32, %v827_v31 }
 0x483   : > { %981 = vmatpush.msra.mxu0 %v6907_v13 }
 0x485   : > { %982 = vmatpush.msra.mxu0 %v6924_v18 }
 0x487   : > { %5539 = vrot.lane.b32.xlu0 %v6911_v14, %s6635_s23  ;;  %983 = vmatpush.msra.mxu0 %v6922_v17 }
 0x488   : > { %5549 = vrot.lane.b32.xlu1 %v6918_v16, %s6635_s23  ;;  %5559 = vrot.lane.b32.xlu2 %v6931_v19, %s6635_s23 }
 0x489   : > { %984 = vmatpush.msra.mxu0 %v6945_v21 }
 0x48b   : > { %985 = vmatpush.msra.mxu0 %v6943_v20 }
 0x48d   : > { %986 = vmatpush.msra.mxu0 %v833_v23 }
 0x48f   : > { %5564 = vrot.lane.b32.xlu0 %v6952_v22, %s6634_s14  ;;  %987 = vmatpush.msra.mxu0 %v832_v24 }
 0x490   : > { %5569 = vrot.lane.b32.xlu1 %v6952_v22, %s6635_s23  ;;  %5574 = vrot.lane.b32.xlu2 %v5573_v25, %s6634_s14 }
 0x491   : > { %988 = vmatpush.msra.mxu0 %v831_v26 }
 0x493   : > { %989 = vmatpush.msra.mxu0 %v830_v27 }
 0x495   : > { %990 = vmatpush.msra.mxu0 %v829_v29 }
 0x497   : > { %5579 = vrot.lane.b32.xlu0 %v5573_v25, %s6635_s23  ;;  %991 = vmatpush.msra.mxu0 %v828_v30  ;;  %v6976_v30 = vld [vmem:[#allocation8 + $0x48] sm:$0xff] }
 0x498   : > { %5584 = vrot.lane.b32.xlu1 %v5583_v28, %s6634_s14  ;;  %5589 = vrot.lane.b32.xlu2 %v5583_v28, %s6635_s23 }
 0x499   : > { %992 = vmatpush.msra.mxu0 %v827_v31 }
 0x49b   : > { %993 = vmatpush.msra.mxu0 %v826_v32  ;;  %v6979_v32 = vld [vmem:[#allocation8 + $0x10] sm:$0xff] }
 0x49c   : > { %994 = vmatmul.f32.vlgmr.msra.gmra.mxu0 %v6967_v51 }
 0x49f   : > { %5594 = vrot.lane.b32.xlu0 %v5593_v33, %s6634_s14 }
 0x4a0   : > { %5599 = vrot.lane.b32.xlu1 %v5593_v33, %s6635_s23  ;;  %5604 = vrot.lane.b32.xlu2 %v5603_v34, %s6634_s14 }
 0x4a4   : > { %997 = vmatmul.f32.gmra.mxu0 %v6970_v61 }
 0x4a7   : > { %5609 = vrot.lane.b32.xlu0 %v5603_v34, %s6635_s23 }
 0x4ac   : > { %1000 = vmatmul.f32.gmra.mxu0 %v6973_v8 }
 0x4b4   : > { %1003 = vmatmul.f32.gmra.mxu0 %v6976_v30 }
 0x4da   : > { %v5555_v35 = vpop.permute.xlu2 %5554 }
 0x4db   : > { %v5556_v46 = vunpack.i.l.bf16 %v5555_v35  ;;  %v5557_v48 = vunpack.i.h.bf16 %v5555_v35 }
 0x4e2   : > { %v5560_v39 = vpop.permute.xlu2 %5559 }
 0x4e3   : > { %v5561_v55 = vunpack.i.l.bf16 %v5560_v39  ;;  %v5562_v57 = vunpack.i.h.bf16 %v5560_v39  ;;  %v6991_v39 = vld [vmem:[#allocation8 + $0x20] sm:$0xff] }
 0x4ea   : > { %v5575_v50 = vpop.permute.xlu2 %5574 }
 0x4eb   : > { %v5576_v60 = vunpack.i.l.bf16 %v5575_v50  ;;  %v5577_v0 = vunpack.i.h.bf16 %v5575_v50  ;;  %v7024_v50 = vld [vmem:[#allocation8 + $0x80] sm:$0xff] }
 0x4f1   : > { %v5535_v36 = vpop.permute.xlu0 %5534 }
 0x4f2   : > { %v5545_v37 = vpop.permute.xlu1 %5544  ;;  %v5536_v38 = vunpack.i.l.bf16 %v5535_v36  ;;  %v5537_v40 = vunpack.i.h.bf16 %v5535_v36  ;;  %v5590_v62 = vpop.permute.xlu2 %5589  ;;  %v6982_v36 = vld [vmem:[#allocation8 + $0x8] sm:$0xff] }
 0x4f3   : > { %v5546_v41 = vunpack.i.l.bf16 %v5545_v37  ;;  %v5547_v42 = vunpack.i.h.bf16 %v5545_v37  ;;  %v5591_v7 = vunpack.i.l.bf16 %v5590_v62  ;;  %v5592_v9 = vunpack.i.h.bf16 %v5590_v62  ;;  %v6984_v37 = vld [vmem:[#allocation8 + $0x60] sm:$0xff] }
 0x4f4   : > { %1060 = vmatpush.msra.mxu2 %v5536_v38  ;;  %1006 = vmatmul.f32.gmra.mxu0 %v6984_v37  ;;  %v6988_v38 = vld [vmem:[#allocation8 + $0x28] sm:$0xff]  ;;  %v7051_v62 = vld [vmem:[#allocation3 + $0xa0] sm:$0xff] }
 0x4f6   : > { %1061 = vmatpush.msra.mxu2 %v5537_v40  ;;  %v6993_v40 = vld [vmem:[#allocation8 + $0x78] sm:$0xff] }
 0x4f8   : > { %1062 = vmatpush.msra.mxu2 %v5546_v41  ;;  %v6997_v41 = vld [vmem:[#allocation8 + $0x40] sm:$0xff] }
 0x4f9   : > { %v5540_v43 = vpop.permute.xlu0 %5539 }
 0x4fa   : > { %1063 = vmatpush.msra.mxu2 %v5547_v42  ;;  %v5550_v44 = vpop.permute.xlu1 %5549  ;;  %v5541_v45 = vunpack.i.l.bf16 %v5540_v43  ;;  %v5542_v47 = vunpack.i.h.bf16 %v5540_v43  ;;  %v5605_v23 = vpop.permute.xlu2 %5604  ;;  %v7000_v42 = vld [vmem:[#allocation8 + $0x38] sm:$0xff]  ;;  %v7002_v43 = vld [vmem:[#allocation8 + $0x90] sm:$0xff] }
 0x4fb   : > { %v5551_v49 = vunpack.i.l.bf16 %v5550_v44  ;;  %v5552_v52 = vunpack.i.h.bf16 %v5550_v44  ;;  %v5606_v29 = vunpack.i.l.bf16 %v5605_v23  ;;  %v5607_v31 = vunpack.i.h.bf16 %v5605_v23  ;;  %v7006_v44 = vld [vmem:[#allocation8 + $0x58] sm:$0xff] }
 0x4fc   : > { %1019 = vmatpush.msra.mxu1 %v5541_v45  ;;  %1064 = vmatpush.msra.mxu2 %v5556_v46  ;;  %v7009_v45 = vld [vmem:[#allocation8 + $0x50] sm:$0xff]  ;;  %v7011_v46 = vld [vmem:[#allocation8 + $0xa8] sm:$0xff] }
 0x4fd   : > { %1009 = vmatmul.f32.gmra.mxu0 %v6993_v40  ;;  %8849 = vst [vmem:[#allocation13_spill] sm:$0xff] %v7011_v46 }
 0x4fe   : > { %1020 = vmatpush.msra.mxu1 %v5542_v47  ;;  %1065 = vmatpush.msra.mxu2 %v5557_v48  ;;  %v7015_v47 = vld [vmem:[#allocation8 + $0x70] sm:$0xff]  ;;  %v7018_v48 = vld [vmem:[#allocation8 + $0x68] sm:$0xff] }
 0x500   : > { %1021 = vmatpush.msra.mxu1 %v5551_v49  ;;  %v7021_v49 = vld [vmem:[#allocation8 + $0x88] sm:$0xff] }
 0x501   : > { %v5565_v53 = vpop.permute.xlu0 %5564  ;;  %8850 = vst [vmem:[#allocation14_spill] sm:$0xff] %v7021_v49 }
 0x502   : > { %1022 = vmatpush.msra.mxu1 %v5552_v52  ;;  %v5570_v54 = vpop.permute.xlu1 %5569  ;;  %v5566_v56 = vunpack.i.l.bf16 %v5565_v53  ;;  %v5567_v58 = vunpack.i.h.bf16 %v5565_v53  ;;  %v7027_v52 = vld [vmem:[#allocation8 + $0xa0] sm:$0xff]  ;;  %v7030_v53 = vld [vmem:[#allocation8 + $0x98] sm:$0xff] }
 0x503   : > { %v5571_v59 = vunpack.i.l.bf16 %v5570_v54  ;;  %v5572_v63 = vunpack.i.h.bf16 %v5570_v54  ;;  %8851 = vst [vmem:[#allocation15_spill] sm:$0xff] %v7027_v52  ;;  %v7033_v54 = vld [vmem:[#allocation8 + $0xb8] sm:$0xff] }
 0x504   : > { %1023 = vmatpush.msra.mxu1 %v5561_v55  ;;  %1066 = vmatpush.msra.mxu2 %v5566_v56  ;;  %8852 = vst [vmem:[#allocation16_spill] sm:$0xff] %v7030_v53  ;;  %v7036_v55 = vld [vmem:[#allocation8 + $0xb0] sm:$0xff] }
 0x505   : > { %1012 = vmatmul.f32.gmra.mxu0 %v7002_v43  ;;  %8853 = vst [vmem:[#allocation17_spill] sm:$0xff] %v7033_v54 }
 0x506   : > { %1024 = vmatpush.msra.mxu1 %v5562_v57  ;;  %1067 = vmatpush.msra.mxu2 %v5567_v58  ;;  %8854 = vst [vmem:[#allocation18_spill] sm:$0xff] %v7036_v55  ;;  %v7039_v58 = vld [vmem:[#allocation3 + $0xb0] sm:$0xff] }
 0x508   : > { %1025 = vmatpush.msra.mxu1 %v5571_v59  ;;  %1068 = vmatpush.msra.mxu2 %v5576_v60  ;;  %v7041_v59 = vld [vmem:[#allocation3 + $0xb8] sm:$0xff] }
 0x509   : > { %v5580_v1 = vpop.permute.xlu0 %5579  ;;  %v7045_v60 = vpack.i.bf16 %v7039_v58, %v7041_v59 }
 0x50a   : > { %1026 = vmatpush.msra.mxu1 %v5572_v63  ;;  %1069 = vmatpush.msra.mxu2 %v5577_v0  ;;  %v5585_v2 = vpop.permute.xlu1 %5584  ;;  %v5581_v3 = vunpack.i.l.bf16 %v5580_v1  ;;  %v5582_v6 = vunpack.i.h.bf16 %v5580_v1  ;;  %v7053_v63 = vld [vmem:[#allocation3 + $0xa8] sm:$0xff] }
 0x50b   : > { %v5586_v4 = vunpack.i.l.bf16 %v5585_v2  ;;  %v5587_v5 = vunpack.i.h.bf16 %v5585_v2  ;;  %8855 = vst [vmem:[#allocation19_spill] sm:$0xff] %v7045_v60  ;;  %5614 = vrot.lane.b32.xlu0 %v7045_v60, %s6635_s23  ;;  %5619 = vrot.lane.b32.xlu1 %v7045_v60, %s6634_s14  ;;  %v7057_v0 = vpack.i.bf16 %v7051_v62, %v7053_v63 }
 0x50c   : > { %1027 = vmatpush.msra.mxu1 %v5581_v3 }
 0x50d   : > { %1070 = vmatpush.msra.mxu2 %v5586_v4  ;;  %1015 = vmatmul.f32.gmra.mxu0 %v7011_v46  ;;  %8856 = vst [vmem:[#allocation20_spill] sm:$0xff] %v7057_v0  ;;  %v7061_v4 = vld [vmem:[#allocation3 + $0x90] sm:$0xff]  ;;  %v7079_v46 = vld [vmem:[#allocation3 + $0x80] sm:$0xff] }
 0x50e   : > { %1028 = vmatpush.msra.mxu1 %v5582_v6  ;;  %5624 = vrot.lane.b32.xlu2 %v7057_v0, %s6635_s23 }
 0x50f   : > { %1071 = vmatpush.msra.mxu2 %v5587_v5  ;;  %v7063_v5 = vld [vmem:[#allocation3 + $0x98] sm:$0xff] }
 0x510   : > { %1029 = vmatpush.msra.mxu1 %v5591_v7  ;;  %v7069_v6 = vpack.i.bf16 %v7061_v4, %v7063_v5 }
 0x511   : > { %v5595_v10 = vpop.permute.xlu0 %5594 }
 0x512   : > { %1030 = vmatpush.msra.mxu1 %v5592_v9  ;;  %v5600_v24 = vpop.permute.xlu1 %5599  ;;  %v5596_v25 = vunpack.i.l.bf16 %v5595_v10  ;;  %v5597_v28 = vunpack.i.h.bf16 %v5595_v10  ;;  %8857 = vst [vmem:[#allocation21_spill] sm:$0xff] %v7069_v6 }
 0x513   : > { %v5601_v26 = vunpack.i.l.bf16 %v5600_v24  ;;  %v5602_v27 = vunpack.i.h.bf16 %v5600_v24  ;;  %5629 = vrot.lane.b32.xlu0 %v7057_v0, %s6634_s14 }
 0x514   : > { %1072 = vmatpush.msra.mxu2 %v5596_v25 }
 0x515   : > { %1031 = vmatpush.msra.mxu1 %v5601_v26 }
 0x516   : > { %1073 = vmatpush.msra.mxu2 %v5597_v28  ;;  %5634 = vrot.lane.b32.xlu2 %v7069_v6, %s6635_s23 }
 0x517   : > { %1032 = vmatpush.msra.mxu1 %v5602_v27 }
 0x518   : > { %1074 = vmatpush.msra.mxu2 %v5606_v29 }
 0x519   : > { %v5610_v33 = vpop.permute.xlu0 %5609  ;;  %v995_v56 = vpop.f32.mrf.mxu0 }
 0x51a   : > { %1075 = vmatpush.msra.mxu2 %v5607_v31  ;;  %v5611_v34 = vunpack.i.l.bf16 %v5610_v33  ;;  %v5612_v35 = vunpack.i.h.bf16 %v5610_v33 }
 0x51b   : > { %1076 = vmatmul.f32.vlgmr.msra.gmra.mxu2 %v6979_v32  ;;  %5639 = vrot.lane.b32.xlu0 %v7069_v6, %s6634_s14 }
 0x51c   : > { %1033 = vmatpush.msra.mxu1 %v5611_v34 }
 0x51e   : > { %1034 = vmatpush.msra.mxu1 %v5612_v35 }
 0x51f   : > { %1035 = vmatmul.f32.vlgmr.msra.gmra.mxu1 %v6982_v36 }
 0x521   : > { %v998_v57 = vpop.f32.mrf.mxu0 }
 0x523   : > { %1079 = vmatmul.f32.gmra.mxu2 %v6988_v38 }
 0x527   : > { %1038 = vmatmul.f32.gmra.mxu1 %v6991_v39 }
 0x529   : > { %v1001_v3 = vpop.f32.mrf.mxu0 }
 0x52b   : > { %1082 = vmatmul.f32.gmra.mxu2 %v6997_v41 }
 0x52f   : > { %1041 = vmatmul.f32.gmra.mxu1 %v7000_v42 }
 0x531   : > { %v1004_v10 = vpop.f32.mrf.mxu0 }
 0x533   : > { %1085 = vmatmul.f32.gmra.mxu2 %v7006_v44 }
 0x537   : > { %1044 = vmatmul.f32.gmra.mxu1 %v7009_v45 }
 0x53b   : > { %1088 = vmatmul.f32.gmra.mxu2 %v7015_v47 }
 0x53f   : > { %1047 = vmatmul.f32.gmra.mxu1 %v7018_v48 }
 0x543   : > { %1091 = vmatmul.f32.gmra.mxu2 %v7021_v49  ;;  %v7081_v49 = vld [vmem:[#allocation3 + $0x88] sm:$0xff] }
 0x547   : > { %1050 = vmatmul.f32.gmra.mxu1 %v7024_v50 }
 0x54b   : > { %1094 = vmatmul.f32.gmra.mxu2 %v7027_v52 }
 0x54f   : > { %1053 = vmatmul.f32.gmra.mxu1 %v7030_v53 }
 0x553   : > { %1097 = vmatmul.f32.gmra.mxu2 %v7033_v54 }
 0x557   : > { %1056 = vmatmul.f32.gmra.mxu1 %v7036_v55 }
 0x571   : > { %v1007_v26 = vpop.f32.mrf.mxu0 }
 0x57a   : > { %v1010_v34 = vpop.f32.mrf.mxu0 }
 0x59c   : > { %v1036_v1 = vpop.f32.mrf.mxu1 }
 0x59d   : > { %v1037_v28 = vadd.f32 %v1036_v1, %v995_v56 }
 0x59e   : > { %v1077_v2 = vpop.f32.mrf.mxu2 }
 0x59f   : > { %v1078_v35 = vadd.f32 %v1077_v2, %v1037_v28 }
 0x5a4   : > { %v1039_v7 = vpop.f32.mrf.mxu1 }
 0x5a5   : > { %v1040_v54 = vadd.f32 %v1039_v7, %v998_v57 }
 0x5a6   : > { %v1080_v9 = vpop.f32.mrf.mxu2 }
 0x5a7   : > { %v1081_v56 = vadd.f32 %v1080_v9, %v1040_v54 }
 0x5ac   : > { %v1042_v23 = vpop.f32.mrf.mxu1 }
 0x5ad   : > { %v1043_v57 = vadd.f32 %v1042_v23, %v1001_v3 }
 0x5ae   : > { %v1083_v24 = vpop.f32.mrf.mxu2 }
 0x5af   : > { %v1084_v54 = vadd.f32 %v1083_v24, %v1043_v57  ;;  %v5620_v24 = vpop.permute.xlu1 %5619 }
 0x5b4   : > { %v1045_v25 = vpop.f32.mrf.mxu1 }
 0x5b5   : > { %v1046_v28 = vadd.f32 %v1045_v25, %v1004_v10  ;;  %v5615_v10 = vpop.permute.xlu0 %5614 }
 0x5b6   : > { %v1086_v27 = vpop.f32.mrf.mxu2  ;;  %v5616_v25 = vunpack.i.l.bf16 %v5615_v10 }
 0x5b8   : > { %1377 = vmatpush.msrb.mxu0 %v5616_v25 }
 0x5bc   : > { %v1048_v29 = vpop.f32.mrf.mxu1 }
 0x5bd   : > { %v1049_v31 = vadd.f32 %v1048_v29, %v1007_v26  ;;  %v1013_v26 = vpop.f32.mrf.mxu0 }
 0x5be   : > { %v1089_v33 = vpop.f32.mrf.mxu2 }
 0x5bf   : > { %v1090_v60 = vadd.f32 %v1089_v33, %v1049_v31 }
 0x5c1   : > { %v1101_v0 = vmax.f32 %v1078_v35, %v1090_v60  ;;  %v7085_v60 = vpack.i.bf16 %v7079_v46, %v7081_v49 }
 0x5c3   : > { %v7075_v55 = vmax.f32 %v1101_v0, 0.0 }
 0x5c4   : > { %v1051_v52 = vpop.f32.mrf.mxu1 }
 0x5c5   : > { %v1052_v53 = vadd.f32 %v1051_v52, %v1010_v34  ;;  %1113 = vrot.lane.b32.xlu1 %v7075_v55, %s6635_s23  ;;  %v1016_v9 = vpop.f32.mrf.mxu0  ;;  %v1087_v34 = vadd.f32 %v1086_v27, %v1046_v28  ;;  %v5621_v27 = vunpack.i.l.bf16 %v5620_v24 }
 0x5c6   : > { %v1092_v6 = vpop.f32.mrf.mxu2 }
 0x5c7   : > { %v1093_v1 = vadd.f32 %v1092_v6, %v1052_v53  ;;  %1418 = vmatpush.msrb.mxu1 %v5621_v27 }
 0x5c9   : > { %v1102_v29 = vmax.f32 %v1081_v56, %v1093_v1 }
 0x5cb   : > { %v7087_v0 = vmax.f32 %v1102_v29, 0.0 }
 0x5cc   : > { %v1054_v52 = vpop.f32.mrf.mxu1 }
 0x5cd   : > { %v1055_v2 = vadd.f32 %v1054_v52, %v1013_v26  ;;  %5644 = vrot.lane.b32.xlu1 %v7085_v60, %s6635_s23  ;;  %1115 = vrot.lane.b32.xlu2 %v7087_v0, %s6635_s23  ;;  %v5622_v26 = vunpack.i.h.bf16 %v5620_v24  ;;  %v7132_v52 = vld [vmem:[%s8777_s8] sm:$0xff] }
 0x5ce   : > { %v1095_v7 = vpop.f32.mrf.mxu2 }
 0x5cf   : > { %v1096_v53 = vadd.f32 %v1095_v7, %v1055_v2  ;;  %1419 = vmatpush.msrb.mxu1 %v5622_v26 }
 0x5d1   : > { %v1103_v6 = vmax.f32 %v1084_v54, %v1096_v53  ;;  %v5630_v54 = vpop.permute.xlu0 %5629 }
 0x5d3   : > { %v7093_v31 = vmax.f32 %v1103_v6, 0.0  ;;  %v5631_v6 = vunpack.i.l.bf16 %v5630_v54 }
 0x5d4   : > { %v1057_v33 = vpop.f32.mrf.mxu1 }
 0x5d5   : > { %v1058_v3 = vadd.f32 %v1057_v33, %v1016_v9  ;;  %1117 = vrot.lane.b32.xlu1 %v7093_v31, %s6635_s23  ;;  %5649 = vrot.lane.b32.xlu2 %v7085_v60, %s6634_s14  ;;  %v5632_v9 = vunpack.i.h.bf16 %v5630_v54 }
 0x5d6   : > { %v1098_v23 = vpop.f32.mrf.mxu2  ;;  %1420 = vmatpush.msrb.mxu1 %v5631_v6 }
 0x5d7   : > { %v1099_v35 = vadd.f32 %v1098_v23, %v1058_v3 }
 0x5d8   : > { %1421 = vmatpush.msrb.mxu1 %v5632_v9 }
 0x5d9   : > { %v1104_v56 = vmax.f32 %v1087_v34, %v1099_v35  ;;  %v5640_v28 = vpop.permute.xlu0 %5639 }
 0x5da   : > { %v5641_v33 = vunpack.i.l.bf16 %v5640_v28  ;;  %v5642_v23 = vunpack.i.h.bf16 %v5640_v28 }
 0x5db   : > { %v7099_v1 = vmax.f32 %v1104_v56, 0.0 }
 0x5dc   : > { %1422 = vmatpush.msrb.mxu1 %v5641_v33 }
 0x5dd   : > { %5654 = vrot.lane.b32.xlu1 %v6911_v14, %s6635_s23  ;;  %1119 = vrot.lane.b32.xlu0 %v7099_v1, %s6635_s23 }
 0x5de   : > { %5659 = vrot.lane.b32.xlu2 %v6911_v14, %s6634_s14  ;;  %v1131_v14 = vld [vmem:[%s8777_s8 + $0x10] sm:$0x3]  ;;  %1423 = vmatpush.msrb.mxu1 %v5642_v23 }
 0x5df   : > { %5315 = vmatpush.msk.msra.mxu3 %vm787_vm5, %v1131_v14 }
 0x5e5   : > { %5669 = vrot.lane.b32.xlu1 %v6918_v16, %s6634_s14  ;;  %5664 = vrot.lane.b32.xlu0 %v6918_v16, %s6635_s23  ;;  %v7125_v16 = vld [vmem:[%s8777_s8 + $0x8] sm:$0xff] }
 0x5e6   : > { %5674 = vrot.lane.b32.xlu2 %v6931_v19, %s6635_s23  ;;  %1163 = vmatpush.msra.mxu3 %v7125_v16 }
 0x5e8   : > { %1164 = vmatpush.msra.mxu3 %v7132_v52 }
 0x5ea   : > { %1336 = vmatpush.msrb.mxu3 %v7041_v59 }
 0x5ec   : > { %1337 = vmatpush.msrb.mxu3 %v7039_v58 }
 0x5ed   : > { %5684 = vrot.lane.b32.xlu1 %v6952_v22, %s6635_s23  ;;  %5679 = vrot.lane.b32.xlu0 %v6931_v19, %s6634_s14  ;;  %v5617_v19 = vunpack.i.h.bf16 %v5615_v10 }
 0x5ee   : > { %5689 = vrot.lane.b32.xlu2 %v6952_v22, %s6634_s14  ;;  %v5625_v22 = vpop.permute.xlu2 %5624  ;;  %1338 = vmatpush.msrb.mxu3 %v7053_v63 }
 0x5ef   : > { %v5626_v29 = vunpack.i.l.bf16 %v5625_v22  ;;  %1378 = vmatpush.msrb.mxu0 %v5617_v19  ;;  %v5627_v57 = vunpack.i.h.bf16 %v5625_v22 }
 0x5f0   : > { %1339 = vmatpush.msrb.mxu3 %v7051_v62 }
 0x5f1   : > { %1379 = vmatpush.msrb.mxu0 %v5626_v29 }
 0x5f2   : > { %1340 = vmatpush.msrb.mxu3 %v7063_v5 }
 0x5f3   : > { %1380 = vmatpush.msrb.mxu0 %v5627_v57 }
 0x5f4   : > { %1341 = vmatpush.msrb.mxu3 %v7061_v4 }
 0x5f6   : > { %v5635_v2 = vpop.permute.xlu2 %5634  ;;  %1342 = vmatpush.msrb.mxu3 %v7081_v49 }
 0x5f7   : > { %v5636_v7 = vunpack.i.l.bf16 %v5635_v2  ;;  %v5637_v53 = vunpack.i.h.bf16 %v5635_v2 }
 0x5f8   : > { %1343 = vmatpush.msrb.mxu3 %v7079_v46 }
 0x5f9   : > { %1381 = vmatpush.msrb.mxu0 %v5636_v7 }
 0x5fa   : > { %1344 = vmatpush.msrb.mxu3 %v6905_v12 }
 0x5fb   : > { %1382 = vmatpush.msrb.mxu0 %v5637_v53 }
 0x5fc   : > { %1345 = vmatpush.msrb.mxu3 %v6903_v11 }
 0x5fe   : > { %1346 = vmatpush.msrb.mxu3 %v6913_v15 }
 0x600   : > { %1347 = vmatpush.msrb.mxu3 %v6907_v13 }
 0x602   : > { %1348 = vmatpush.msrb.mxu3 %v6924_v18 }
 0x604   : > { %1349 = vmatpush.msrb.mxu3 %v6922_v17 }
 0x606   : > { %1350 = vmatpush.msrb.mxu3 %v6945_v21 }
 0x608   : > { %1351 = vmatpush.msrb.mxu3 %v6943_v20 }
 0x627   : > { %v1116_v3 = vpop.permute.xlu2 %1115 }
 0x628   : > { %v1126_v18 = vmax.f32 %v7087_v0, %v1116_v3 }
 0x62f   : > { %v5650_v34 = vpop.permute.xlu2 %5649 }
 0x630   : > { %v5651_v35 = vunpack.i.l.bf16 %v5650_v34  ;;  %v5652_v56 = vunpack.i.h.bf16 %v5650_v34 }
 0x632   : > { %1424 = vmatpush.msrb.mxu1 %v5651_v35  ;;  %v7209_v35 = vld [vmem:[#allocation3 + $0xc0] sm:$0xff] }
 0x634   : > { %1425 = vmatpush.msrb.mxu1 %v5652_v56  ;;  %v7211_v56 = vld [vmem:[#allocation3 + $0xc8] sm:$0xff] }
 0x637   : > { %v1114_v14 = vpop.permute.xlu1 %1113 }
 0x638   : > { %v1125_v12 = vmax.f32 %v7075_v55, %v1114_v14  ;;  %v5660_v11 = vpop.permute.xlu2 %5659  ;;  %v7215_v14 = vpack.i.bf16 %v7209_v35, %v7211_v56 }
 0x639   : > { %v5661_v15 = vunpack.i.l.bf16 %v5660_v11  ;;  %v5662_v10 = vunpack.i.h.bf16 %v5660_v11  ;;  %v7219_v11 = vld [vmem:[#allocation3 + $0xe0] sm:$0xff] }
 0x63a   : > { %5316 = vmatmul.msk.f32.vlgmr.msra.gmra.mxu3 %vm1132_vm8, %v1125_v12  ;;  %5714 = vrot.lane.b32.xlu0 %v7215_v14, %s6635_s23 }
 0x63b   : > { %1426 = vmatpush.msrb.mxu1 %v5661_v15  ;;  %v7221_v15 = vld [vmem:[#allocation3 + $0xe8] sm:$0xff] }
 0x63d   : > { %1427 = vmatpush.msrb.mxu1 %v5662_v10  ;;  %v7225_v10 = vpack.i.bf16 %v7219_v11, %v7221_v15 }
 0x63f   : > { %v5645_v13 = vpop.permute.xlu1 %5644  ;;  %5699 = vrot.lane.b32.xlu2 %v7225_v10, %s6635_s23 }
 0x640   : > { %v5646_v24 = vunpack.i.l.bf16 %v5645_v13  ;;  %v5647_v17 = vunpack.i.h.bf16 %v5645_v13  ;;  %v5675_v0 = vpop.permute.xlu2 %5674 }
 0x641   : > { %v5676_v54 = vunpack.i.l.bf16 %v5675_v0 }
 0x642   : > { %5317 = vmatmul.msk.f32.gmra.mxu3 %vm1132_vm8, %v1126_v18  ;;  %1383 = vmatpush.msrb.mxu0 %v5646_v24 }
 0x644   : > { %1384 = vmatpush.msrb.mxu0 %v5647_v17 }
 0x647   : > { %v1118_v21 = vpop.permute.xlu1 %1117 }
 0x648   : > { %v1127_v55 = vmax.f32 %v7093_v31, %v1118_v21  ;;  %v5690_v53 = vpop.permute.xlu2 %5689 }
 0x649   : > { %v5691_v34 = vunpack.i.l.bf16 %v5690_v53 }
 0x64a   : > { %5318 = vmatmul.msk.f32.gmra.mxu3 %vm1132_vm8, %v1127_v55 }
 0x64f   : > { %v5655_v20 = vpop.permute.xlu1 %5654  ;;  %v1120_v25 = vpop.permute.xlu0 %1119 }
 0x650   : > { %v1128_v19 = vmax.f32 %v7099_v1, %v1120_v25  ;;  %v5656_v27 = vunpack.i.l.bf16 %v5655_v20  ;;  %v5657_v26 = vunpack.i.h.bf16 %v5655_v20  ;;  %v5677_v1 = vunpack.i.h.bf16 %v5675_v0  ;;  %v8864_v20 = vld [vmem:[#allocation20_spill] sm:$0xff] }
 0x652   : > { %5319 = vmatmul.msk.f32.gmra.mxu3 %vm1132_vm8, %v1128_v19  ;;  %1385 = vmatpush.msrb.mxu0 %v5656_v27 }
 0x654   : > { %1386 = vmatpush.msrb.mxu0 %v5657_v26 }
 0x657   : > { %v5670_v22 = vpop.permute.xlu1 %5669  ;;  %v5665_v29 = vpop.permute.xlu0 %5664 }
 0x658   : > { %v5666_v57 = vunpack.i.l.bf16 %v5665_v29  ;;  %v5671_v2 = vunpack.i.l.bf16 %v5670_v22  ;;  %v5672_v7 = vunpack.i.h.bf16 %v5670_v22  ;;  %v5667_v31 = vunpack.i.h.bf16 %v5665_v29 }
 0x65a   : > { %1387 = vmatpush.msrb.mxu0 %v5666_v57  ;;  %1428 = vmatpush.msrb.mxu1 %v5671_v2 }
 0x65b   : > { %1352 = vmatmul.f32.vlgmr.msrb.gmra.mxu3 %v6967_v51  ;;  %v5692_v51 = vunpack.i.h.bf16 %v5690_v53 }
 0x65c   : > { %1388 = vmatpush.msrb.mxu0 %v5667_v31  ;;  %1429 = vmatpush.msrb.mxu1 %v5672_v7 }
 0x65e   : > { %1389 = vmatpush.msrb.mxu0 %v5676_v54 }
 0x65f   : > { %v5685_v6 = vpop.permute.xlu1 %5684  ;;  %v5680_v9 = vpop.permute.xlu0 %5679 }
 0x660   : > { %1390 = vmatpush.msrb.mxu0 %v5677_v1  ;;  %v5686_v28 = vunpack.i.l.bf16 %v5685_v6  ;;  %v5681_v33 = vunpack.i.l.bf16 %v5680_v9  ;;  %v5687_v3 = vunpack.i.h.bf16 %v5685_v6  ;;  %v5682_v23 = vunpack.i.h.bf16 %v5680_v9 }
 0x662   : > { %1391 = vmatpush.msrb.mxu0 %v5686_v28  ;;  %1430 = vmatpush.msrb.mxu1 %v5681_v33 }
 0x663   : > { %1355 = vmatmul.f32.gmra.mxu3 %v6970_v61  ;;  %v8858_v61 = vld [vmem:[#allocation14_spill] sm:$0xff] }
 0x664   : > { %1392 = vmatpush.msrb.mxu0 %v5687_v3  ;;  %1431 = vmatpush.msrb.mxu1 %v5682_v23  ;;  %v1489_v3 = vld [vmem:[%s8777_s8 + $0x10] sm:$0x3] }
 0x665   : > { %1393 = vmatmul.f32.vlgmr.msrb.gmra.mxu0 %v6982_v36  ;;  %v8862_v36 = vld [vmem:[#allocation18_spill] sm:$0xff]  ;;  %5320 = vmatpush.msk.msrb.mxu2 %vm787_vm5, %v1489_v3  ;;  %v7301_v3 = vld [vmem:[#allocation8 + $0x30] sm:$0xff] }
 0x666   : > { %1432 = vmatpush.msrb.mxu1 %v5691_v34 }
 0x667   : > { %1519 = vmatpush.msrb.mxu2 %v7125_v16  ;;  %v8866_v16 = vld [vmem:[#allocation21_spill] sm:$0xff] }
 0x668   : > { %1433 = vmatpush.msrb.mxu1 %v5692_v51 }
 0x669   : > { %1434 = vmatmul.f32.vlgmr.msrb.gmra.mxu1 %v6979_v32  ;;  %v8861_v32 = vld [vmem:[#allocation15_spill] sm:$0xff]  ;;  %1520 = vmatpush.msrb.mxu2 %v7132_v52 }
 0x66b   : > { %1358 = vmatmul.f32.gmra.mxu3 %v6973_v8  ;;  %v8859_v8 = vld [vmem:[#allocation13_spill] sm:$0xff] }
 0x66d   : > { %1396 = vmatmul.f32.gmra.mxu0 %v6991_v39 }
 0x671   : > { %1437 = vmatmul.f32.gmra.mxu1 %v6988_v38 }
 0x673   : > { %1361 = vmatmul.f32.gmra.mxu3 %v6976_v30  ;;  %v8860_v30 = vld [vmem:[#allocation16_spill] sm:$0xff] }
 0x675   : > { %1399 = vmatmul.f32.gmra.mxu0 %v7000_v42  ;;  %v7188_v42 = vld [vmem:[#allocation3 + $0xf8] sm:$0xff] }
 0x676   : > { %1692 = vmatpush.msra.mxu3 %v7188_v42 }
 0x679   : > { %1440 = vmatmul.f32.gmra.mxu1 %v6997_v41  ;;  %v7186_v41 = vld [vmem:[#allocation3 + $0xf0] sm:$0xff] }
 0x67a   : > { %1693 = vmatpush.msra.mxu3 %v7186_v41 }
 0x67b   : > { %1364 = vmatmul.f32.gmra.mxu3 %v6984_v37  ;;  %v8863_v37 = vld [vmem:[#allocation17_spill] sm:$0xff] }
 0x67c   : > { %1694 = vmatpush.msra.mxu3 %v7221_v15 }
 0x67d   : > { %1402 = vmatmul.f32.gmra.mxu0 %v7009_v45  ;;  %v7199_v45 = vld [vmem:[#allocation3 + $0xd0] sm:$0xff] }
 0x67e   : > { %1695 = vmatpush.msra.mxu3 %v7219_v11 }
 0x681   : > { %1443 = vmatmul.f32.gmra.mxu1 %v7006_v44  ;;  %v7192_v44 = vpack.i.bf16 %v7186_v41, %v7188_v42 }
 0x683   : > { %1367 = vmatmul.f32.gmra.mxu3 %v6993_v40  ;;  %5694 = vrot.lane.b32.xlu1 %v7192_v44, %s6635_s23 }
 0x684   : > { %5709 = vrot.lane.b32.xlu2 %v7192_v44, %s6634_s14 }
 0x685   : > { %1405 = vmatmul.f32.gmra.mxu0 %v7018_v48 }
 0x689   : > { %1446 = vmatmul.f32.gmra.mxu1 %v7015_v47  ;;  %v7201_v47 = vld [vmem:[#allocation3 + $0xd8] sm:$0xff] }
 0x68a   : > { %v7205_v48 = vpack.i.bf16 %v7199_v45, %v7201_v47  ;;  %1696 = vmatpush.msra.mxu3 %v7201_v47 }
 0x68b   : > { %1370 = vmatmul.f32.gmra.mxu3 %v7002_v43 }
 0x68c   : > { %5704 = vrot.lane.b32.xlu1 %v7205_v48, %s6635_s23  ;;  %1697 = vmatpush.msra.mxu3 %v7199_v45 }
 0x68d   : > { %1408 = vmatmul.f32.gmra.mxu0 %v7024_v50  ;;  %5734 = vrot.lane.b32.xlu2 %v8864_v20, %s6635_s23 }
 0x68e   : > { %1698 = vmatpush.msra.mxu3 %v7211_v56 }
 0x690   : > { %1699 = vmatpush.msra.mxu3 %v7209_v35 }
 0x691   : > { %1449 = vmatmul.f32.gmra.mxu1 %v8858_v61 }
 0x692   : > { %1700 = vmatpush.msra.mxu3 %v7041_v59 }
 0x693   : > { %1373 = vmatmul.f32.gmra.mxu3 %v8859_v8 }
 0x694   : > { %5719 = vrot.lane.b32.xlu1 %v7225_v10, %s6634_s14  ;;  %1701 = vmatpush.msra.mxu3 %v7039_v58 }
 0x695   : > { %1411 = vmatmul.f32.gmra.mxu0 %v8860_v30 }
 0x696   : > { %1702 = vmatpush.msra.mxu3 %v7053_v63 }
 0x698   : > { %1703 = vmatpush.msra.mxu3 %v7051_v62 }
 0x699   : > { %1452 = vmatmul.f32.gmra.mxu1 %v8861_v32  ;;  %v5700_v52 = vpop.permute.xlu2 %5699 }
 0x69a   : > { %1704 = vmatpush.msra.mxu3 %v7063_v5 }
 0x69c   : > { %5729 = vrot.lane.b32.xlu1 %v7205_v48, %s6634_s14  ;;  %1705 = vmatpush.msra.mxu3 %v7061_v4 }
 0x69d   : > { %1414 = vmatmul.f32.gmra.mxu0 %v8862_v36 }
 0x69e   : > { %1706 = vmatpush.msra.mxu3 %v7081_v49 }
 0x6a0   : > { %1707 = vmatpush.msra.mxu3 %v7079_v46 }
 0x6a1   : > { %1455 = vmatmul.f32.gmra.mxu1 %v8863_v37 }
 0x6bd   : > { %v1166_v38 = vpop.f32.mrf.mxu3 }
 0x6be   : > { %1179 = vst.msk [vmem:[#allocation4] sm:$0xff] %vm1178_vm9, %v1166_v38  ;;  %v8865_v38 = vld [vmem:[#allocation19_spill] sm:$0xff] }
 0x6c5   : > { %v1169_v39 = vpop.f32.mrf.mxu3 }
 0x6c6   : > { %1180 = vst.msk [vmem:[#allocation4 + $0x8] sm:$0xff] %vm1178_vm9, %v1169_v39 }
 0x6cd   : > { %v1172_v40 = vpop.f32.mrf.mxu3 }
 0x6ce   : > { %1181 = vst.msk [vmem:[#allocation4 + $0x10] sm:$0xff] %vm1178_vm9, %v1172_v40 }
 0x6d5   : > { %v1175_v43 = vpop.f32.mrf.mxu3 }
 0x6d6   : > { %1182 = vst.msk [vmem:[#allocation4 + $0x18] sm:$0xff] %vm1178_vm9, %v1175_v43 }
 0x6de   : > { %v1353_v50 = vpop.f32.mrf.mxu3 }
 0x6e2   : > { %v1394_v12 = vpop.f32.mrf.mxu0 }
 0x6e3   : > { %v1395_v63 = vadd.f32 %v1394_v12, %v1353_v50 }
 0x6e6   : > { %v1435_v13 = vpop.f32.mrf.mxu1  ;;  %v1356_v18 = vpop.f32.mrf.mxu3 }
 0x6e7   : > { %v1436_v57 = vadd.f32 %v1435_v13, %v1395_v63  ;;  %v5710_v13 = vpop.permute.xlu2 %5709 }
 0x6ea   : > { %v1397_v24 = vpop.f32.mrf.mxu0 }
 0x6eb   : > { %v1398_v31 = vadd.f32 %v1397_v24, %v1356_v18  ;;  %v5712_v18 = vunpack.i.h.bf16 %v5710_v13  ;;  %v5711_v24 = vunpack.i.l.bf16 %v5710_v13  ;;  %v7309_v13 = vld [vmem:[#allocation8 + $0x8] sm:$0xff] }
 0x6ed   : > { %1774 = vmatpush.msra.mxu0 %v5711_v24  ;;  %v7312_v24 = vld [vmem:[#allocation8 + $0x60] sm:$0xff] }
 0x6ee   : > { %v1438_v17 = vpop.f32.mrf.mxu1  ;;  %v1359_v21 = vpop.f32.mrf.mxu3 }
 0x6ef   : > { %v1439_v4 = vadd.f32 %v1438_v17, %v1398_v31  ;;  %1775 = vmatpush.msra.mxu0 %v5712_v18  ;;  %v5735_v31 = vpop.permute.xlu2 %5734 }
 0x6f2   : > { %v1400_v55 = vpop.f32.mrf.mxu0 }
 0x6f3   : > { %v1401_v9 = vadd.f32 %v1400_v55, %v1359_v21 }
 0x6f5   : > { %v5695_v17 = vpop.permute.xlu1 %5694 }
 0x6f6   : > { %v1441_v25 = vpop.f32.mrf.mxu1  ;;  %v1362_v19 = vpop.f32.mrf.mxu3  ;;  %v5697_v21 = vunpack.i.h.bf16 %v5695_v17  ;;  %v5696_v55 = vunpack.i.l.bf16 %v5695_v17 }
 0x6f7   : > { %v1442_v34 = vadd.f32 %v1441_v25, %v1401_v9  ;;  %v5701_v25 = vunpack.i.l.bf16 %v5700_v52  ;;  %v7297_v9 = vld [vmem:[#allocation8 + $0x18] sm:$0xff] }
 0x6f8   : > { %1733 = vmatpush.msra.mxu2 %v5696_v55 }
 0x6fa   : > { %v1403_v27 = vpop.f32.mrf.mxu0  ;;  %1734 = vmatpush.msra.mxu2 %v5697_v21 }
 0x6fb   : > { %v1404_v32 = vadd.f32 %v1403_v27, %v1362_v19  ;;  %v5702_v19 = vunpack.i.h.bf16 %v5700_v52 }
 0x6fc   : > { %1735 = vmatpush.msra.mxu2 %v5701_v25 }
 0x6fe   : > { %v1444_v58 = vpop.f32.mrf.mxu1  ;;  %v1365_v59 = vpop.f32.mrf.mxu3  ;;  %1736 = vmatpush.msra.mxu2 %v5702_v19 }
 0x6ff   : > { %v1445_v40 = vadd.f32 %v1444_v58, %v1404_v32 }
 0x702   : > { %v1406_v26 = vpop.f32.mrf.mxu0 }
 0x703   : > { %v1407_v0 = vadd.f32 %v1406_v26, %v1365_v59 }
 0x706   : > { %v1447_v22 = vpop.f32.mrf.mxu1  ;;  %v1368_v29 = vpop.f32.mrf.mxu3 }
 0x707   : > { %v1448_v62 = vadd.f32 %v1447_v22, %v1407_v0 }
 0x709   : > { %v1459_v2 = vmax.f32 %v1436_v57, %v1448_v62 }
 0x70a   : > { %v1409_v7 = vpop.f32.mrf.mxu0 }
 0x70b   : > { %v1410_v5 = vadd.f32 %v1409_v7, %v1368_v29  ;;  %v7251_v54 = vmax.f32 %v1459_v2, 0.0 }
 0x70d   : > { %1471 = vrot.lane.b32.xlu0 %v7251_v54, %s6635_s23 }
 0x70e   : > { %v1450_v49 = vpop.f32.mrf.mxu1  ;;  %v1371_v46 = vpop.f32.mrf.mxu3 }
 0x70f   : > { %v1451_v1 = vadd.f32 %v1450_v49, %v1410_v5 }
 0x711   : > { %v1460_v53 = vmax.f32 %v1439_v4, %v1451_v1 }
 0x712   : > { %v1412_v6 = vpop.f32.mrf.mxu0 }
 0x713   : > { %v1413_v28 = vadd.f32 %v1412_v6, %v1371_v46  ;;  %v7255_v33 = vmax.f32 %v1460_v53, 0.0  ;;  %v7292_v46 = vld [vmem:[#allocation8] sm:$0xff] }
 0x714   : > { %1708 = vmatmul.f32.vlgmr.msra.gmra.mxu3 %v7292_v46 }
 0x715   : > { %1473 = vrot.lane.b32.xlu0 %v7255_v33, %s6635_s23 }
 0x716   : > { %v1453_v23 = vpop.f32.mrf.mxu1  ;;  %v1374_v61 = vpop.f32.mrf.mxu3 }
 0x717   : > { %v1454_v51 = vadd.f32 %v1453_v23, %v1413_v28  ;;  %v5737_v23 = vunpack.i.h.bf16 %v5735_v31 }
 0x719   : > { %v1461_v8 = vmax.f32 %v1442_v34, %v1454_v51 }
 0x71a   : > { %v1415_v30 = vpop.f32.mrf.mxu0 }
 0x71b   : > { %v1416_v36 = vadd.f32 %v1415_v30, %v1374_v61  ;;  %v7265_v37 = vmax.f32 %v1461_v8, 0.0 }
 0x71c   : > { %1711 = vmatmul.f32.gmra.mxu3 %v7297_v9 }
 0x71d   : > { %1475 = vrot.lane.b32.xlu2 %v7265_v37, %s6635_s23  ;;  %5724 = vrot.lane.b32.xlu0 %v8865_v38, %s6635_s23 }
 0x71e   : > { %v1456_v39 = vpop.f32.mrf.mxu1 }
 0x71f   : > { %v1457_v43 = vadd.f32 %v1456_v39, %v1416_v36 }
 0x721   : > { %v1462_v50 = vmax.f32 %v1445_v40, %v1457_v43 }
 0x723   : > { %v7271_v12 = vmax.f32 %v1462_v50, 0.0 }
 0x724   : > { %1714 = vmatmul.f32.gmra.mxu3 %v7301_v3 }
 0x725   : > { %1477 = vrot.lane.b32.xlu1 %v7271_v12, %s6635_s23  ;;  %5739 = vrot.lane.b32.xlu0 %v7215_v14, %s6634_s14 }
 0x726   : > { %5744 = vrot.lane.b32.xlu2 %v8866_v16, %s6635_s23 }
 0x72d   : > { %5749 = vrot.lane.b32.xlu0 %v8865_v38, %s6634_s14  ;;  %5754 = vrot.lane.b32.xlu1 %v7085_v60, %s6635_s23  ;;  %v7306_v38 = vld [vmem:[#allocation8 + $0x48] sm:$0xff] }
 0x72e   : > { %5759 = vrot.lane.b32.xlu2 %v8864_v20, %s6634_s14  ;;  %v5705_v20 = vpop.permute.xlu1 %5704  ;;  %1717 = vmatmul.f32.gmra.mxu3 %v7306_v38 }
 0x72f   : > { %v5707_v27 = vunpack.i.h.bf16 %v5705_v20  ;;  %v5706_v58 = vunpack.i.l.bf16 %v5705_v20  ;;  %v7315_v20 = vld [vmem:[#allocation8 + $0x20] sm:$0xff] }
 0x731   : > { %1737 = vmatpush.msra.mxu2 %v5706_v58  ;;  %v7318_v58 = vld [vmem:[#allocation8 + $0x10] sm:$0xff] }
 0x733   : > { %1738 = vmatpush.msra.mxu2 %v5707_v27 }
 0x735   : > { %5764 = vrot.lane.b32.xlu0 %v8866_v16, %s6634_s14  ;;  %5769 = vrot.lane.b32.xlu1 %v7085_v60, %s6634_s14  ;;  %v5715_v60 = vpop.permute.xlu0 %5714 }
 0x736   : > { %v5716_v59 = vunpack.i.l.bf16 %v5715_v60  ;;  %v5717_v26 = vunpack.i.h.bf16 %v5715_v60  ;;  %v5720_v63 = vpop.permute.xlu1 %5719  ;;  %1720 = vmatmul.f32.gmra.mxu3 %v7312_v24  ;;  %v7320_v60 = vld [vmem:[#allocation8 + $0x78] sm:$0xff] }
 0x737   : > { %v5722_v0 = vunpack.i.h.bf16 %v5720_v63  ;;  %v5721_v22 = vunpack.i.l.bf16 %v5720_v63  ;;  %v7329_v63 = vld [vmem:[#allocation8 + $0x90] sm:$0xff] }
 0x738   : > { %1739 = vmatpush.msra.mxu2 %v5716_v59  ;;  %v7324_v59 = vld [vmem:[#allocation8 + $0x38] sm:$0xff] }
 0x739   : > { %1776 = vmatpush.msra.mxu0 %v5721_v22  ;;  %v7336_v22 = vld [vmem:[#allocation8 + $0x40] sm:$0xff] }
 0x73a   : > { %1740 = vmatpush.msra.mxu2 %v5717_v26  ;;  %v7327_v26 = vld [vmem:[#allocation8 + $0x28] sm:$0xff] }
 0x73b   : > { %1777 = vmatpush.msra.mxu0 %v5722_v0  ;;  %v7333_v0 = vld [vmem:[#allocation8 + $0x50] sm:$0xff] }
 0x73e   : > { %v5730_v29 = vpop.permute.xlu1 %5729  ;;  %1723 = vmatmul.f32.gmra.mxu3 %v7320_v60 }
 0x73f   : > { %v5732_v57 = vunpack.i.h.bf16 %v5730_v29  ;;  %v5731_v62 = vunpack.i.l.bf16 %v5730_v29  ;;  %v7338_v29 = vld [vmem:[#allocation8 + $0xa8] sm:$0xff] }
 0x741   : > { %1778 = vmatpush.msra.mxu0 %v5731_v62  ;;  %v7345_v62 = vld [vmem:[#allocation8 + $0x58] sm:$0xff] }
 0x743   : > { %1779 = vmatpush.msra.mxu0 %v5732_v57  ;;  %v7342_v57 = vld [vmem:[#allocation8 + $0x68] sm:$0xff] }
 0x746   : > { %1726 = vmatmul.f32.gmra.mxu3 %v7329_v63 }
 0x74e   : > { %1729 = vmatmul.f32.gmra.mxu3 %v7338_v29 }
 0x777   : > { %v1476_v4 = vpop.permute.xlu2 %1475 }
 0x778   : > { %v1485_v53 = vmax.f32 %v7265_v37, %v1476_v4  ;;  %v7363_v4 = vld [vmem:[#allocation8 + $0xa0] sm:$0xff] }
 0x77f   : > { %v1472_v2 = vpop.permute.xlu0 %1471 }
 0x780   : > { %v1483_v7 = vmax.f32 %v7251_v54, %v1472_v2  ;;  %v5745_v28 = vpop.permute.xlu2 %5744  ;;  %v7348_v2 = vld [vmem:[#allocation8 + $0x80] sm:$0xff] }
 0x781   : > { %v5746_v61 = vunpack.i.l.bf16 %v5745_v28  ;;  %v5747_v32 = vunpack.i.h.bf16 %v5745_v28 }
 0x782   : > { %5321 = vmatmul.msk.f32.vlgmr.msrb.gmra.mxu2 %vm1132_vm8, %v1483_v7  ;;  %v7351_v7 = vld [vmem:[#allocation8 + $0x70] sm:$0xff] }
 0x787   : > { %v1474_v5 = vpop.permute.xlu0 %1473 }
 0x788   : > { %v1484_v49 = vmax.f32 %v7255_v33, %v1474_v5  ;;  %v5736_v33 = vunpack.i.l.bf16 %v5735_v31  ;;  %v5760_v37 = vpop.permute.xlu2 %5759  ;;  %v7354_v31 = vld [vmem:[#allocation8 + $0x98] sm:$0xff]  ;;  %v7357_v5 = vld [vmem:[#allocation8 + $0x88] sm:$0xff] }
 0x789   : > { %v5761_v52 = vunpack.i.l.bf16 %v5760_v37  ;;  %v5762_v18 = vunpack.i.h.bf16 %v5760_v37  ;;  %v7399_v37 = vld [vmem:[#allocation3 + $0x110] sm:$0xff] }
 0x78a   : > { %5322 = vmatmul.msk.f32.gmra.mxu2 %vm1132_vm8, %v1484_v49  ;;  %v7360_v49 = vld [vmem:[#allocation8 + $0xb0] sm:$0xff] }
 0x78f   : > { %v5725_v1 = vpop.permute.xlu0 %5724 }
 0x790   : > { %v5726_v6 = vunpack.i.l.bf16 %v5725_v1  ;;  %v5727_v54 = vunpack.i.h.bf16 %v5725_v1  ;;  %v7366_v1 = vld [vmem:[#allocation8 + $0xb8] sm:$0xff] }
 0x792   : > { %5323 = vmatmul.msk.f32.gmra.mxu2 %vm1132_vm8, %v1485_v53 }
 0x793   : > { %1741 = vmatpush.msra.mxu2 %v5726_v6 }
 0x795   : > { %1742 = vmatpush.msra.mxu2 %v5727_v54 }
 0x797   : > { %1743 = vmatpush.msra.mxu2 %v5736_v33  ;;  %v1478_v34 = vpop.permute.xlu1 %1477  ;;  %v5740_v51 = vpop.permute.xlu0 %5739 }
 0x798   : > { %v1486_v8 = vmax.f32 %v7271_v12, %v1478_v34  ;;  %v5741_v30 = vunpack.i.l.bf16 %v5740_v51  ;;  %v5742_v36 = vunpack.i.h.bf16 %v5740_v51  ;;  %v1709_v28 = vpop.f32.mrf.mxu3  ;;  %v7375_v34 = vld [vmem:[#allocation3 + $0x138] sm:$0xff] }
 0x799   : > { %1744 = vmatpush.msra.mxu2 %v5737_v23  ;;  %v7373_v23 = vld [vmem:[#allocation3 + $0x130] sm:$0xff]  ;;  %2048 = vmatpush.msrb.mxu3 %v7375_v34 }
 0x79a   : > { %5324 = vmatmul.msk.f32.gmra.mxu2 %vm1132_vm8, %v1486_v8  ;;  %1780 = vmatpush.msra.mxu0 %v5741_v30  ;;  %v7379_v51 = vpack.i.bf16 %v7373_v23, %v7375_v34  ;;  %v7384_v8 = vld [vmem:[#allocation3 + $0x128] sm:$0xff] }
 0x79b   : > { %1745 = vmatpush.msra.mxu2 %v5746_v61  ;;  %v7382_v61 = vld [vmem:[#allocation3 + $0x120] sm:$0xff]  ;;  %2049 = vmatpush.msrb.mxu3 %v7373_v23 }
 0x79c   : > { %1781 = vmatpush.msra.mxu0 %v5742_v36  ;;  %5779 = vrot.lane.b32.xlu1 %v7379_v51, %s6635_s23  ;;  %v7392_v30 = vpack.i.bf16 %v7382_v61, %v7384_v8 }
 0x79d   : > { %1746 = vmatpush.msra.mxu2 %v5747_v32  ;;  %5774 = vrot.lane.b32.xlu2 %v7379_v51, %s6634_s14 }
 0x79e   : > { %8867 = vst [vmem:[#allocation14_spill] sm:$0xff] %v7392_v30  ;;  %5789 = vrot.lane.b32.xlu0 %v7392_v30, %s6635_s23  ;;  %2050 = vmatpush.msrb.mxu3 %v7384_v8 }
 0x79f   : > { %v5750_v39 = vpop.permute.xlu0 %5749  ;;  %v5755_v40 = vpop.permute.xlu1 %5754 }
 0x7a0   : > { %v5751_v43 = vunpack.i.l.bf16 %v5750_v39  ;;  %v5757_v50 = vunpack.i.h.bf16 %v5755_v40  ;;  %v5756_v12 = vunpack.i.l.bf16 %v5755_v40  ;;  %v5752_v16 = vunpack.i.h.bf16 %v5750_v39  ;;  %v1712_v32 = vpop.f32.mrf.mxu3  ;;  %2051 = vmatpush.msrb.mxu3 %v7382_v61  ;;  %v7401_v39 = vld [vmem:[#allocation3 + $0x118] sm:$0xff] }
 0x7a1   : > { %v7407_v40 = vpack.i.bf16 %v7399_v37, %v7401_v39 }
 0x7a2   : > { %1782 = vmatpush.msra.mxu0 %v5751_v43  ;;  %1747 = vmatpush.msra.mxu2 %v5756_v12 }
 0x7a3   : > { %8868 = vst [vmem:[#allocation13_spill] sm:$0xff] %v7407_v40  ;;  %2052 = vmatpush.msrb.mxu3 %v7401_v39 }
 0x7a4   : > { %1783 = vmatpush.msra.mxu0 %v5752_v16  ;;  %1748 = vmatpush.msra.mxu2 %v5757_v50  ;;  %v7415_v16 = vld [vmem:[#allocation3 + $0x100] sm:$0xff] }
 0x7a5   : > { %1749 = vmatmul.f32.vlgmr.msra.gmra.mxu2 %v7309_v13  ;;  %5784 = vrot.lane.b32.xlu2 %v7392_v30, %s6634_s14 }
 0x7a6   : > { %1784 = vmatpush.msra.mxu0 %v5761_v52  ;;  %5799 = vrot.lane.b32.xlu0 %v7407_v40, %s6635_s23  ;;  %v7417_v52 = vld [vmem:[#allocation3 + $0x108] sm:$0xff] }
 0x7a7   : > { %v5765_v17 = vpop.permute.xlu0 %5764  ;;  %v5770_v21 = vpop.permute.xlu1 %5769  ;;  %5794 = vrot.lane.b32.xlu1 %v7407_v40, %s6634_s14  ;;  %2053 = vmatpush.msrb.mxu3 %v7399_v37 }
 0x7a8   : > { %v5766_v55 = vunpack.i.l.bf16 %v5765_v17  ;;  %1785 = vmatpush.msra.mxu0 %v5762_v18  ;;  %v5767_v25 = vunpack.i.h.bf16 %v5765_v17  ;;  %v5771_v19 = vunpack.i.l.bf16 %v5770_v21  ;;  %v5772_v27 = vunpack.i.h.bf16 %v5770_v21  ;;  %v1715_v50 = vpop.f32.mrf.mxu3 }
 0x7a9   : > { %v7421_v18 = vpack.i.bf16 %v7415_v16, %v7417_v52  ;;  %2054 = vmatpush.msrb.mxu3 %v7417_v52 }
 0x7aa   : > { %1786 = vmatpush.msra.mxu0 %v5766_v55 }
 0x7ab   : > { %8869 = vst [vmem:[#allocation16_spill] sm:$0xff] %v7421_v18  ;;  %2055 = vmatpush.msrb.mxu3 %v7415_v16 }
 0x7ac   : > { %1787 = vmatpush.msra.mxu0 %v5767_v25 }
 0x7ad   : > { %1752 = vmatmul.f32.gmra.mxu2 %v7315_v20  ;;  %5809 = vrot.lane.b32.xlu2 %v7421_v18, %s6635_s23 }
 0x7ae   : > { %1788 = vmatpush.msra.mxu0 %v5771_v19  ;;  %2056 = vmatpush.msrb.mxu3 %v7188_v42 }
 0x7af   : > { %5804 = vrot.lane.b32.xlu1 %v7421_v18, %s6634_s14 }
 0x7b0   : > { %1789 = vmatpush.msra.mxu0 %v5772_v27  ;;  %2057 = vmatpush.msrb.mxu3 %v7186_v41 }
 0x7b1   : > { %1790 = vmatmul.f32.vlgmr.msra.gmra.mxu0 %v7318_v58  ;;  %v1718_v55 = vpop.f32.mrf.mxu3 }
 0x7b2   : > { %2058 = vmatpush.msrb.mxu3 %v7221_v15 }
 0x7b4   : > { %2059 = vmatpush.msrb.mxu3 %v7219_v11 }
 0x7b5   : > { %1755 = vmatmul.f32.gmra.mxu2 %v7324_v59 }
 0x7b6   : > { %2060 = vmatpush.msrb.mxu3 %v7201_v47 }
 0x7b8   : > { %2061 = vmatpush.msrb.mxu3 %v7199_v45 }
 0x7b9   : > { %1793 = vmatmul.f32.gmra.mxu0 %v7327_v26  ;;  %v1721_v27 = vpop.f32.mrf.mxu3 }
 0x7ba   : > { %2062 = vmatpush.msrb.mxu3 %v7211_v56 }
 0x7bc   : > { %2063 = vmatpush.msrb.mxu3 %v7209_v35 }
 0x7bd   : > { %1758 = vmatmul.f32.gmra.mxu2 %v7333_v0  ;;  %2064 = vmatmul.f32.vlgmr.msrb.gmra.mxu3 %v7292_v46 }
 0x7c1   : > { %1796 = vmatmul.f32.gmra.mxu0 %v7336_v22  ;;  %v1724_v15 = vpop.f32.mrf.mxu3 }
 0x7c5   : > { %1761 = vmatmul.f32.gmra.mxu2 %v7342_v57  ;;  %2067 = vmatmul.f32.gmra.mxu3 %v7297_v9 }
 0x7c9   : > { %1799 = vmatmul.f32.gmra.mxu0 %v7345_v62  ;;  %v1727_v56 = vpop.f32.mrf.mxu3 }
 0x7cd   : > { %1764 = vmatmul.f32.gmra.mxu2 %v7348_v2  ;;  %2070 = vmatmul.f32.gmra.mxu3 %v7301_v3 }
 0x7d1   : > { %1802 = vmatmul.f32.gmra.mxu0 %v7351_v7 }
 0x7d5   : > { %1767 = vmatmul.f32.gmra.mxu2 %v7354_v31  ;;  %2073 = vmatmul.f32.gmra.mxu3 %v7306_v38 }
 0x7d9   : > { %1805 = vmatmul.f32.gmra.mxu0 %v7357_v5 }
 0x7dd   : > { %1770 = vmatmul.f32.gmra.mxu2 %v7360_v49  ;;  %2076 = vmatmul.f32.gmra.mxu3 %v7312_v24 }
 0x7e1   : > { %1808 = vmatmul.f32.gmra.mxu0 %v7363_v4 }
 0x7e5   : > { %2079 = vmatmul.f32.gmra.mxu3 %v7320_v60 }
 0x7e9   : > { %1811 = vmatmul.f32.gmra.mxu0 %v7366_v1 }
 0x7ed   : > { %2082 = vmatmul.f32.gmra.mxu3 %v7329_v63 }
 0x7f5   : > { %2085 = vmatmul.f32.gmra.mxu3 %v7338_v29 }
 0x7f7   : > { %v5775_v24 = vpop.permute.xlu2 %5774 }
 0x7f8   : > { %v5777_v60 = vunpack.i.h.bf16 %v5775_v24 }
 0x805   : > { %v1522_v53 = vpop.f32.mrf.mxu2 }
 0x806   : > { %1535 = vst.msk [vmem:[#allocation4 + $0x20] sm:$0xff] %vm1178_vm9, %v1522_v53 }
 0x80d   : > { %v1525_v6 = vpop.f32.mrf.mxu2 }
 0x80e   : > { %1536 = vst.msk [vmem:[#allocation4 + $0x28] sm:$0xff] %vm1178_vm9, %v1525_v6 }
 0x815   : > { %v1528_v54 = vpop.f32.mrf.mxu2 }
 0x816   : > { %1537 = vst.msk [vmem:[#allocation4 + $0x30] sm:$0xff] %vm1178_vm9, %v1528_v54 }
 0x81d   : > { %v1531_v33 = vpop.f32.mrf.mxu2 }
 0x81e   : > { %1538 = vst.msk [vmem:[#allocation4 + $0x38] sm:$0xff] %vm1178_vm9, %v1531_v33 }
 0x828   : > { %v1750_v36 = vpop.f32.mrf.mxu2 }
 0x829   : > { %v1751_v41 = vadd.f32 %v1750_v36, %v1709_v28 }
 0x82e   : > { %v1791_v43 = vpop.f32.mrf.mxu0 }
 0x82f   : > { %v1792_v11 = vadd.f32 %v1791_v43, %v1751_v41 }
 0x830   : > { %v1753_v12 = vpop.f32.mrf.mxu2 }
 0x831   : > { %v1754_v45 = vadd.f32 %v1753_v12, %v1712_v32  ;;  %v1845_v32 = vld [vmem:[%s8777_s8 + $0x10] sm:$0x3] }
 0x832   : > { %5325 = vmatpush.msk.msra.mxu1 %vm787_vm5, %v1845_v32 }
 0x836   : > { %v1794_v17 = vpop.f32.mrf.mxu0 }
 0x837   : > { %v1795_v46 = vadd.f32 %v1794_v17, %v1754_v45 }
 0x838   : > { %v1756_v21 = vpop.f32.mrf.mxu2 }
 0x839   : > { %v1757_v9 = vadd.f32 %v1756_v21, %v1715_v50  ;;  %v1730_v50 = vpop.f32.mrf.mxu3 }
 0x83e   : > { %v1797_v25 = vpop.f32.mrf.mxu0 }
 0x83f   : > { %v1798_v3 = vadd.f32 %v1797_v25, %v1757_v9 }
 0x840   : > { %v1759_v19 = vpop.f32.mrf.mxu2 }
 0x841   : > { %v1760_v21 = vadd.f32 %v1759_v19, %v1718_v55  ;;  %v5776_v55 = vunpack.i.l.bf16 %v5775_v24 }
 0x843   : > { %2130 = vmatpush.msrb.mxu2 %v5776_v55 }
 0x845   : > { %2131 = vmatpush.msrb.mxu2 %v5777_v60 }
 0x846   : > { %v1800_v42 = vpop.f32.mrf.mxu0 }
 0x847   : > { %v1801_v38 = vadd.f32 %v1800_v42, %v1760_v21 }
 0x848   : > { %v1762_v53 = vpop.f32.mrf.mxu2 }
 0x849   : > { %v1763_v6 = vadd.f32 %v1762_v53, %v1721_v27 }
 0x84e   : > { %v1803_v54 = vpop.f32.mrf.mxu0 }
 0x84f   : > { %v1804_v47 = vadd.f32 %v1803_v54, %v1763_v6 }
 0x850   : > { %v1765_v33 = vpop.f32.mrf.mxu2 }
 0x851   : > { %v1815_v18 = vmax.f32 %v1792_v11, %v1804_v47  ;;  %v1766_v40 = vadd.f32 %v1765_v33, %v1724_v15  ;;  %v5780_v47 = vpop.permute.xlu1 %5779 }
 0x852   : > { %v5782_v33 = vunpack.i.h.bf16 %v5780_v47  ;;  %v5781_v45 = vunpack.i.l.bf16 %v5780_v47 }
 0x853   : > { %v7439_v30 = vmax.f32 %v1815_v18, 0.0 }
 0x855   : > { %1827 = vrot.lane.b32.xlu0 %v7439_v30, %s6635_s23 }
 0x856   : > { %v1806_v35 = vpop.f32.mrf.mxu0 }
 0x857   : > { %v1807_v28 = vadd.f32 %v1806_v35, %v1766_v40 }
 0x858   : > { %v1768_v36 = vpop.f32.mrf.mxu2 }
 0x859   : > { %v1816_v27 = vmax.f32 %v1795_v46, %v1807_v28  ;;  %v1769_v43 = vadd.f32 %v1768_v36, %v1727_v56  ;;  %v5795_v46 = vpop.permute.xlu1 %5794 }
 0x85a   : > { %v5797_v36 = vunpack.i.h.bf16 %v5795_v46 }
 0x85b   : > { %v7444_v53 = vmax.f32 %v1816_v27, 0.0  ;;  %v5796_v27 = vunpack.i.l.bf16 %v5795_v46 }
 0x85d   : > { %1829 = vrot.lane.b32.xlu2 %v7444_v53, %s6635_s23  ;;  %5814 = vrot.lane.b32.xlu0 %v7192_v44, %s6634_s14 }
 0x85e   : > { %v1809_v12 = vpop.f32.mrf.mxu0 }
 0x85f   : > { %v1810_v40 = vadd.f32 %v1809_v12, %v1769_v43 }
 0x860   : > { %v1771_v18 = vpop.f32.mrf.mxu2 }
 0x861   : > { %v1817_v17 = vmax.f32 %v1798_v3, %v1810_v40  ;;  %v1772_v41 = vadd.f32 %v1771_v18, %v1730_v50  ;;  %v5805_v12 = vpop.permute.xlu1 %5804 }
 0x862   : > { %v5807_v3 = vunpack.i.h.bf16 %v5805_v12  ;;  %v5806_v40 = vunpack.i.l.bf16 %v5805_v12 }
 0x863   : > { %v7455_v6 = vmax.f32 %v1817_v17, 0.0 }
 0x865   : > { %1831 = vrot.lane.b32.xlu1 %v7455_v6, %s6635_s23  ;;  %5824 = vrot.lane.b32.xlu0 %v7225_v10, %s6634_s14 }
 0x866   : > { %v1812_v15 = vpop.f32.mrf.mxu0  ;;  %5819 = vrot.lane.b32.xlu2 %v7192_v44, %s6635_s23  ;;  %v7476_v44 = vld [vmem:[%s8777_s8 + $0x8] sm:$0xff] }
 0x867   : > { %v1813_v25 = vadd.f32 %v1812_v15, %v1772_v41  ;;  %1875 = vmatpush.msra.mxu1 %v7476_v44 }
 0x869   : > { %v1818_v54 = vmax.f32 %v1801_v38, %v1813_v25 }
 0x86b   : > { %v7464_v11 = vmax.f32 %v1818_v54, 0.0 }
 0x86d   : > { %5829 = vrot.lane.b32.xlu1 %v7225_v10, %s6635_s23  ;;  %1833 = vrot.lane.b32.xlu0 %v7464_v11, %s6635_s23  ;;  %v7486_v10 = vld [vmem:[%s8777_s8] sm:$0xff] }
 0x86e   : > { %5834 = vrot.lane.b32.xlu2 %v7205_v48, %s6634_s14  ;;  %1876 = vmatpush.msra.mxu1 %v7486_v10 }
 0x870   : > { %2089 = vmatpush.msrb.mxu1 %v5781_v45 }
 0x872   : > { %2090 = vmatpush.msrb.mxu1 %v5782_v33 }
 0x875   : > { %5839 = vrot.lane.b32.xlu1 %v7205_v48, %s6635_s23  ;;  %5849 = vrot.lane.b32.xlu0 %v7215_v14, %s6635_s23  ;;  %v5785_v48 = vpop.permute.xlu2 %5784 }
 0x876   : > { %5844 = vrot.lane.b32.xlu2 %v7215_v14, %s6634_s14  ;;  %v5787_v19 = vunpack.i.h.bf16 %v5785_v48  ;;  %v5786_v42 = vunpack.i.l.bf16 %v5785_v48  ;;  %v5790_v14 = vpop.permute.xlu0 %5789 }
 0x877   : > { %v5791_v35 = vunpack.i.l.bf16 %v5790_v14  ;;  %v5792_v56 = vunpack.i.h.bf16 %v5790_v14 }
 0x878   : > { %2132 = vmatpush.msrb.mxu2 %v5786_v42 }
 0x879   : > { %2091 = vmatpush.msrb.mxu1 %v5791_v35 }
 0x87a   : > { %2133 = vmatpush.msrb.mxu2 %v5787_v19 }
 0x87b   : > { %2092 = vmatpush.msrb.mxu1 %v5792_v56 }
 0x87c   : > { %2134 = vmatpush.msrb.mxu2 %v5796_v27 }
 0x87d   : > { %v5810_v9 = vpop.permute.xlu2 %5809 }
 0x87e   : > { %v5800_v63 = vpop.permute.xlu0 %5799  ;;  %v5811_v43 = vunpack.i.l.bf16 %v5810_v9  ;;  %v5812_v32 = vunpack.i.h.bf16 %v5810_v9  ;;  %2135 = vmatpush.msrb.mxu2 %v5797_v36 }
 0x87f   : > { %v5802_v28 = vunpack.i.h.bf16 %v5800_v63  ;;  %v5801_v29 = vunpack.i.l.bf16 %v5800_v63 }
 0x880   : > { %2136 = vmatpush.msrb.mxu2 %v5806_v40 }
 0x881   : > { %2093 = vmatpush.msrb.mxu1 %v5801_v29 }
 0x882   : > { %2137 = vmatpush.msrb.mxu2 %v5807_v3 }
 0x883   : > { %2094 = vmatpush.msrb.mxu1 %v5802_v28 }
 0x885   : > { %2095 = vmatpush.msrb.mxu1 %v5811_v43 }
 0x887   : > { %2096 = vmatpush.msrb.mxu1 %v5812_v32 }
 0x8b7   : > { %v1830_v50 = vpop.permute.xlu2 %1829 }
 0x8b8   : > { %v1840_v25 = vmax.f32 %v7444_v53, %v1830_v50  ;;  %v7563_v50 = vld [vmem:[#allocation3 + $0x140] sm:$0xff] }
 0x8c0   : > { %v5820_v18 = vpop.permute.xlu2 %5819 }
 0x8c1   : > { %v5822_v17 = vunpack.i.h.bf16 %v5820_v18  ;;  %v5821_v21 = vunpack.i.l.bf16 %v5820_v18  ;;  %v7565_v18 = vld [vmem:[#allocation3 + $0x148] sm:$0xff] }
 0x8c3   : > { %2097 = vmatpush.msrb.mxu1 %v5821_v21  ;;  %v7569_v21 = vpack.i.bf16 %v7563_v50, %v7565_v18 }
 0x8c5   : > { %2098 = vmatpush.msrb.mxu1 %v5822_v17 }
 0x8c7   : > { %v1828_v41 = vpop.permute.xlu0 %1827 }
 0x8c8   : > { %v1839_v15 = vmax.f32 %v7439_v30, %v1828_v41  ;;  %v5835_v60 = vpop.permute.xlu2 %5834 }
 0x8c9   : > { %v5836_v30 = vunpack.i.l.bf16 %v5835_v60  ;;  %v5837_v45 = vunpack.i.h.bf16 %v5835_v60 }
 0x8ca   : > { %5326 = vmatmul.msk.f32.vlgmr.msra.gmra.mxu1 %vm1132_vm8, %v1839_v15 }
 0x8cf   : > { %v5815_v38 = vpop.permute.xlu0 %5814 }
 0x8d0   : > { %v5817_v54 = vunpack.i.h.bf16 %v5815_v38  ;;  %v5816_v24 = vunpack.i.l.bf16 %v5815_v38  ;;  %v5845_v33 = vpop.permute.xlu2 %5844 }
 0x8d1   : > { %v5846_v53 = vunpack.i.l.bf16 %v5845_v33  ;;  %v5847_v46 = vunpack.i.h.bf16 %v5845_v33 }
 0x8d2   : > { %5327 = vmatmul.msk.f32.gmra.mxu1 %vm1132_vm8, %v1840_v25  ;;  %2138 = vmatpush.msrb.mxu2 %v5816_v24 }
 0x8d4   : > { %2139 = vmatpush.msrb.mxu2 %v5817_v54 }
 0x8d7   : > { %v1832_v55 = vpop.permute.xlu1 %1831  ;;  %v5825_v48 = vpop.permute.xlu0 %5824 }
 0x8d8   : > { %v1841_v19 = vmax.f32 %v7455_v6, %v1832_v55  ;;  %v5827_v42 = vunpack.i.h.bf16 %v5825_v48  ;;  %v5826_v47 = vunpack.i.l.bf16 %v5825_v48 }
 0x8da   : > { %5328 = vmatmul.msk.f32.gmra.mxu1 %vm1132_vm8, %v1841_v19  ;;  %2140 = vmatpush.msrb.mxu2 %v5826_v47 }
 0x8dc   : > { %2141 = vmatpush.msrb.mxu2 %v5827_v42 }
 0x8de   : > { %2142 = vmatpush.msrb.mxu2 %v5836_v30 }
 0x8df   : > { %v5830_v14 = vpop.permute.xlu1 %5829  ;;  %v1834_v35 = vpop.permute.xlu0 %1833 }
 0x8e0   : > { %v5831_v56 = vunpack.i.l.bf16 %v5830_v14  ;;  %v1842_v63 = vmax.f32 %v7464_v11, %v1834_v35  ;;  %2143 = vmatpush.msrb.mxu2 %v5837_v45  ;;  %v5832_v6 = vunpack.i.h.bf16 %v5830_v14 }
 0x8e2   : > { %5329 = vmatmul.msk.f32.gmra.mxu1 %vm1132_vm8, %v1842_v63  ;;  %2144 = vmatpush.msrb.mxu2 %v5846_v53 }
 0x8e3   : > { %2099 = vmatpush.msrb.mxu1 %v5831_v56  ;;  %v2201_v56 = vld [vmem:[%s8777_s8 + $0x10] sm:$0x3] }
 0x8e4   : > { %2145 = vmatpush.msrb.mxu2 %v5847_v46  ;;  %5330 = vmatpush.msk.msrb.mxu0 %vm787_vm5, %v2201_v56 }
 0x8e5   : > { %2100 = vmatpush.msrb.mxu1 %v5832_v6  ;;  %2146 = vmatmul.f32.vlgmr.msrb.gmra.mxu2 %v7318_v58 }
 0x8e6   : > { %2231 = vmatpush.msrb.mxu0 %v7476_v44  ;;  %v8870_v44 = vld [vmem:[#allocation14_spill] sm:$0xff] }
 0x8e7   : > { %v5840_v28 = vpop.permute.xlu1 %5839  ;;  %v5850_v29 = vpop.permute.xlu0 %5849 }
 0x8e8   : > { %v5841_v36 = vunpack.i.l.bf16 %v5840_v28  ;;  %v5842_v27 = vunpack.i.h.bf16 %v5840_v28  ;;  %v5851_v9 = vunpack.i.l.bf16 %v5850_v29  ;;  %v5852_v11 = vunpack.i.h.bf16 %v5850_v29  ;;  %2232 = vmatpush.msrb.mxu0 %v7486_v10  ;;  %v8871_v10 = vld [vmem:[#allocation13_spill] sm:$0xff] }
 0x8ea   : > { %2101 = vmatpush.msrb.mxu1 %v5841_v36 }
 0x8ec   : > { %2102 = vmatpush.msrb.mxu1 %v5842_v27 }
 0x8ed   : > { %2149 = vmatmul.f32.gmra.mxu2 %v7327_v26 }
 0x8ee   : > { %2103 = vmatpush.msrb.mxu1 %v5851_v9 }
 0x8f0   : > { %2104 = vmatpush.msrb.mxu1 %v5852_v11 }
 0x8f1   : > { %2105 = vmatmul.f32.vlgmr.msrb.gmra.mxu1 %v7309_v13 }
 0x8f5   : > { %2152 = vmatmul.f32.gmra.mxu2 %v7336_v22  ;;  %v7523_v22 = vld [vmem:[#allocation3 + $0x178] sm:$0xff] }
 0x8f6   : > { %2404 = vmatpush.msra.mxu3 %v7523_v22 }
 0x8f9   : > { %2108 = vmatmul.f32.gmra.mxu1 %v7315_v20 }
 0x8fd   : > { %2155 = vmatmul.f32.gmra.mxu2 %v7345_v62  ;;  %v7534_v62 = vld [vmem:[#allocation3 + $0x160] sm:$0xff] }
 0x901   : > { %2111 = vmatmul.f32.gmra.mxu1 %v7324_v59  ;;  %v2065_v59 = vpop.f32.mrf.mxu3 }
 0x905   : > { %2158 = vmatmul.f32.gmra.mxu2 %v7351_v7 }
 0x909   : > { %2114 = vmatmul.f32.gmra.mxu1 %v7333_v0  ;;  %v7521_v0 = vld [vmem:[#allocation3 + $0x170] sm:$0xff] }
 0x90a   : > { %2405 = vmatpush.msra.mxu3 %v7521_v0 }
 0x90d   : > { %2161 = vmatmul.f32.gmra.mxu2 %v7357_v5  ;;  %v2068_v5 = vpop.f32.mrf.mxu3 }
 0x911   : > { %2117 = vmatmul.f32.gmra.mxu1 %v7342_v57  ;;  %v7527_v57 = vpack.i.bf16 %v7521_v0, %v7523_v22 }
 0x913   : > { %5859 = vrot.lane.b32.xlu0 %v7527_v57, %s6634_s14  ;;  %5854 = vrot.lane.b32.xlu2 %v7527_v57, %s6635_s23 }
 0x915   : > { %2164 = vmatmul.f32.gmra.mxu2 %v7363_v4  ;;  %v7551_v4 = vld [vmem:[#allocation3 + $0x158] sm:$0xff]  ;;  %v2071_v12 = vpop.f32.mrf.mxu3 }
 0x919   : > { %2120 = vmatmul.f32.gmra.mxu1 %v7348_v2  ;;  %v7536_v2 = vld [vmem:[#allocation3 + $0x168] sm:$0xff] }
 0x91a   : > { %v7541_v7 = vpack.i.bf16 %v7534_v62, %v7536_v2  ;;  %2406 = vmatpush.msra.mxu3 %v7536_v2 }
 0x91c   : > { %5864 = vrot.lane.b32.xlu1 %v7541_v7, %s6635_s23  ;;  %2407 = vmatpush.msra.mxu3 %v7534_v62 }
 0x91d   : > { %2167 = vmatmul.f32.gmra.mxu2 %v7366_v1  ;;  %5869 = vrot.lane.b32.xlu0 %v7541_v7, %s6634_s14  ;;  %v2074_v17 = vpop.f32.mrf.mxu3 }
 0x91e   : > { %2408 = vmatpush.msra.mxu3 %v7551_v4 }
 0x921   : > { %2123 = vmatmul.f32.gmra.mxu1 %v7354_v31 }
 0x925   : > { %5884 = vrot.lane.b32.xlu0 %v7569_v21, %s6635_s23  ;;  %v2077_v25 = vpop.f32.mrf.mxu3 }
 0x929   : > { %2126 = vmatmul.f32.gmra.mxu1 %v7360_v49  ;;  %v7549_v49 = vld [vmem:[#allocation3 + $0x150] sm:$0xff] }
 0x92a   : > { %v7555_v43 = vpack.i.bf16 %v7549_v49, %v7551_v4  ;;  %2409 = vmatpush.msra.mxu3 %v7549_v49 }
 0x92c   : > { %5874 = vrot.lane.b32.xlu1 %v7555_v43, %s6635_s23  ;;  %5879 = vrot.lane.b32.xlu2 %v7555_v43, %s6634_s14 }
 0x92d   : > { %2410 = vmatpush.msra.mxu3 %v7565_v18  ;;  %5894 = vrot.lane.b32.xlu0 %v7379_v51, %s6635_s23 }
 0x92f   : > { %2411 = vmatpush.msra.mxu3 %v7563_v50 }
 0x931   : > { %2412 = vmatpush.msra.mxu3 %v7375_v34 }
 0x933   : > { %2413 = vmatpush.msra.mxu3 %v7373_v23 }
 0x935   : > { %2414 = vmatpush.msra.mxu3 %v7384_v8  ;;  %v2080_v8 = vpop.f32.mrf.mxu3 }
 0x937   : > { %2415 = vmatpush.msra.mxu3 %v7382_v61 }
 0x939   : > { %2416 = vmatpush.msra.mxu3 %v7401_v39 }
 0x93b   : > { %2417 = vmatpush.msra.mxu3 %v7399_v37 }
 0x93d   : > { %2418 = vmatpush.msra.mxu3 %v7417_v52  ;;  %v2083_v52 = vpop.f32.mrf.mxu3 }
 0x93f   : > { %2419 = vmatpush.msra.mxu3 %v7415_v16 }
 0x945   : > { %v2086_v28 = vpop.f32.mrf.mxu3 }
 0x947   : > { %v1878_v13 = vpop.f32.mrf.mxu1 }
 0x948   : > { %1891 = vst.msk [vmem:[#allocation4 + $0x40] sm:$0xff] %vm1178_vm9, %v1878_v13 }
 0x94f   : > { %v1881_v20 = vpop.f32.mrf.mxu1 }
 0x950   : > { %1892 = vst.msk [vmem:[#allocation4 + $0x48] sm:$0xff] %vm1178_vm9, %v1881_v20 }
 0x957   : > { %v1884_v58 = vpop.f32.mrf.mxu1 }
 0x958   : > { %1893 = vst.msk [vmem:[#allocation4 + $0x50] sm:$0xff] %vm1178_vm9, %v1884_v58 }
 0x95f   : > { %v1887_v26 = vpop.f32.mrf.mxu1 }
 0x960   : > { %1894 = vst.msk [vmem:[#allocation4 + $0x58] sm:$0xff] %vm1178_vm9, %v1887_v26 }
 0x968   : > { %v2147_v31 = vpop.f32.mrf.mxu2 }
 0x96d   : > { %v5855_v26 = vpop.permute.xlu2 %5854 }
 0x96e   : > { %v2106_v1 = vpop.f32.mrf.mxu1 }
 0x96f   : > { %v2107_v24 = vadd.f32 %v2106_v1, %v2065_v59  ;;  %v8872_v59 = vld [vmem:[#allocation16_spill] sm:$0xff] }
 0x970   : > { %v2150_v32 = vpop.f32.mrf.mxu2 }
 0x971   : > { %v2148_v60 = vadd.f32 %v2147_v31, %v2107_v24  ;;  %v5857_v31 = vunpack.i.h.bf16 %v5855_v26 }
 0x976   : > { %v2109_v3 = vpop.f32.mrf.mxu1 }
 0x977   : > { %v2110_v42 = vadd.f32 %v2109_v3, %v2068_v5  ;;  %v5856_v5 = vunpack.i.l.bf16 %v5855_v26 }
 0x978   : > { %v2153_v40 = vpop.f32.mrf.mxu2 }
 0x979   : > { %v2151_v37 = vadd.f32 %v2150_v32, %v2110_v42  ;;  %2445 = vmatpush.msra.mxu0 %v5856_v5 }
 0x97b   : > { %2446 = vmatpush.msra.mxu0 %v5857_v31 }
 0x97e   : > { %v2112_v41 = vpop.f32.mrf.mxu1 }
 0x97f   : > { %v2113_v16 = vadd.f32 %v2112_v41, %v2071_v12 }
 0x980   : > { %v2156_v15 = vpop.f32.mrf.mxu2 }
 0x981   : > { %v2154_v63 = vadd.f32 %v2153_v40, %v2113_v16 }
 0x985   : > { %v5860_v1 = vpop.permute.xlu0 %5859 }
 0x986   : > { %v2115_v38 = vpop.f32.mrf.mxu1  ;;  %v5862_v32 = vunpack.i.h.bf16 %v5860_v1  ;;  %v5861_v12 = vunpack.i.l.bf16 %v5860_v1 }
 0x987   : > { %v2116_v29 = vadd.f32 %v2115_v38, %v2074_v17 }
 0x988   : > { %v2159_v54 = vpop.f32.mrf.mxu2  ;;  %2486 = vmatpush.msra.mxu1 %v5861_v12 }
 0x989   : > { %v2157_v11 = vadd.f32 %v2156_v15, %v2116_v29 }
 0x98a   : > { %2487 = vmatpush.msra.mxu1 %v5862_v32 }
 0x98e   : > { %v2118_v34 = vpop.f32.mrf.mxu1  ;;  %v5865_v3 = vpop.permute.xlu1 %5864 }
 0x98f   : > { %v2119_v23 = vadd.f32 %v2118_v34, %v2077_v25  ;;  %v5867_v40 = vunpack.i.h.bf16 %v5865_v3  ;;  %v5866_v17 = vunpack.i.l.bf16 %v5865_v3  ;;  %v5870_v41 = vpop.permute.xlu0 %5869  ;;  %v5880_v25 = vpop.permute.xlu2 %5879 }
 0x990   : > { %v2162_v48 = vpop.f32.mrf.mxu2  ;;  %v5872_v15 = vunpack.i.h.bf16 %v5870_v41  ;;  %v5871_v38 = vunpack.i.l.bf16 %v5870_v41  ;;  %v5882_v34 = vunpack.i.h.bf16 %v5880_v25 }
 0x991   : > { %v2160_v55 = vadd.f32 %v2159_v54, %v2119_v23  ;;  %2447 = vmatpush.msra.mxu0 %v5866_v17  ;;  %v5881_v54 = vunpack.i.l.bf16 %v5880_v25  ;;  %v7646_v17 = vld [vmem:[#allocation8 + $0x8] sm:$0xff]  ;;  %v7655_v25 = vld [vmem:[#allocation8 + $0x20] sm:$0xff] }
 0x992   : > { %2488 = vmatpush.msra.mxu1 %v5871_v38  ;;  %v7651_v38 = vld [vmem:[#allocation8 + $0x78] sm:$0xff] }
 0x993   : > { %v2171_v19 = vmax.f32 %v2148_v60, %v2160_v55  ;;  %2448 = vmatpush.msra.mxu0 %v5867_v40  ;;  %8873 = vst [vmem:[#allocation15_spill] sm:$0xff] %v7651_v38 }
 0x994   : > { %2489 = vmatpush.msra.mxu1 %v5872_v15  ;;  %v7649_v15 = vld [vmem:[#allocation8 + $0x10] sm:$0xff] }
 0x995   : > { %v7585_v47 = vmax.f32 %v2171_v19, 0.0 }
 0x996   : > { %v2121_v61 = vpop.f32.mrf.mxu1  ;;  %2490 = vmatpush.msra.mxu1 %v5881_v54  ;;  %v7658_v54 = vld [vmem:[#allocation8 + $0x28] sm:$0xff] }
 0x997   : > { %v2122_v30 = vadd.f32 %v2121_v61, %v2080_v8  ;;  %2183 = vrot.lane.b32.xlu1 %v7585_v47, %s6635_s23  ;;  %v5885_v60 = vpop.permute.xlu0 %5884 }
 0x998   : > { %v2165_v45 = vpop.f32.mrf.mxu2  ;;  %2491 = vmatpush.msra.mxu1 %v5882_v34  ;;  %v5887_v55 = vunpack.i.h.bf16 %v5885_v60  ;;  %v7664_v34 = vld [vmem:[#allocation8 + $0x38] sm:$0xff] }
 0x999   : > { %v2163_v39 = vadd.f32 %v2162_v48, %v2122_v30  ;;  %v5886_v48 = vunpack.i.l.bf16 %v5885_v60  ;;  %v7673_v60 = vld [vmem:[#allocation8 + $0x50] sm:$0xff] }
 0x99b   : > { %v2172_v33 = vmax.f32 %v2151_v37, %v2163_v39 }
 0x99d   : > { %v7589_v53 = vmax.f32 %v2172_v33, 0.0 }
 0x99e   : > { %v2124_v14 = vpop.f32.mrf.mxu1  ;;  %v5875_v24 = vpop.permute.xlu1 %5874 }
 0x99f   : > { %v2125_v35 = vadd.f32 %v2124_v14, %v2083_v52  ;;  %2185 = vrot.lane.b32.xlu2 %v7589_v53, %s6635_s23  ;;  %5899 = vrot.lane.b32.xlu1 %v7379_v51, %s6634_s14  ;;  %v5877_v23 = vunpack.i.h.bf16 %v5875_v24  ;;  %v5876_v8 = vunpack.i.l.bf16 %v5875_v24  ;;  %v5895_v19 = vpop.permute.xlu0 %5894  ;;  %v7624_v14 = vld [vmem:[#allocation8] sm:$0xff]  ;;  %v7660_v24 = vld [vmem:[#allocation8 + $0x90] sm:$0xff] }
 0x9a0   : > { %v2168_v9 = vpop.f32.mrf.mxu2  ;;  %v5897_v61 = vunpack.i.h.bf16 %v5895_v19  ;;  %v5896_v30 = vunpack.i.l.bf16 %v5895_v19  ;;  %2420 = vmatmul.f32.vlgmr.msra.gmra.mxu3 %v7624_v14  ;;  %8874 = vst [vmem:[#allocation18_spill] sm:$0xff] %v7660_v24  ;;  %v7682_v19 = vld [vmem:[#allocation8 + $0x70] sm:$0xff] }
 0x9a1   : > { %v2166_v46 = vadd.f32 %v2165_v45, %v2125_v35  ;;  %2449 = vmatpush.msra.mxu0 %v5876_v8  ;;  %v7669_v8 = vld [vmem:[#allocation8 + $0xa8] sm:$0xff]  ;;  %8877 = vst [vmem:[#allocation19_spill] sm:$0xff] %v7682_v19 }
 0x9a2   : > { %8875 = vst [vmem:[#allocation17_spill] sm:$0xff] %v7669_v8 }
 0x9a3   : > { %v2173_v6 = vmax.f32 %v2154_v63, %v2166_v46  ;;  %2450 = vmatpush.msra.mxu0 %v5877_v23  ;;  %v7667_v23 = vld [vmem:[#allocation8 + $0x40] sm:$0xff] }
 0x9a5   : > { %v7600_v36 = vmax.f32 %v2173_v6, 0.0  ;;  %2451 = vmatpush.msra.mxu0 %v5886_v48  ;;  %v7679_v48 = vld [vmem:[#allocation8 + $0x68] sm:$0xff] }
 0x9a6   : > { %v2127_v27 = vpop.f32.mrf.mxu1 }
 0x9a7   : > { %v2128_v51 = vadd.f32 %v2127_v27, %v2086_v28  ;;  %2187 = vrot.lane.b32.xlu1 %v7600_v36, %s6635_s23  ;;  %5889 = vrot.lane.b32.xlu2 %v7569_v21, %s6634_s14  ;;  %v7629_v27 = vld [vmem:[#allocation8 + $0x18] sm:$0xff] }
 0x9a8   : > { %2452 = vmatpush.msra.mxu0 %v5887_v55  ;;  %2423 = vmatmul.f32.gmra.mxu3 %v7629_v27  ;;  %v7676_v55 = vld [vmem:[#allocation8 + $0x58] sm:$0xff] }
 0x9a9   : > { %v2169_v13 = vadd.f32 %v2168_v9, %v2128_v51  ;;  %v7633_v51 = vld [vmem:[#allocation8 + $0x30] sm:$0xff]  ;;  %8876 = vst [vmem:[#allocation20_spill] sm:$0xff] %v7676_v55 }
 0x9aa   : > { %2453 = vmatpush.msra.mxu0 %v5896_v30  ;;  %v7691_v30 = vld [vmem:[#allocation8 + $0x98] sm:$0xff] }
 0x9ab   : > { %v2174_v20 = vmax.f32 %v2157_v11, %v2169_v13  ;;  %v7638_v13 = vld [vmem:[#allocation8 + $0x48] sm:$0xff]  ;;  %8880 = vst [vmem:[#allocation13_spill] sm:$0xff] %v7691_v30 }
 0x9ac   : > { %2454 = vmatpush.msra.mxu0 %v5897_v61  ;;  %v7688_v61 = vld [vmem:[#allocation8 + $0x88] sm:$0xff] }
 0x9ad   : > { %v7607_v58 = vmax.f32 %v2174_v20, 0.0  ;;  %8879 = vst [vmem:[#allocation14_spill] sm:$0xff] %v7688_v61 }
 0x9af   : > { %2189 = vrot.lane.b32.xlu0 %v7607_v58, %s6635_s23  ;;  %5909 = vrot.lane.b32.xlu1 %v8870_v44, %s6634_s14 }
 0x9b0   : > { %5904 = vrot.lane.b32.xlu2 %v8870_v44, %s6635_s23  ;;  %2426 = vmatmul.f32.gmra.mxu3 %v7633_v51 }
 0x9b7   : > { %5919 = vrot.lane.b32.xlu0 %v8871_v10, %s6634_s14  ;;  %5924 = vrot.lane.b32.xlu1 %v8872_v59, %s6635_s23 }
 0x9b8   : > { %5914 = vrot.lane.b32.xlu2 %v8871_v10, %s6635_s23  ;;  %2429 = vmatmul.f32.gmra.mxu3 %v7638_v13 }
 0x9c0   : > { %5929 = vrot.lane.b32.xlu2 %v8872_v59, %s6634_s14 }
 0x9f9   : > { %v2186_v42 = vpop.permute.xlu2 %2185 }
 0x9fa   : > { %v2196_v46 = vmax.f32 %v7589_v53, %v2186_v42  ;;  %v7685_v42 = vld [vmem:[#allocation8 + $0x80] sm:$0xff] }
 0x9fb   : > { %8878 = vst [vmem:[#allocation21_spill] sm:$0xff] %v7685_v42 }
 0xa01   : > { %v5890_v37 = vpop.permute.xlu2 %5889 }
 0xa02   : > { %v5892_v39 = vunpack.i.h.bf16 %v5890_v37  ;;  %v5891_v52 = vunpack.i.l.bf16 %v5890_v37  ;;  %v7694_v37 = vld [vmem:[#allocation8 + $0xa0] sm:$0xff] }
 0xa03   : > { %8881 = vst [vmem:[#allocation16_spill] sm:$0xff] %v7694_v37 }
 0xa04   : > { %2492 = vmatpush.msra.mxu1 %v5891_v52  ;;  %v7700_v52 = vld [vmem:[#allocation8 + $0xb8] sm:$0xff] }
 0xa05   : > { %8883 = vst [vmem:[#allocation23_spill] sm:$0xff] %v7700_v52 }
 0xa06   : > { %2493 = vmatpush.msra.mxu1 %v5892_v39  ;;  %v7697_v39 = vld [vmem:[#allocation8 + $0xb0] sm:$0xff] }
 0xa07   : > { %8882 = vst [vmem:[#allocation22_spill] sm:$0xff] %v7697_v39 }
 0xa09   : > { %v2184_v33 = vpop.permute.xlu1 %2183 }
 0xa0a   : > { %v2195_v45 = vmax.f32 %v7585_v47, %v2184_v33  ;;  %v5905_v16 = vpop.permute.xlu2 %5904 }
 0xa0b   : > { %v5907_v35 = vunpack.i.h.bf16 %v5905_v16  ;;  %v5906_v56 = vunpack.i.l.bf16 %v5905_v16 }
 0xa0c   : > { %5331 = vmatmul.msk.f32.vlgmr.msrb.gmra.mxu0 %vm1132_vm8, %v2195_v45 }
 0xa0d   : > { %2455 = vmatpush.msra.mxu0 %v5906_v56  ;;  %v7706_v56 = vld [vmem:[#allocation3 + $0x1b0] sm:$0xff] }
 0xa0f   : > { %2456 = vmatpush.msra.mxu0 %v5907_v35 }
 0xa11   : > { %v5900_v63 = vpop.permute.xlu1 %5899 }
 0xa12   : > { %v5902_v6 = vunpack.i.h.bf16 %v5900_v63  ;;  %v5901_v28 = vunpack.i.l.bf16 %v5900_v63  ;;  %v5915_v29 = vpop.permute.xlu2 %5914  ;;  %v7708_v63 = vld [vmem:[#allocation3 + $0x1b8] sm:$0xff] }
 0xa13   : > { %v5917_v47 = vunpack.i.h.bf16 %v5915_v29  ;;  %v5916_v9 = vunpack.i.l.bf16 %v5915_v29  ;;  %v7717_v29 = vld [vmem:[#allocation3 + $0x190] sm:$0xff] }
 0xa14   : > { %5332 = vmatmul.msk.f32.gmra.mxu0 %vm1132_vm8, %v2196_v46  ;;  %2494 = vmatpush.msra.mxu1 %v5901_v28  ;;  %v7712_v46 = vpack.i.bf16 %v7706_v56, %v7708_v63 }
 0xa15   : > { %2457 = vmatpush.msra.mxu0 %v5916_v9 }
 0xa16   : > { %2495 = vmatpush.msra.mxu1 %v5902_v6  ;;  %8884 = vst [vmem:[#allocation24_spill] sm:$0xff] %v7712_v46  ;;  %5934 = vrot.lane.b32.xlu1 %v7712_v46, %s6635_s23 }
 0xa17   : > { %2458 = vmatpush.msra.mxu0 %v5917_v47  ;;  %v7719_v47 = vld [vmem:[#allocation3 + $0x198] sm:$0xff] }
 0xa18   : > { %v7723_v9 = vpack.i.bf16 %v7717_v29, %v7719_v47 }
 0xa19   : > { %v2188_v11 = vpop.permute.xlu1 %2187 }
 0xa1a   : > { %v2197_v53 = vmax.f32 %v7600_v36, %v2188_v11  ;;  %v5930_v31 = vpop.permute.xlu2 %5929  ;;  %v7643_v36 = vld [vmem:[#allocation8 + $0x60] sm:$0xff]  ;;  %8885 = vst [vmem:[#allocation25_spill] sm:$0xff] %v7723_v9 }
 0xa1b   : > { %2432 = vmatmul.f32.gmra.mxu3 %v7643_v36  ;;  %v5932_v41 = vunpack.i.h.bf16 %v5930_v31  ;;  %v7725_v11 = vld [vmem:[#allocation3 + $0x180] sm:$0xff] }
 0xa1c   : > { %5333 = vmatmul.msk.f32.gmra.mxu0 %vm1132_vm8, %v2197_v53  ;;  %v7727_v53 = vld [vmem:[#allocation3 + $0x188] sm:$0xff] }
 0xa1e   : > { %5944 = vrot.lane.b32.xlu1 %v7723_v9, %s6635_s23 }
 0xa21   : > { %v2190_v20 = vpop.permute.xlu0 %2189  ;;  %v5910_v44 = vpop.permute.xlu1 %5909 }
 0xa22   : > { %v2198_v10 = vmax.f32 %v7607_v58, %v2190_v20  ;;  %v5912_v59 = vunpack.i.h.bf16 %v5910_v44  ;;  %v5911_v26 = vunpack.i.l.bf16 %v5910_v44  ;;  %v5931_v58 = vunpack.i.l.bf16 %v5930_v31 }
 0xa23   : > { %2435 = vmatmul.f32.gmra.mxu3 %v7651_v38  ;;  %v2421_v35 = vpop.f32.mrf.mxu3  ;;  %v7733_v20 = vpack.i.bf16 %v7725_v11, %v7727_v53 }
 0xa24   : > { %5334 = vmatmul.msk.f32.gmra.mxu0 %vm1132_vm8, %v2198_v10  ;;  %2496 = vmatpush.msra.mxu1 %v5911_v26  ;;  %v7737_v10 = vld [vmem:[#allocation3 + $0x1a0] sm:$0xff] }
 0xa25   : > { %5954 = vrot.lane.b32.xlu0 %v7733_v20, %s6635_s23 }
 0xa26   : > { %2497 = vmatpush.msra.mxu1 %v5912_v59  ;;  %v7739_v59 = vld [vmem:[#allocation3 + $0x1a8] sm:$0xff] }
 0xa27   : > { %v7743_v26 = vpack.i.bf16 %v7737_v10, %v7739_v59 }
 0xa29   : > { %v5920_v5 = vpop.permute.xlu0 %5919  ;;  %v5925_v1 = vpop.permute.xlu1 %5924  ;;  %8886 = vst [vmem:[#allocation26_spill] sm:$0xff] %v7743_v26  ;;  %5939 = vrot.lane.b32.xlu2 %v7743_v26, %s6635_s23  ;;  %5959 = vrot.lane.b32.xlu1 %v7743_v26, %s6634_s14 }
 0xa2a   : > { %v5921_v32 = vunpack.i.l.bf16 %v5920_v5  ;;  %v5927_v12 = vunpack.i.h.bf16 %v5925_v1  ;;  %v5926_v3 = vunpack.i.l.bf16 %v5925_v1  ;;  %v5922_v40 = vunpack.i.h.bf16 %v5920_v5 }
 0xa2b   : > { %2438 = vmatmul.f32.gmra.mxu3 %v7660_v24  ;;  %v2424_v28 = vpop.f32.mrf.mxu3 }
 0xa2c   : > { %2459 = vmatpush.msra.mxu0 %v5926_v3  ;;  %2498 = vmatpush.msra.mxu1 %v5921_v32 }
 0xa2e   : > { %2460 = vmatpush.msra.mxu0 %v5927_v12  ;;  %2499 = vmatpush.msra.mxu1 %v5922_v40 }
 0xa2f   : > { %2461 = vmatmul.f32.vlgmr.msra.gmra.mxu0 %v7646_v17 }
 0xa30   : > { %2500 = vmatpush.msra.mxu1 %v5931_v58 }
 0xa31   : > { %5949 = vrot.lane.b32.xlu2 %v7712_v46, %s6634_s14  ;;  %5969 = vrot.lane.b32.xlu1 %v7723_v9, %s6634_s14 }
 0xa32   : > { %2501 = vmatpush.msra.mxu1 %v5932_v41 }
 0xa33   : > { %2502 = vmatmul.f32.vlgmr.msra.gmra.mxu1 %v7649_v15  ;;  %2441 = vmatmul.f32.gmra.mxu3 %v7669_v8  ;;  %v2427_v5 = vpop.f32.mrf.mxu3 }
 0xa37   : > { %2464 = vmatmul.f32.gmra.mxu0 %v7655_v25 }
 0xa39   : > { %5974 = vrot.lane.b32.xlu2 %v7541_v7, %s6635_s23 }
 0xa3b   : > { %2505 = vmatmul.f32.gmra.mxu1 %v7658_v54  ;;  %v2430_v12 = vpop.f32.mrf.mxu3 }
 0xa3f   : > { %2467 = vmatmul.f32.gmra.mxu0 %v7664_v34 }
 0xa43   : > { %2508 = vmatmul.f32.gmra.mxu1 %v7667_v23 }
 0xa47   : > { %2470 = vmatmul.f32.gmra.mxu0 %v7673_v60 }
 0xa4b   : > { %2511 = vmatmul.f32.gmra.mxu1 %v7676_v55 }
 0xa4f   : > { %2473 = vmatmul.f32.gmra.mxu0 %v7679_v48 }
 0xa53   : > { %2514 = vmatmul.f32.gmra.mxu1 %v7682_v19 }
 0xa57   : > { %2476 = vmatmul.f32.gmra.mxu0 %v7685_v42 }
 0xa5b   : > { %2517 = vmatmul.f32.gmra.mxu1 %v7688_v61 }
 0xa5f   : > { %2479 = vmatmul.f32.gmra.mxu0 %v7691_v30 }
 0xa63   : > { %2520 = vmatmul.f32.gmra.mxu1 %v7694_v37 }
 0xa67   : > { %2482 = vmatmul.f32.gmra.mxu0 %v7697_v39 }
 0xa6b   : > { %2523 = vmatmul.f32.gmra.mxu1 %v7700_v52 }
 0xa89   : > { %v2234_v33 = vpop.f32.mrf.mxu0 }
 0xa8a   : > { %2247 = vst.msk [vmem:[#allocation4 + $0x60] sm:$0xff] %vm1178_vm9, %v2234_v33 }
 0xa91   : > { %v2237_v45 = vpop.f32.mrf.mxu0 }
 0xa92   : > { %2248 = vst.msk [vmem:[#allocation4 + $0x68] sm:$0xff] %vm1178_vm9, %v2237_v45 }
 0xa99   : > { %v2240_v16 = vpop.f32.mrf.mxu0 }
 0xa9a   : > { %2249 = vst.msk [vmem:[#allocation4 + $0x70] sm:$0xff] %vm1178_vm9, %v2240_v16 }
 0xa9e   : > { %v2433_v41 = vpop.f32.mrf.mxu3 }
 0xaa1   : > { %v2243_v6 = vpop.f32.mrf.mxu0 }
 0xaa2   : > { %2250 = vst.msk [vmem:[#allocation4 + $0x78] sm:$0xff] %vm1178_vm9, %v2243_v6 }
 0xaa6   : > { %v2436_v26 = vpop.f32.mrf.mxu3 }
 0xaac   : > { %v2462_v44 = vpop.f32.mrf.mxu0 }
 0xaad   : > { %v2463_v16 = vadd.f32 %v2462_v44, %v2421_v35 }
 0xaae   : > { %v2439_v19 = vpop.f32.mrf.mxu3 }
 0xab0   : > { %v2503_v31 = vpop.f32.mrf.mxu1 }
 0xab1   : > { %v2504_v37 = vadd.f32 %v2503_v31, %v2463_v16 }
 0xab4   : > { %v2465_v1 = vpop.f32.mrf.mxu0 }
 0xab5   : > { %v2466_v61 = vadd.f32 %v2465_v1, %v2424_v28 }
 0xab8   : > { %v2506_v32 = vpop.f32.mrf.mxu1 }
 0xab9   : > { %v2507_v42 = vadd.f32 %v2506_v32, %v2466_v61  ;;  %v2442_v61 = vpop.f32.mrf.mxu3 }
 0xabc   : > { %v2468_v3 = vpop.f32.mrf.mxu0 }
 0xabd   : > { %v2469_v44 = vadd.f32 %v2468_v3, %v2427_v5  ;;  %v7790_v5 = vld [vmem:[%s8777_s8 + $0x8] sm:$0xff]  ;;  %v5935_v3 = vpop.permute.xlu1 %5934 }
 0xac0   : > { %v2509_v40 = vpop.f32.mrf.mxu1 }
 0xac4   : > { %v2471_v58 = vpop.f32.mrf.mxu0 }
 0xac5   : > { %v5945_v16 = vpop.permute.xlu1 %5944 }
 0xac8   : > { %v2512_v33 = vpop.f32.mrf.mxu1 }
 0xacc   : > { %v2474_v45 = vpop.f32.mrf.mxu0 }
 0xacd   : > { %v2475_v6 = vadd.f32 %v2474_v45, %v2433_v41 }
 0xad0   : > { %v2515_v52 = vpop.f32.mrf.mxu1 }
 0xad1   : > { %v2516_v39 = vadd.f32 %v2515_v52, %v2475_v6  ;;  %v5947_v6 = vunpack.i.h.bf16 %v5945_v16 }
 0xad3   : > { %v2527_v46 = vmax.f32 %v2504_v37, %v2516_v39  ;;  %v2510_v39 = vadd.f32 %v2509_v40, %v2469_v44  ;;  %v5937_v40 = vunpack.i.h.bf16 %v5935_v3 }
 0xad4   : > { %v2477_v8 = vpop.f32.mrf.mxu0 }
 0xad5   : > { %v2478_v30 = vadd.f32 %v2477_v8, %v2436_v26  ;;  %v7755_v9 = vmax.f32 %v2527_v46, 0.0  ;;  %v2557_v8 = vld [vmem:[%s8777_s8 + $0x10] sm:$0x3] }
 0xad6   : > { %5335 = vmatpush.msk.msra.mxu2 %vm787_vm5, %v2557_v8  ;;  %v5960_v8 = vpop.permute.xlu1 %5959 }
 0xad7   : > { %2539 = vrot.lane.b32.xlu0 %v7755_v9, %s6635_s23 }
 0xad8   : > { %v2518_v24 = vpop.f32.mrf.mxu1  ;;  %2587 = vmatpush.msra.mxu2 %v7790_v5 }
 0xad9   : > { %v2519_v38 = vadd.f32 %v2518_v24, %v2478_v30 }
 0xadb   : > { %v2528_v55 = vmax.f32 %v2507_v42, %v2519_v38  ;;  %v2472_v42 = vadd.f32 %v2471_v58, %v2430_v12 }
 0xadc   : > { %v2480_v35 = vpop.f32.mrf.mxu0 }
 0xadd   : > { %v2481_v41 = vadd.f32 %v2480_v35, %v2439_v19  ;;  %v7759_v45 = vmax.f32 %v2528_v55, 0.0  ;;  %v2513_v46 = vadd.f32 %v2512_v33, %v2472_v42  ;;  %v5955_v35 = vpop.permute.xlu0 %5954 }
 0xade   : > { %v5957_v44 = vunpack.i.h.bf16 %v5955_v35 }
 0xadf   : > { %2541 = vrot.lane.b32.xlu0 %v7759_v45, %s6635_s23 }
 0xae0   : > { %v2521_v37 = vpop.f32.mrf.mxu1 }
 0xae1   : > { %v2522_v52 = vadd.f32 %v2521_v37, %v2481_v41  ;;  %v7800_v41 = vld [vmem:[%s8777_s8] sm:$0xff]  ;;  %v5962_v37 = vunpack.i.h.bf16 %v5960_v8 }
 0xae2   : > { %2588 = vmatpush.msra.mxu2 %v7800_v41 }
 0xae3   : > { %v2529_v24 = vmax.f32 %v2510_v39, %v2522_v52  ;;  %v5961_v39 = vunpack.i.l.bf16 %v5960_v8  ;;  %v5970_v52 = vpop.permute.xlu1 %5969 }
 0xae4   : > { %v2483_v38 = vpop.f32.mrf.mxu0  ;;  %2760 = vmatpush.msrb.mxu2 %v7708_v63 }
 0xae5   : > { %v2484_v30 = vadd.f32 %v2483_v38, %v2442_v61  ;;  %v7767_v19 = vmax.f32 %v2529_v24, 0.0  ;;  %v5972_v61 = vunpack.i.h.bf16 %v5970_v52  ;;  %v5971_v24 = vunpack.i.l.bf16 %v5970_v52  ;;  %v7855_v52 = vld [vmem:[#allocation3 + $0x1d0] sm:$0xff] }
 0xae6   : > { %2761 = vmatpush.msrb.mxu2 %v7706_v56 }
 0xae7   : > { %2543 = vrot.lane.b32.xlu2 %v7767_v19, %s6635_s23  ;;  %5964 = vrot.lane.b32.xlu0 %v7527_v57, %s6635_s23 }
 0xae8   : > { %v2524_v55 = vpop.f32.mrf.mxu1  ;;  %2762 = vmatpush.msrb.mxu2 %v7739_v59 }
 0xae9   : > { %v2525_v28 = vadd.f32 %v2524_v55, %v2484_v30 }
 0xaea   : > { %2763 = vmatpush.msrb.mxu2 %v7737_v10 }
 0xaeb   : > { %v2530_v26 = vmax.f32 %v2513_v46, %v2525_v28 }
 0xaec   : > { %2764 = vmatpush.msrb.mxu2 %v7719_v47 }
 0xaed   : > { %v7773_v31 = vmax.f32 %v2530_v26, 0.0 }
 0xaee   : > { %2765 = vmatpush.msrb.mxu2 %v7717_v29 }
 0xaef   : > { %2545 = vrot.lane.b32.xlu1 %v7773_v31, %s6635_s23  ;;  %5979 = vrot.lane.b32.xlu0 %v7733_v20, %s6634_s14 }
 0xaf0   : > { %5984 = vrot.lane.b32.xlu2 %v7555_v43, %s6635_s23  ;;  %2766 = vmatpush.msrb.mxu2 %v7727_v53 }
 0xaf2   : > { %2767 = vmatpush.msrb.mxu2 %v7725_v11 }
 0xaf4   : > { %2768 = vmatpush.msrb.mxu2 %v7523_v22 }
 0xaf6   : > { %2769 = vmatpush.msrb.mxu2 %v7521_v0 }
 0xaf7   : > { %5989 = vrot.lane.b32.xlu0 %v7527_v57, %s6634_s14  ;;  %5994 = vrot.lane.b32.xlu1 %v7569_v21, %s6635_s23  ;;  %v5940_v57 = vpop.permute.xlu2 %5939 }
 0xaf8   : > { %5999 = vrot.lane.b32.xlu2 %v7541_v7, %s6634_s14  ;;  %v5936_v7 = vunpack.i.l.bf16 %v5935_v3  ;;  %v5941_v58 = vunpack.i.l.bf16 %v5940_v57  ;;  %v5942_v33 = vunpack.i.h.bf16 %v5940_v57  ;;  %2770 = vmatpush.msrb.mxu2 %v7536_v2 }
 0xafa   : > { %2801 = vmatpush.msrb.mxu3 %v5936_v7  ;;  %2771 = vmatpush.msrb.mxu2 %v7534_v62 }
 0xafc   : > { %2802 = vmatpush.msrb.mxu3 %v5937_v40  ;;  %2772 = vmatpush.msrb.mxu2 %v7551_v4 }
 0xafe   : > { %2803 = vmatpush.msrb.mxu3 %v5941_v58  ;;  %2773 = vmatpush.msrb.mxu2 %v7549_v49 }
 0xaff   : > { %6004 = vrot.lane.b32.xlu0 %v7555_v43, %s6634_s14  ;;  %6009 = vrot.lane.b32.xlu1 %v7569_v21, %s6634_s14  ;;  %v5950_v1 = vpop.permute.xlu2 %5949  ;;  %v5946_v43 = vunpack.i.l.bf16 %v5945_v16  ;;  %v5956_v21 = vunpack.i.l.bf16 %v5955_v35 }
 0xb00   : > { %v5952_v32 = vunpack.i.h.bf16 %v5950_v1  ;;  %v5951_v12 = vunpack.i.l.bf16 %v5950_v1  ;;  %2804 = vmatpush.msrb.mxu3 %v5942_v33  ;;  %2774 = vmatpush.msrb.mxu2 %v7565_v18 }
 0xb02   : > { %2842 = vmatpush.msrb.mxu0 %v5951_v12  ;;  %2805 = vmatpush.msrb.mxu3 %v5946_v43 }
 0xb03   : > { %2775 = vmatpush.msrb.mxu2 %v7563_v50 }
 0xb04   : > { %2843 = vmatpush.msrb.mxu0 %v5952_v32  ;;  %2806 = vmatpush.msrb.mxu3 %v5947_v6 }
 0xb06   : > { %2807 = vmatpush.msrb.mxu3 %v5956_v21  ;;  %2844 = vmatpush.msrb.mxu0 %v5961_v39 }
 0xb07   : > { %v5975_v30 = vpop.permute.xlu2 %5974 }
 0xb08   : > { %2808 = vmatpush.msrb.mxu3 %v5957_v44  ;;  %2845 = vmatpush.msrb.mxu0 %v5962_v37  ;;  %v5976_v18 = vunpack.i.l.bf16 %v5975_v30 }
 0xb0a   : > { %2846 = vmatpush.msrb.mxu0 %v5971_v24  ;;  %v7859_v24 = vld [vmem:[#allocation3 + $0x1f0] sm:$0xff] }
 0xb0c   : > { %2847 = vmatpush.msrb.mxu0 %v5972_v61  ;;  %v7857_v61 = vld [vmem:[#allocation3 + $0x1d8] sm:$0xff] }
 0xb41   : > { %v2544_v62 = vpop.permute.xlu2 %2543 }
 0xb42   : > { %v2553_v4 = vmax.f32 %v7767_v19, %v2544_v62  ;;  %v7877_v62 = vld [vmem:[#allocation3 + $0x1c0] sm:$0xff] }
 0xb49   : > { %v2540_v38 = vpop.permute.xlu0 %2539 }
 0xb4a   : > { %v2551_v42 = vmax.f32 %v7755_v9, %v2540_v38  ;;  %v5985_v50 = vpop.permute.xlu2 %5984  ;;  %v5977_v9 = vunpack.i.h.bf16 %v5975_v30  ;;  %v7863_v38 = vpack.i.bf16 %v7855_v52, %v7857_v61 }
 0xb4b   : > { %v5986_v26 = vunpack.i.l.bf16 %v5985_v50  ;;  %v5987_v1 = vunpack.i.h.bf16 %v5985_v50 }
 0xb4c   : > { %5336 = vmatmul.msk.f32.vlgmr.msra.gmra.mxu2 %vm1132_vm8, %v2551_v42  ;;  %v7865_v42 = vld [vmem:[#allocation3 + $0x1f8] sm:$0xff]  ;;  %6034 = vrot.lane.b32.xlu1 %v7863_v38, %s6635_s23 }
 0xb4d   : > { %v7869_v30 = vpack.i.bf16 %v7859_v24, %v7865_v42 }
 0xb4f   : > { %6014 = vrot.lane.b32.xlu2 %v7869_v30, %s6635_s23  ;;  %6019 = vrot.lane.b32.xlu0 %v7869_v30, %s6634_s14 }
 0xb51   : > { %v2542_v22 = vpop.permute.xlu0 %2541 }
 0xb52   : > { %v2552_v0 = vmax.f32 %v7759_v45, %v2542_v22  ;;  %v6000_v19 = vpop.permute.xlu2 %5999 }
 0xb53   : > { %v6001_v16 = vunpack.i.l.bf16 %v6000_v19 }
 0xb54   : > { %5337 = vmatmul.msk.f32.gmra.mxu2 %vm1132_vm8, %v2552_v0 }
 0xb59   : > { %v5965_v2 = vpop.permute.xlu0 %5964 }
 0xb5a   : > { %v5966_v49 = vunpack.i.l.bf16 %v5965_v2  ;;  %v5967_v55 = vunpack.i.h.bf16 %v5965_v2  ;;  %v7879_v2 = vld [vmem:[#allocation3 + $0x1c8] sm:$0xff] }
 0xb5c   : > { %5338 = vmatmul.msk.f32.gmra.mxu2 %vm1132_vm8, %v2553_v4  ;;  %2809 = vmatpush.msrb.mxu3 %v5966_v49  ;;  %v7881_v4 = vld [vmem:[#allocation3 + $0x1e0] sm:$0xff]  ;;  %v7885_v49 = vpack.i.bf16 %v7877_v62, %v7879_v2 }
 0xb5e   : > { %2810 = vmatpush.msrb.mxu3 %v5967_v55  ;;  %v7887_v55 = vld [vmem:[#allocation3 + $0x1e8] sm:$0xff]  ;;  %6044 = vrot.lane.b32.xlu1 %v7885_v49, %s6635_s23 }
 0xb60   : > { %2811 = vmatpush.msrb.mxu3 %v5976_v18  ;;  %v7891_v18 = vpack.i.bf16 %v7881_v4, %v7887_v55 }
 0xb61   : > { %v2546_v46 = vpop.permute.xlu1 %2545  ;;  %v5980_v28 = vpop.permute.xlu0 %5979 }
 0xb62   : > { %v2554_v45 = vmax.f32 %v7773_v31, %v2546_v46  ;;  %v5981_v57 = vunpack.i.l.bf16 %v5980_v28  ;;  %2812 = vmatpush.msrb.mxu3 %v5977_v9  ;;  %v5982_v32 = vunpack.i.h.bf16 %v5980_v28  ;;  %v6002_v31 = vunpack.i.h.bf16 %v6000_v19  ;;  %6024 = vrot.lane.b32.xlu2 %v7891_v18, %s6635_s23  ;;  %v8898_v28 = vld [vmem:[#allocation24_spill] sm:$0xff] }
 0xb63   : > { %6029 = vrot.lane.b32.xlu0 %v7891_v18, %s6634_s14 }
 0xb64   : > { %5339 = vmatmul.msk.f32.gmra.mxu2 %vm1132_vm8, %v2554_v45  ;;  %2848 = vmatpush.msrb.mxu0 %v5981_v57 }
 0xb65   : > { %2813 = vmatpush.msrb.mxu3 %v5986_v26 }
 0xb66   : > { %2849 = vmatpush.msrb.mxu0 %v5982_v32 }
 0xb67   : > { %2814 = vmatpush.msrb.mxu3 %v5987_v1 }
 0xb69   : > { %v5990_v12 = vpop.permute.xlu0 %5989  ;;  %v5995_v3 = vpop.permute.xlu1 %5994 }
 0xb6a   : > { %v5991_v40 = vunpack.i.l.bf16 %v5990_v12  ;;  %v5997_v7 = vunpack.i.h.bf16 %v5995_v3  ;;  %v5996_v58 = vunpack.i.l.bf16 %v5995_v3  ;;  %v5992_v33 = vunpack.i.h.bf16 %v5990_v12  ;;  %6039 = vrot.lane.b32.xlu2 %v7863_v38, %s6634_s14 }
 0xb6b   : > { %6054 = vrot.lane.b32.xlu0 %v8898_v28, %s6635_s23 }
 0xb6c   : > { %2850 = vmatpush.msrb.mxu0 %v5991_v40  ;;  %2815 = vmatpush.msrb.mxu3 %v5996_v58 }
 0xb6d   : > { %2776 = vmatmul.f32.vlgmr.msrb.gmra.mxu2 %v7624_v14  ;;  %v8887_v14 = vld [vmem:[#allocation20_spill] sm:$0xff] }
 0xb6e   : > { %2851 = vmatpush.msrb.mxu0 %v5992_v33  ;;  %2816 = vmatpush.msrb.mxu3 %v5997_v7 }
 0xb6f   : > { %2817 = vmatmul.f32.vlgmr.msrb.gmra.mxu3 %v7646_v17  ;;  %v8889_v17 = vld [vmem:[#allocation21_spill] sm:$0xff] }
 0xb70   : > { %2852 = vmatpush.msrb.mxu0 %v6001_v16 }
 0xb71   : > { %v6005_v6 = vpop.permute.xlu0 %6004  ;;  %v6010_v43 = vpop.permute.xlu1 %6009 }
 0xb72   : > { %v6006_v35 = vunpack.i.l.bf16 %v6005_v6  ;;  %2853 = vmatpush.msrb.mxu0 %v6002_v31  ;;  %v6007_v21 = vunpack.i.h.bf16 %v6005_v6  ;;  %v6011_v44 = vunpack.i.l.bf16 %v6010_v43  ;;  %v6012_v8 = vunpack.i.h.bf16 %v6010_v43  ;;  %6049 = vrot.lane.b32.xlu2 %v7885_v49, %s6634_s14 }
 0xb74   : > { %2854 = vmatpush.msrb.mxu0 %v6006_v35 }
 0xb75   : > { %2779 = vmatmul.f32.gmra.mxu2 %v7629_v27  ;;  %v8888_v27 = vld [vmem:[#allocation15_spill] sm:$0xff] }
 0xb76   : > { %2855 = vmatpush.msrb.mxu0 %v6007_v21 }
 0xb77   : > { %2820 = vmatmul.f32.gmra.mxu3 %v7655_v25  ;;  %v8892_v25 = vld [vmem:[#allocation13_spill] sm:$0xff] }
 0xb78   : > { %2856 = vmatpush.msrb.mxu0 %v6011_v44 }
 0xb7a   : > { %2857 = vmatpush.msrb.mxu0 %v6012_v8 }
 0xb7b   : > { %2858 = vmatmul.f32.vlgmr.msrb.gmra.mxu0 %v7649_v15  ;;  %v8891_v15 = vld [vmem:[#allocation18_spill] sm:$0xff] }
 0xb7d   : > { %2782 = vmatmul.f32.gmra.mxu2 %v7633_v51  ;;  %v8890_v51 = vld [vmem:[#allocation19_spill] sm:$0xff] }
 0xb7f   : > { %2823 = vmatmul.f32.gmra.mxu3 %v7664_v34  ;;  %v8895_v34 = vld [vmem:[#allocation22_spill] sm:$0xff] }
 0xb83   : > { %2861 = vmatmul.f32.gmra.mxu0 %v7658_v54  ;;  %v8894_v54 = vld [vmem:[#allocation17_spill] sm:$0xff] }
 0xb85   : > { %2785 = vmatmul.f32.gmra.mxu2 %v7638_v13  ;;  %v8893_v13 = vld [vmem:[#allocation14_spill] sm:$0xff] }
 0xb87   : > { %2826 = vmatmul.f32.gmra.mxu3 %v7673_v60 }
 0xb8b   : > { %2864 = vmatmul.f32.gmra.mxu0 %v7667_v23  ;;  %v8897_v23 = vld [vmem:[#allocation23_spill] sm:$0xff] }
 0xb8d   : > { %2788 = vmatmul.f32.gmra.mxu2 %v7643_v36  ;;  %v8896_v36 = vld [vmem:[#allocation16_spill] sm:$0xff] }
 0xb8f   : > { %2829 = vmatmul.f32.gmra.mxu3 %v7679_v48 }
 0xb93   : > { %2867 = vmatmul.f32.gmra.mxu0 %v8887_v14 }
 0xb95   : > { %2791 = vmatmul.f32.gmra.mxu2 %v8888_v27 }
 0xb97   : > { %2832 = vmatmul.f32.gmra.mxu3 %v8889_v17 }
 0xb9b   : > { %2870 = vmatmul.f32.gmra.mxu0 %v8890_v51 }
 0xb9d   : > { %2794 = vmatmul.f32.gmra.mxu2 %v8891_v15 }
 0xb9f   : > { %2835 = vmatmul.f32.gmra.mxu3 %v8892_v25 }
 0xba3   : > { %2873 = vmatmul.f32.gmra.mxu0 %v8893_v13 }
 0xba5   : > { %2797 = vmatmul.f32.gmra.mxu2 %v8894_v54 }
 0xba7   : > { %2838 = vmatmul.f32.gmra.mxu3 %v8895_v34 }
 0xbab   : > { %2876 = vmatmul.f32.gmra.mxu0 %v8896_v36 }
 0xbb3   : > { %2879 = vmatmul.f32.gmra.mxu0 %v8897_v23 }
 0xbcf   : > { %v2590_v60 = vpop.f32.mrf.mxu2 }
 0xbd0   : > { %2603 = vst.msk [vmem:[#allocation4 + $0x80] sm:$0xff] %vm1178_vm9, %v2590_v60 }
 0xbd7   : > { %v2593_v48 = vpop.f32.mrf.mxu2 }
 0xbd8   : > { %2604 = vst.msk [vmem:[#allocation4 + $0x88] sm:$0xff] %vm1178_vm9, %v2593_v48 }
 0xbdf   : > { %v2596_v37 = vpop.f32.mrf.mxu2 }
 0xbe0   : > { %2605 = vst.msk [vmem:[#allocation4 + $0x90] sm:$0xff] %vm1178_vm9, %v2596_v37 }
 0xbe7   : > { %v2599_v39 = vpop.f32.mrf.mxu2 }
 0xbe8   : > { %2606 = vst.msk [vmem:[#allocation4 + $0x98] sm:$0xff] %vm1178_vm9, %v2599_v39  ;;  %v2913_v39 = vld [vmem:[%s8777_s8 + $0x10] sm:$0x3] }
 0xbe9   : > { %5340 = vmatpush.msk.msrb.mxu1 %vm787_vm5, %v2913_v39 }
 0xbeb   : > { %2943 = vmatpush.msrb.mxu1 %v7790_v5 }
 0xbed   : > { %2944 = vmatpush.msrb.mxu1 %v7800_v41  ;;  %v6015_v41 = vpop.permute.xlu2 %6014 }
 0xbef   : > { %3116 = vmatpush.msra.mxu1 %v7865_v42 }
 0xbf0   : > { %v2777_v22 = vpop.f32.mrf.mxu2 }
 0xbf1   : > { %3117 = vmatpush.msra.mxu1 %v7859_v24 }
 0xbf2   : > { %v2818_v0 = vpop.f32.mrf.mxu3 }
 0xbf3   : > { %v2819_v7 = vadd.f32 %v2818_v0, %v2777_v22  ;;  %3118 = vmatpush.msra.mxu1 %v7887_v55 }
 0xbf5   : > { %3119 = vmatpush.msra.mxu1 %v7881_v4 }
 0xbf7   : > { %3120 = vmatpush.msra.mxu1 %v7857_v61 }
 0xbf8   : > { %v2859_v50 = vpop.f32.mrf.mxu0  ;;  %v2780_v9 = vpop.f32.mrf.mxu2 }
 0xbf9   : > { %v2860_v31 = vadd.f32 %v2859_v50, %v2819_v7  ;;  %3121 = vmatpush.msra.mxu1 %v7855_v52 }
 0xbfa   : > { %v2821_v46 = vpop.f32.mrf.mxu3 }
 0xbfb   : > { %v2822_v21 = vadd.f32 %v2821_v46, %v2780_v9  ;;  %v8899_v46 = vld [vmem:[#allocation26_spill] sm:$0xff]  ;;  %3122 = vmatpush.msra.mxu1 %v7879_v2 }
 0xbfd   : > { %3123 = vmatpush.msra.mxu1 %v7877_v62 }
 0xbff   : > { %3124 = vmatpush.msra.mxu1 %v7708_v63  ;;  %v6025_v63 = vpop.permute.xlu2 %6024 }
 0xc00   : > { %v2862_v26 = vpop.f32.mrf.mxu0  ;;  %v2783_v45 = vpop.f32.mrf.mxu2 }
 0xc01   : > { %v2863_v17 = vadd.f32 %v2862_v26, %v2822_v21  ;;  %3125 = vmatpush.msra.mxu1 %v7706_v56  ;;  %v6026_v56 = vunpack.i.l.bf16 %v6025_v63 }
 0xc02   : > { %v2824_v57 = vpop.f32.mrf.mxu3 }
 0xc03   : > { %v2825_v13 = vadd.f32 %v2824_v57, %v2783_v45  ;;  %3126 = vmatpush.msra.mxu1 %v7739_v59  ;;  %v6035_v59 = vpop.permute.xlu1 %6034 }
 0xc05   : > { %3127 = vmatpush.msra.mxu1 %v7737_v10  ;;  %v6037_v10 = vunpack.i.h.bf16 %v6035_v59 }
 0xc07   : > { %3128 = vmatpush.msra.mxu1 %v7719_v47  ;;  %v6040_v47 = vpop.permute.xlu2 %6039 }
 0xc08   : > { %v2865_v1 = vpop.f32.mrf.mxu0  ;;  %v2786_v32 = vpop.f32.mrf.mxu2 }
 0xc09   : > { %v2866_v23 = vadd.f32 %v2865_v1, %v2825_v13  ;;  %v8900_v1 = vld [vmem:[#allocation25_spill] sm:$0xff]  ;;  %3129 = vmatpush.msra.mxu1 %v7717_v29 }
 0xc0a   : > { %v2827_v19 = vpop.f32.mrf.mxu3 }
 0xc0b   : > { %v2828_v0 = vadd.f32 %v2827_v19, %v2786_v32  ;;  %v6017_v32 = vunpack.i.h.bf16 %v6015_v41  ;;  %v6016_v19 = vunpack.i.l.bf16 %v6015_v41  ;;  %3130 = vmatpush.msra.mxu1 %v7727_v53  ;;  %v6045_v29 = vpop.permute.xlu1 %6044 }
 0xc0c   : > { %v6047_v53 = vunpack.i.h.bf16 %v6045_v29 }
 0xc0d   : > { %3157 = vmatpush.msra.mxu2 %v6016_v19  ;;  %3131 = vmatpush.msra.mxu1 %v7725_v11  ;;  %v7964_v19 = vld [vmem:[#allocation8 + $0x8] sm:$0xff] }
 0xc0f   : > { %3158 = vmatpush.msra.mxu2 %v6017_v32 }
 0xc10   : > { %v2868_v12 = vpop.f32.mrf.mxu0  ;;  %v2789_v3 = vpop.f32.mrf.mxu2 }
 0xc11   : > { %v2869_v26 = vadd.f32 %v2868_v12, %v2828_v0  ;;  %3159 = vmatpush.msra.mxu2 %v6026_v56  ;;  %v6036_v12 = vunpack.i.l.bf16 %v6035_v59  ;;  %v7968_v56 = vld [vmem:[#allocation8] sm:$0xff] }
 0xc12   : > { %v2830_v40 = vpop.f32.mrf.mxu3 }
 0xc13   : > { %v2831_v58 = vadd.f32 %v2830_v40, %v2789_v3  ;;  %v6020_v3 = vpop.permute.xlu0 %6019 }
 0xc14   : > { %v6022_v40 = vunpack.i.h.bf16 %v6020_v3  ;;  %v6021_v7 = vunpack.i.l.bf16 %v6020_v3  ;;  %v7979_v3 = vld [vmem:[#allocation8 + $0x28] sm:$0xff] }
 0xc16   : > { %3198 = vmatpush.msra.mxu3 %v6021_v7  ;;  %v7986_v7 = vld [vmem:[#allocation8 + $0x30] sm:$0xff] }
 0xc18   : > { %v2871_v33 = vpop.f32.mrf.mxu0  ;;  %v2792_v16 = vpop.f32.mrf.mxu2  ;;  %3199 = vmatpush.msra.mxu3 %v6022_v40  ;;  %v7981_v40 = vld [vmem:[#allocation8 + $0x38] sm:$0xff] }
 0xc19   : > { %v2872_v6 = vadd.f32 %v2871_v33, %v2831_v58  ;;  %v6046_v58 = vunpack.i.l.bf16 %v6045_v29  ;;  %v7990_v29 = vld [vmem:[#allocation8 + $0x50] sm:$0xff] }
 0xc1a   : > { %v2833_v43 = vpop.f32.mrf.mxu3 }
 0xc1b   : > { %v2883_v35 = vmax.f32 %v2860_v31, %v2872_v6  ;;  %v2834_v44 = vadd.f32 %v2833_v43, %v2792_v16  ;;  %v6030_v11 = vpop.permute.xlu0 %6029  ;;  %v6041_v31 = vunpack.i.l.bf16 %v6040_v47  ;;  %v6042_v6 = vunpack.i.h.bf16 %v6040_v47  ;;  %v6050_v43 = vpop.permute.xlu2 %6049  ;;  %v7988_v47 = vld [vmem:[#allocation8 + $0x40] sm:$0xff] }
 0xc1c   : > { %v6032_v33 = vunpack.i.h.bf16 %v6030_v11  ;;  %v6031_v16 = vunpack.i.l.bf16 %v6030_v11  ;;  %v7999_v11 = vld [vmem:[#allocation8 + $0x68] sm:$0xff] }
 0xc1d   : > { %v7905_v8 = vmax.f32 %v2883_v35, 0.0  ;;  %v6051_v35 = vunpack.i.l.bf16 %v6050_v43  ;;  %8901 = vst [vmem:[#allocation20_spill] sm:$0xff] %v7999_v11 }
 0xc1e   : > { %3200 = vmatpush.msra.mxu3 %v6031_v16  ;;  %v8006_v16 = vld [vmem:[#allocation8 + $0x70] sm:$0xff] }
 0xc1f   : > { %2895 = vrot.lane.b32.xlu1 %v7905_v8, %s6635_s23 }
 0xc20   : > { %v2874_v14 = vpop.f32.mrf.mxu0  ;;  %v2795_v27 = vpop.f32.mrf.mxu2  ;;  %3201 = vmatpush.msra.mxu3 %v6032_v33  ;;  %v8004_v33 = vld [vmem:[#allocation8 + $0x60] sm:$0xff] }
 0xc21   : > { %v2875_v51 = vadd.f32 %v2874_v14, %v2834_v44  ;;  %v6052_v44 = vunpack.i.h.bf16 %v6050_v43  ;;  %v8015_v43 = vld [vmem:[#allocation8 + $0x88] sm:$0xff] }
 0xc22   : > { %v2836_v15 = vpop.f32.mrf.mxu3  ;;  %3202 = vmatpush.msra.mxu3 %v6041_v31  ;;  %v8008_v31 = vld [vmem:[#allocation8 + $0x80] sm:$0xff]  ;;  %8904 = vst [vmem:[#allocation19_spill] sm:$0xff] %v8015_v43 }
 0xc23   : > { %v2884_v25 = vmax.f32 %v2863_v17, %v2875_v51  ;;  %v2837_v54 = vadd.f32 %v2836_v15, %v2795_v27  ;;  %v6055_v21 = vpop.permute.xlu0 %6054  ;;  %8902 = vst [vmem:[#allocation15_spill] sm:$0xff] %v8008_v31 }
 0xc24   : > { %v6057_v14 = vunpack.i.h.bf16 %v6055_v21  ;;  %v6056_v27 = vunpack.i.l.bf16 %v6055_v21  ;;  %3203 = vmatpush.msra.mxu3 %v6042_v6  ;;  %v8013_v6 = vld [vmem:[#allocation8 + $0x78] sm:$0xff]  ;;  %v8022_v21 = vld [vmem:[#allocation8 + $0x90] sm:$0xff] }
 0xc25   : > { %v7909_v34 = vmax.f32 %v2884_v25, 0.0  ;;  %8903 = vst [vmem:[#allocation21_spill] sm:$0xff] %v8013_v6 }
 0xc26   : > { %3204 = vmatpush.msra.mxu3 %v6051_v35  ;;  %v8017_v35 = vld [vmem:[#allocation8 + $0x98] sm:$0xff]  ;;  %8906 = vst [vmem:[#allocation13_spill] sm:$0xff] %v8022_v21 }
 0xc27   : > { %2897 = vrot.lane.b32.xlu0 %v7909_v34, %s6635_s23  ;;  %6059 = vrot.lane.b32.xlu1 %v8898_v28, %s6634_s14  ;;  %8905 = vst [vmem:[#allocation18_spill] sm:$0xff] %v8017_v35 }
 0xc28   : > { %v2877_v36 = vpop.f32.mrf.mxu0  ;;  %v2798_v48 = vpop.f32.mrf.mxu2  ;;  %3205 = vmatpush.msra.mxu3 %v6052_v44  ;;  %v8024_v44 = vld [vmem:[#allocation8 + $0xa0] sm:$0xff] }
 0xc29   : > { %v2878_v60 = vadd.f32 %v2877_v36, %v2837_v54  ;;  %8907 = vst [vmem:[#allocation14_spill] sm:$0xff] %v8024_v44 }
 0xc2a   : > { %v2839_v37 = vpop.f32.mrf.mxu3 }
 0xc2b   : > { %v2885_v22 = vmax.f32 %v2866_v23, %v2878_v60  ;;  %v2840_v50 = vadd.f32 %v2839_v37, %v2798_v48 }
 0xc2d   : > { %v7919_v9 = vmax.f32 %v2885_v22, 0.0 }
 0xc2f   : > { %2899 = vrot.lane.b32.xlu2 %v7919_v9, %s6635_s23  ;;  %6064 = vrot.lane.b32.xlu0 %v8899_v46, %s6635_s23 }
 0xc30   : > { %6069 = vrot.lane.b32.xlu1 %v8899_v46, %s6634_s14  ;;  %v2880_v28 = vpop.f32.mrf.mxu0 }
 0xc31   : > { %v2881_v45 = vadd.f32 %v2880_v28, %v2840_v50 }
 0xc33   : > { %v2886_v57 = vmax.f32 %v2869_v26, %v2881_v45 }
 0xc35   : > { %v7931_v5 = vmax.f32 %v2886_v57, 0.0 }
 0xc37   : > { %6079 = vrot.lane.b32.xlu0 %v8900_v1, %s6634_s14  ;;  %6074 = vrot.lane.b32.xlu2 %v8900_v1, %s6635_s23 }
 0xc38   : > { %2901 = vrot.lane.b32.xlu1 %v7931_v5, %s6635_s23 }
 0xc3f   : > { %6089 = vrot.lane.b32.xlu0 %v7733_v20, %s6634_s14  ;;  %6084 = vrot.lane.b32.xlu2 %v7733_v20, %s6635_s23  ;;  %v6027_v20 = vunpack.i.h.bf16 %v6025_v63 }
 0xc41   : > { %3160 = vmatpush.msra.mxu2 %v6027_v20 }
 0xc43   : > { %3161 = vmatpush.msra.mxu2 %v6036_v12  ;;  %v7977_v12 = vld [vmem:[#allocation8 + $0x18] sm:$0xff] }
 0xc45   : > { %3162 = vmatpush.msra.mxu2 %v6037_v10  ;;  %v7970_v10 = vld [vmem:[#allocation8 + $0x10] sm:$0xff] }
 0xc47   : > { %3163 = vmatpush.msra.mxu2 %v6046_v58  ;;  %v7997_v58 = vld [vmem:[#allocation8 + $0x58] sm:$0xff] }
 0xc49   : > { %3164 = vmatpush.msra.mxu2 %v6047_v53  ;;  %v7995_v53 = vld [vmem:[#allocation8 + $0x48] sm:$0xff] }
 0xc4b   : > { %3165 = vmatpush.msra.mxu2 %v6056_v27  ;;  %v8031_v27 = vld [vmem:[#allocation8 + $0xa8] sm:$0xff] }
 0xc4c   : > { %8909 = vst [vmem:[#allocation22_spill] sm:$0xff] %v8031_v27 }
 0xc4d   : > { %3166 = vmatpush.msra.mxu2 %v6057_v14  ;;  %v8026_v14 = vld [vmem:[#allocation8 + $0xb0] sm:$0xff] }
 0xc4e   : > { %8908 = vst [vmem:[#allocation17_spill] sm:$0xff] %v8026_v14 }
 0xc89   : > { %v2900_v15 = vpop.permute.xlu2 %2899 }
 0xc8a   : > { %v2909_v37 = vmax.f32 %v7919_v9, %v2900_v15 }
 0xc91   : > { %v2896_v17 = vpop.permute.xlu1 %2895  ;;  %v6075_v60 = vpop.permute.xlu2 %6074 }
 0xc92   : > { %v2907_v51 = vmax.f32 %v7905_v8, %v2896_v17  ;;  %v6076_v46 = vunpack.i.l.bf16 %v6075_v60  ;;  %v6077_v28 = vunpack.i.h.bf16 %v6075_v60  ;;  %v8033_v17 = vld [vmem:[#allocation8 + $0xb8] sm:$0xff] }
 0xc93   : > { %8910 = vst [vmem:[#allocation16_spill] sm:$0xff] %v8033_v17 }
 0xc94   : > { %5341 = vmatmul.msk.f32.vlgmr.msrb.gmra.mxu1 %vm1132_vm8, %v2907_v51 }
 0xc99   : > { %v2898_v25 = vpop.permute.xlu0 %2897  ;;  %v6060_v13 = vpop.permute.xlu1 %6059 }
 0xc9a   : > { %v2908_v54 = vmax.f32 %v7909_v34, %v2898_v25  ;;  %v6062_v36 = vunpack.i.h.bf16 %v6060_v13  ;;  %v6061_v23 = vunpack.i.l.bf16 %v6060_v13  ;;  %v6085_v34 = vpop.permute.xlu2 %6084 }
 0xc9b   : > { %v6086_v26 = vunpack.i.l.bf16 %v6085_v34  ;;  %v6087_v9 = vunpack.i.h.bf16 %v6085_v34 }
 0xc9c   : > { %5342 = vmatmul.msk.f32.gmra.mxu1 %vm1132_vm8, %v2908_v54  ;;  %3206 = vmatpush.msra.mxu3 %v6061_v23  ;;  %v8041_v54 = vld [vmem:[#allocation3 + $0x220] sm:$0xff]  ;;  %v8045_v23 = vld [vmem:[#allocation3 + $0x230] sm:$0xff] }
 0xc9e   : > { %3207 = vmatpush.msra.mxu3 %v6062_v36  ;;  %v8043_v36 = vld [vmem:[#allocation3 + $0x228] sm:$0xff] }
 0xc9f   : > { %v8049_v60 = vpack.i.bf16 %v8041_v54, %v8043_v36 }
 0xca1   : > { %v6065_v48 = vpop.permute.xlu0 %6064  ;;  %8911 = vst [vmem:[#allocation23_spill] sm:$0xff] %v8049_v60  ;;  %6109 = vrot.lane.b32.xlu2 %v8049_v60, %s6635_s23 }
 0xca2   : > { %v6066_v39 = vunpack.i.l.bf16 %v6065_v48  ;;  %v6070_v22 = vpop.permute.xlu1 %6069  ;;  %v6067_v50 = vunpack.i.h.bf16 %v6065_v48  ;;  %v8051_v48 = vld [vmem:[#allocation3 + $0x238] sm:$0xff] }
 0xca3   : > { %v6072_v8 = vunpack.i.h.bf16 %v6070_v22  ;;  %v6071_v0 = vunpack.i.l.bf16 %v6070_v22 }
 0xca4   : > { %5343 = vmatmul.msk.f32.gmra.mxu1 %vm1132_vm8, %v2909_v37  ;;  %3167 = vmatpush.msra.mxu2 %v6066_v39  ;;  %v8055_v37 = vpack.i.bf16 %v8045_v23, %v8051_v48 }
 0xca5   : > { %3208 = vmatpush.msra.mxu3 %v6071_v0  ;;  %v8065_v0 = vld [vmem:[#allocation3 + $0x218] sm:$0xff] }
 0xca6   : > { %3168 = vmatpush.msra.mxu2 %v6067_v50  ;;  %8912 = vst [vmem:[#allocation24_spill] sm:$0xff] %v8055_v37  ;;  %6094 = vrot.lane.b32.xlu1 %v8055_v37, %s6634_s14 }
 0xca7   : > { %3209 = vmatpush.msra.mxu3 %v6072_v8  ;;  %6099 = vrot.lane.b32.xlu0 %v8055_v37, %s6635_s23  ;;  %v8063_v8 = vld [vmem:[#allocation3 + $0x210] sm:$0xff] }
 0xca8   : > { %3169 = vmatpush.msra.mxu2 %v6076_v46  ;;  %v8069_v50 = vpack.i.bf16 %v8063_v8, %v8065_v0 }
 0xca9   : > { %v6080_v45 = vpop.permute.xlu0 %6079 }
 0xcaa   : > { %v6081_v57 = vunpack.i.l.bf16 %v6080_v45  ;;  %v2902_v1 = vpop.permute.xlu1 %2901  ;;  %3170 = vmatpush.msra.mxu2 %v6077_v28  ;;  %v6082_v32 = vunpack.i.h.bf16 %v6080_v45  ;;  %8913 = vst [vmem:[#allocation26_spill] sm:$0xff] %v8069_v50  ;;  %6119 = vrot.lane.b32.xlu2 %v8069_v50, %s6635_s23  ;;  %v8079_v45 = vld [vmem:[#allocation3 + $0x208] sm:$0xff] }
 0xcab   : > { %v2910_v41 = vmax.f32 %v7931_v5, %v2902_v1  ;;  %v7972_v5 = vld [vmem:[#allocation8 + $0x20] sm:$0xff] }
 0xcac   : > { %3210 = vmatpush.msra.mxu3 %v6081_v57  ;;  %3171 = vmatpush.msra.mxu2 %v6086_v26  ;;  %v8077_v26 = vld [vmem:[#allocation3 + $0x200] sm:$0xff] }
 0xcad   : > { %5344 = vmatmul.msk.f32.gmra.mxu1 %vm1132_vm8, %v2910_v41  ;;  %v8083_v57 = vpack.i.bf16 %v8077_v26, %v8079_v45 }
 0xcae   : > { %3211 = vmatpush.msra.mxu3 %v6082_v32  ;;  %3172 = vmatpush.msra.mxu2 %v6087_v9 }
 0xcaf   : > { %3173 = vmatmul.f32.vlgmr.msra.gmra.mxu2 %v7964_v19  ;;  %6104 = vrot.lane.b32.xlu1 %v8049_v60, %s6634_s14  ;;  %8914 = vst [vmem:[#allocation25_spill] sm:$0xff] %v8083_v57 }
 0xcb0   : > { %6114 = vrot.lane.b32.xlu0 %v8069_v50, %s6634_s14 }
 0xcb1   : > { %v6090_v63 = vpop.permute.xlu0 %6089 }
 0xcb2   : > { %v6091_v20 = vunpack.i.l.bf16 %v6090_v63  ;;  %v6092_v59 = vunpack.i.h.bf16 %v6090_v63 }
 0xcb4   : > { %3212 = vmatpush.msra.mxu3 %v6091_v20 }
 0xcb5   : > { %3132 = vmatmul.f32.vlgmr.msra.gmra.mxu1 %v7968_v56 }
 0xcb6   : > { %3213 = vmatpush.msra.mxu3 %v6092_v59 }
 0xcb7   : > { %3214 = vmatmul.f32.vlgmr.msra.gmra.mxu3 %v7970_v10  ;;  %3176 = vmatmul.f32.gmra.mxu2 %v7972_v5 }
 0xcb8   : > { %6129 = vrot.lane.b32.xlu1 %v8083_v57, %s6635_s23  ;;  %6124 = vrot.lane.b32.xlu0 %v8083_v57, %s6634_s14 }
 0xcbd   : > { %3135 = vmatmul.f32.gmra.mxu1 %v7977_v12 }
 0xcbf   : > { %3217 = vmatmul.f32.gmra.mxu3 %v7979_v3  ;;  %3179 = vmatmul.f32.gmra.mxu2 %v7981_v40 }
 0xcc5   : > { %3138 = vmatmul.f32.gmra.mxu1 %v7986_v7 }
 0xcc7   : > { %3220 = vmatmul.f32.gmra.mxu3 %v7988_v47  ;;  %3182 = vmatmul.f32.gmra.mxu2 %v7990_v29 }
 0xccd   : > { %3141 = vmatmul.f32.gmra.mxu1 %v7995_v53 }
 0xccf   : > { %3223 = vmatmul.f32.gmra.mxu3 %v7997_v58  ;;  %3185 = vmatmul.f32.gmra.mxu2 %v7999_v11 }
 0xcd5   : > { %3144 = vmatmul.f32.gmra.mxu1 %v8004_v33 }
 0xcd7   : > { %3226 = vmatmul.f32.gmra.mxu3 %v8006_v16  ;;  %3188 = vmatmul.f32.gmra.mxu2 %v8008_v31 }
 0xcdd   : > { %3147 = vmatmul.f32.gmra.mxu1 %v8013_v6 }
 0xcdf   : > { %3229 = vmatmul.f32.gmra.mxu3 %v8015_v43  ;;  %3191 = vmatmul.f32.gmra.mxu2 %v8017_v35 }
 0xce5   : > { %3150 = vmatmul.f32.gmra.mxu1 %v8022_v21 }
 0xce7   : > { %3232 = vmatmul.f32.gmra.mxu3 %v8024_v44  ;;  %3194 = vmatmul.f32.gmra.mxu2 %v8026_v14 }
 0xced   : > { %3153 = vmatmul.f32.gmra.mxu1 %v8031_v27 }
 0xcef   : > { %3235 = vmatmul.f32.gmra.mxu3 %v8033_v17 }
 0xd11   : > { %v2946_v51 = vpop.f32.mrf.mxu1 }
 0xd12   : > { %2959 = vst.msk [vmem:[#allocation4 + $0xa0] sm:$0xff] %vm1178_vm9, %v2946_v51 }
 0xd19   : > { %v2949_v15 = vpop.f32.mrf.mxu1 }
 0xd1a   : > { %2960 = vst.msk [vmem:[#allocation4 + $0xa8] sm:$0xff] %vm1178_vm9, %v2949_v15 }
 0xd21   : > { %v2952_v25 = vpop.f32.mrf.mxu1 }
 0xd22   : > { %2961 = vst.msk [vmem:[#allocation4 + $0xb0] sm:$0xff] %vm1178_vm9, %v2952_v25 }
 0xd2a   : > { %v2955_v13 = vpop.f32.mrf.mxu1 }
 0xd2b   : > { %2962 = vst.msk [vmem:[#allocation4 + $0xb8] sm:$0xff] %vm1178_vm9, %v2955_v13 }
 0xd32   : > { %v3133_v39 = vpop.f32.mrf.mxu1  ;;  %v3174_v22 = vpop.f32.mrf.mxu2 }
 0xd33   : > { %v3175_v25 = vadd.f32 %v3174_v22, %v3133_v39 }
 0xd3a   : > { %v3215_v46 = vpop.f32.mrf.mxu3  ;;  %v3136_v34 = vpop.f32.mrf.mxu1 }
 0xd3b   : > { %v3177_v28 = vpop.f32.mrf.mxu2  ;;  %v3216_v37 = vadd.f32 %v3215_v46, %v3175_v25 }
 0xd3c   : > { %v3178_v35 = vadd.f32 %v3177_v28, %v3136_v34 }
 0xd42   : > { %v3218_v1 = vpop.f32.mrf.mxu3  ;;  %v3139_v9 = vpop.f32.mrf.mxu1 }
 0xd43   : > { %v3180_v41 = vpop.f32.mrf.mxu2  ;;  %v3219_v43 = vadd.f32 %v3218_v1, %v3178_v35  ;;  %v6095_v1 = vpop.permute.xlu1 %6094 }
 0xd44   : > { %v3181_v22 = vadd.f32 %v3180_v41, %v3139_v9  ;;  %v6097_v9 = vunpack.i.h.bf16 %v6095_v1  ;;  %v6096_v41 = vunpack.i.l.bf16 %v6095_v1 }
 0xd46   : > { %3554 = vmatpush.msrb.mxu2 %v6096_v41 }
 0xd48   : > { %3555 = vmatpush.msrb.mxu2 %v6097_v9 }
 0xd4a   : > { %v3221_v32 = vpop.f32.mrf.mxu3  ;;  %v3142_v63 = vpop.f32.mrf.mxu1 }
 0xd4b   : > { %v3183_v20 = vpop.f32.mrf.mxu2 }
 0xd52   : > { %v3224_v59 = vpop.f32.mrf.mxu3  ;;  %v3145_v51 = vpop.f32.mrf.mxu1 }
 0xd53   : > { %v3186_v15 = vpop.f32.mrf.mxu2 }
 0xd54   : > { %v3187_v13 = vadd.f32 %v3186_v15, %v3145_v51 }
 0xd5a   : > { %v3227_v50 = vpop.f32.mrf.mxu3  ;;  %v3148_v60 = vpop.f32.mrf.mxu1 }
 0xd5b   : > { %v3228_v14 = vadd.f32 %v3227_v50, %v3187_v13  ;;  %v3189_v17 = vpop.f32.mrf.mxu2  ;;  %v6105_v13 = vpop.permute.xlu1 %6104 }
 0xd5c   : > { %v3190_v44 = vadd.f32 %v3189_v17, %v3148_v60  ;;  %v3222_v17 = vadd.f32 %v3221_v32, %v3181_v22  ;;  %v6107_v22 = vunpack.i.h.bf16 %v6105_v13 }
 0xd5d   : > { %v3239_v27 = vmax.f32 %v3216_v37, %v3228_v14  ;;  %v8114_v37 = vld [vmem:[%s8777_s8 + $0x8] sm:$0xff] }
 0xd5f   : > { %v8089_v57 = vmax.f32 %v3239_v27, 0.0  ;;  %v3269_v27 = vld [vmem:[%s8777_s8 + $0x10] sm:$0x3] }
 0xd60   : > { %5345 = vmatpush.msk.msra.mxu0 %vm787_vm5, %v3269_v27 }
 0xd61   : > { %3251 = vrot.lane.b32.xlu2 %v8089_v57, %s6635_s23 }
 0xd62   : > { %v3230_v21 = vpop.f32.mrf.mxu3  ;;  %v3151_v31 = vpop.f32.mrf.mxu1  ;;  %3299 = vmatpush.msra.mxu0 %v8114_v37 }
 0xd63   : > { %v3231_v6 = vadd.f32 %v3230_v21, %v3190_v44  ;;  %v3192_v11 = vpop.f32.mrf.mxu2 }
 0xd64   : > { %v3193_v51 = vadd.f32 %v3192_v11, %v3151_v31  ;;  %v3184_v31 = vadd.f32 %v3183_v20, %v3142_v63 }
 0xd65   : > { %v3240_v39 = vmax.f32 %v3219_v43, %v3231_v6 }
 0xd66   : > { %v3225_v50 = vadd.f32 %v3224_v59, %v3184_v31 }
 0xd67   : > { %v8093_v15 = vmax.f32 %v3240_v39, 0.0 }
 0xd69   : > { %3253 = vrot.lane.b32.xlu1 %v8093_v15, %s6635_s23  ;;  %6134 = vrot.lane.b32.xlu2 %v7869_v30, %s6634_s14 }
 0xd6a   : > { %v3233_v14 = vpop.f32.mrf.mxu3  ;;  %v3154_v6 = vpop.f32.mrf.mxu1 }
 0xd6b   : > { %v3234_v35 = vadd.f32 %v3233_v14, %v3193_v51  ;;  %v3195_v43 = vpop.f32.mrf.mxu2  ;;  %v6106_v51 = vunpack.i.l.bf16 %v6105_v13 }
 0xd6c   : > { %v3196_v44 = vadd.f32 %v3195_v43, %v3154_v6 }
 0xd6d   : > { %v3241_v11 = vmax.f32 %v3222_v17, %v3234_v35  ;;  %3556 = vmatpush.msrb.mxu2 %v6106_v51  ;;  %v6130_v35 = vpop.permute.xlu1 %6129 }
 0xd6e   : > { %v6132_v6 = vunpack.i.h.bf16 %v6130_v35  ;;  %v6131_v43 = vunpack.i.l.bf16 %v6130_v35  ;;  %v8181_v35 = vld [vmem:[#allocation4 + $0x60] sm:$0xff] }
 0xd6f   : > { %v8103_v21 = vmax.f32 %v3241_v11, 0.0  ;;  %3557 = vmatpush.msrb.mxu2 %v6107_v22 }
 0xd71   : > { %3255 = vrot.lane.b32.xlu0 %v8103_v21, %s6635_s23  ;;  %6139 = vrot.lane.b32.xlu1 %v7869_v30, %s6635_s23  ;;  %v8134_v30 = vld [vmem:[%s8777_s8] sm:$0xff] }
 0xd72   : > { %6144 = vrot.lane.b32.xlu2 %v7891_v18, %s6634_s14  ;;  %v3236_v60 = vpop.f32.mrf.mxu3  ;;  %3300 = vmatpush.msra.mxu0 %v8134_v30 }
 0xd73   : > { %v3237_v46 = vadd.f32 %v3236_v60, %v3196_v44 }
 0xd74   : > { %3472 = vmatpush.msrb.mxu0 %v8051_v48 }
 0xd75   : > { %v3242_v34 = vmax.f32 %v3225_v50, %v3237_v46 }
 0xd76   : > { %3473 = vmatpush.msrb.mxu0 %v8045_v23 }
 0xd77   : > { %v8117_v28 = vmax.f32 %v3242_v34, 0.0 }
 0xd78   : > { %3474 = vmatpush.msrb.mxu0 %v8043_v36 }
 0xd79   : > { %6149 = vrot.lane.b32.xlu0 %v7891_v18, %s6635_s23  ;;  %6154 = vrot.lane.b32.xlu1 %v7863_v38, %s6634_s14  ;;  %v6110_v18 = vpop.permute.xlu2 %6109 }
 0xd7a   : > { %3257 = vrot.lane.b32.xlu2 %v8117_v28, %s6635_s23  ;;  %3475 = vmatpush.msrb.mxu0 %v8041_v54  ;;  %v6111_v63 = vunpack.i.l.bf16 %v6110_v18  ;;  %v6112_v20 = vunpack.i.h.bf16 %v6110_v18 }
 0xd7c   : > { %3476 = vmatpush.msrb.mxu0 %v8065_v0 }
 0xd7e   : > { %3477 = vmatpush.msrb.mxu0 %v8063_v8 }
 0xd80   : > { %3478 = vmatpush.msrb.mxu0 %v8079_v45 }
 0xd81   : > { %6159 = vrot.lane.b32.xlu0 %v7863_v38, %s6635_s23  ;;  %6164 = vrot.lane.b32.xlu1 %v7885_v49, %s6634_s14  ;;  %v6100_v38 = vpop.permute.xlu0 %6099  ;;  %v6120_v59 = vpop.permute.xlu2 %6119 }
 0xd82   : > { %6169 = vrot.lane.b32.xlu2 %v7885_v49, %s6635_s23  ;;  %v6101_v32 = vunpack.i.l.bf16 %v6100_v38  ;;  %v6102_v49 = vunpack.i.h.bf16 %v6100_v38  ;;  %v6121_v25 = vunpack.i.l.bf16 %v6120_v59  ;;  %v6122_v39 = vunpack.i.h.bf16 %v6120_v59  ;;  %3479 = vmatpush.msrb.mxu0 %v8077_v26 }
 0xd84   : > { %3513 = vmatpush.msrb.mxu1 %v6101_v32  ;;  %3480 = vmatpush.msrb.mxu0 %v7865_v42 }
 0xd86   : > { %3514 = vmatpush.msrb.mxu1 %v6102_v49  ;;  %3481 = vmatpush.msrb.mxu0 %v7859_v24 }
 0xd88   : > { %3515 = vmatpush.msrb.mxu1 %v6111_v63  ;;  %3482 = vmatpush.msrb.mxu0 %v7887_v55 }
 0xd89   : > { %v6115_v14 = vpop.permute.xlu0 %6114 }
 0xd8a   : > { %3516 = vmatpush.msrb.mxu1 %v6112_v20  ;;  %v6116_v27 = vunpack.i.l.bf16 %v6115_v14  ;;  %v6117_v17 = vunpack.i.h.bf16 %v6115_v14  ;;  %3483 = vmatpush.msrb.mxu0 %v7881_v4  ;;  %v3981_v14 = vld [vmem:[%s8777_s8 + $0x10] sm:$0x3] }
 0xd8c   : > { %3517 = vmatpush.msrb.mxu1 %v6121_v25  ;;  %3558 = vmatpush.msrb.mxu2 %v6116_v27 }
 0xd8d   : > { %3484 = vmatpush.msrb.mxu0 %v7857_v61 }
 0xd8e   : > { %3518 = vmatpush.msrb.mxu1 %v6122_v39  ;;  %3559 = vmatpush.msrb.mxu2 %v6117_v17  ;;  %v8170_v17 = vld [vmem:[#allocation4 + $0x78] sm:$0xff] }
 0xd8f   : > { %3485 = vmatpush.msrb.mxu0 %v7855_v52 }
 0xd90   : > { %3519 = vmatpush.msrb.mxu1 %v6131_v43  ;;  %v8211_v43 = vld [vmem:[#allocation4 + $0x20] sm:$0xff] }
 0xd91   : > { %v6125_v11 = vpop.permute.xlu0 %6124  ;;  %3486 = vmatpush.msrb.mxu0 %v7879_v2 }
 0xd92   : > { %v6127_v31 = vunpack.i.h.bf16 %v6125_v11  ;;  %v6126_v44 = vunpack.i.l.bf16 %v6125_v11  ;;  %3520 = vmatpush.msrb.mxu1 %v6132_v6  ;;  %v8196_v6 = vld [vmem:[#allocation4 + $0x40] sm:$0xff] }
 0xd93   : > { %3487 = vmatpush.msrb.mxu0 %v7877_v62  ;;  %v8226_v11 = vld [vmem:[#allocation4] sm:$0xff] }
 0xd94   : > { %3560 = vmatpush.msrb.mxu2 %v6126_v44  ;;  %v8917_v44 = vld [vmem:[#allocation19_spill] sm:$0xff] }
 0xd96   : > { %3561 = vmatpush.msrb.mxu2 %v6127_v31  ;;  %v8916_v31 = vld [vmem:[#allocation21_spill] sm:$0xff] }
 0xdbb   : > { %v3252_v24 = vpop.permute.xlu2 %3251 }
 0xdbc   : > { %v3263_v42 = vmax.f32 %v8089_v57, %v3252_v24  ;;  %v8919_v24 = vld [vmem:[#allocation13_spill] sm:$0xff] }
 0xdbe   : > { %5346 = vmatmul.msk.f32.vlgmr.msra.gmra.mxu0 %vm1132_vm8, %v3263_v42  ;;  %v8920_v42 = vld [vmem:[#allocation14_spill] sm:$0xff] }
 0xdc3   : > { %v6135_v4 = vpop.permute.xlu2 %6134 }
 0xdc4   : > { %v6137_v55 = vunpack.i.h.bf16 %v6135_v4  ;;  %v6136_v60 = vunpack.i.l.bf16 %v6135_v4  ;;  %v8922_v4 = vld [vmem:[#allocation22_spill] sm:$0xff] }
 0xdc6   : > { %3562 = vmatpush.msrb.mxu2 %v6136_v60  ;;  %v8924_v60 = vld [vmem:[#allocation17_spill] sm:$0xff] }
 0xdc8   : > { %3563 = vmatpush.msrb.mxu2 %v6137_v55  ;;  %v8923_v55 = vld [vmem:[#allocation16_spill] sm:$0xff] }
 0xdcc   : > { %v6145_v61 = vpop.permute.xlu2 %6144 }
 0xdcd   : > { %v6147_v50 = vunpack.i.h.bf16 %v6145_v61  ;;  %v6146_v46 = vunpack.i.l.bf16 %v6145_v61 }
 0xdcf   : > { %3564 = vmatpush.msrb.mxu2 %v6146_v46 }
 0xdd1   : > { %3565 = vmatpush.msrb.mxu2 %v6147_v50 }
 0xdd4   : > { %v3258_v38 = vpop.permute.xlu2 %3257 }
 0xdd5   : > { %v3266_v32 = vmax.f32 %v8117_v28, %v3258_v38 }
 0xddb   : > { %v3254_v52 = vpop.permute.xlu1 %3253 }
 0xddc   : > { %v3264_v2 = vmax.f32 %v8093_v15, %v3254_v52 }
 0xdde   : > { %5347 = vmatmul.msk.f32.gmra.mxu0 %vm1132_vm8, %v3264_v2 }
 0xde3   : > { %v3256_v57 = vpop.permute.xlu0 %3255  ;;  %v6140_v34 = vpop.permute.xlu1 %6139 }
 0xde4   : > { %v3265_v62 = vmax.f32 %v8103_v21, %v3256_v57  ;;  %v6141_v18 = vunpack.i.l.bf16 %v6140_v34  ;;  %v6142_v1 = vunpack.i.h.bf16 %v6140_v34  ;;  %v6170_v21 = vpop.permute.xlu2 %6169  ;;  %v8243_v57 = vld [vmem:[#allocation3 + $0x270] sm:$0xff]  ;;  %v8245_v34 = vld [vmem:[#allocation3 + $0x278] sm:$0xff] }
 0xde5   : > { %v6171_v28 = vunpack.i.l.bf16 %v6170_v21  ;;  %v6172_v27 = vunpack.i.h.bf16 %v6170_v21 }
 0xde6   : > { %5348 = vmatmul.msk.f32.gmra.mxu0 %vm1132_vm8, %v3265_v62  ;;  %3521 = vmatpush.msrb.mxu1 %v6141_v18  ;;  %v6178_v62 = vpack.i.bf16 %v8243_v57, %v8245_v34  ;;  %v8249_v18 = vld [vmem:[#allocation3 + $0x260] sm:$0xff] }
 0xde8   : > { %3522 = vmatpush.msrb.mxu1 %v6142_v1  ;;  %v8251_v1 = vld [vmem:[#allocation3 + $0x268] sm:$0xff]  ;;  %6179 = vrot.lane.b32.xlu0 %v6178_v62, %s6634_s14 }
 0xde9   : > { %6174 = vrot.lane.b32.xlu2 %v6178_v62, %s6635_s23 }
 0xdeb   : > { %v6150_v9 = vpop.permute.xlu0 %6149  ;;  %v6155_v41 = vpop.permute.xlu1 %6154 }
 0xdec   : > { %v6151_v49 = vunpack.i.l.bf16 %v6150_v9  ;;  %v6156_v63 = vunpack.i.l.bf16 %v6155_v41  ;;  %v6152_v15 = vunpack.i.h.bf16 %v6150_v9  ;;  %v6157_v20 = vunpack.i.h.bf16 %v6155_v41 }
 0xded   : > { %v6183_v9 = vpack.i.bf16 %v8249_v18, %v8251_v1 }
 0xdee   : > { %5349 = vmatmul.msk.f32.gmra.mxu0 %vm1132_vm8, %v3266_v32  ;;  %3523 = vmatpush.msrb.mxu1 %v6151_v49  ;;  %v8257_v49 = vld [vmem:[#allocation3 + $0x250] sm:$0xff] }
 0xdef   : > { %3566 = vmatpush.msrb.mxu2 %v6156_v63  ;;  %6184 = vrot.lane.b32.xlu1 %v6183_v9, %s6635_s23  ;;  %v8259_v63 = vld [vmem:[#allocation3 + $0x258] sm:$0xff] }
 0xdf0   : > { %3524 = vmatpush.msrb.mxu1 %v6152_v15 }
 0xdf1   : > { %3567 = vmatpush.msrb.mxu2 %v6157_v20  ;;  %v6193_v20 = vpack.i.bf16 %v8257_v49, %v8259_v63  ;;  %6189 = vrot.lane.b32.xlu2 %v6183_v9, %s6634_s14 }
 0xdf3   : > { %v6160_v59 = vpop.permute.xlu0 %6159  ;;  %v6165_v25 = vpop.permute.xlu1 %6164 }
 0xdf4   : > { %v6161_v13 = vunpack.i.l.bf16 %v6160_v59  ;;  %v6166_v39 = vunpack.i.l.bf16 %v6165_v25  ;;  %v6162_v22 = vunpack.i.h.bf16 %v6160_v59  ;;  %v6167_v51 = vunpack.i.h.bf16 %v6165_v25 }
 0xdf6   : > { %3525 = vmatpush.msrb.mxu1 %v6161_v13  ;;  %3568 = vmatpush.msrb.mxu2 %v6166_v39 }
 0xdf7   : > { %3488 = vmatmul.f32.vlgmr.msrb.gmra.mxu0 %v7968_v56  ;;  %v8174_v56 = vld [vmem:[#allocation4 + $0x70] sm:$0xff]  ;;  %6194 = vrot.lane.b32.xlu1 %v6193_v20, %s6635_s23 }
 0xdf8   : > { %3526 = vmatpush.msrb.mxu1 %v6162_v22  ;;  %3569 = vmatpush.msrb.mxu2 %v6167_v51 }
 0xdf9   : > { %3570 = vmatmul.f32.vlgmr.msrb.gmra.mxu2 %v7970_v10  ;;  %v8178_v10 = vld [vmem:[#allocation4 + $0x68] sm:$0xff]  ;;  %6199 = vrot.lane.b32.xlu2 %v6193_v20, %s6634_s14 }
 0xdfa   : > { %5355 = vmatpush.msk.msra.mxu2 %vm787_vm5, %v3981_v14  ;;  %3527 = vmatpush.msrb.mxu1 %v6171_v28 }
 0xdfc   : > { %4011 = vmatpush.msra.mxu2 %v8114_v37  ;;  %3528 = vmatpush.msrb.mxu1 %v6172_v27 }
 0xdfd   : > { %3529 = vmatmul.f32.vlgmr.msrb.gmra.mxu1 %v7964_v19  ;;  %v8185_v19 = vld [vmem:[#allocation4 + $0x58] sm:$0xff] }
 0xdfe   : > { %4012 = vmatpush.msra.mxu2 %v8134_v30 }
 0xdff   : > { %3491 = vmatmul.f32.gmra.mxu0 %v7977_v12  ;;  %v8189_v12 = vld [vmem:[#allocation4 + $0x50] sm:$0xff] }
 0xe00   : > { %4183 = vmatpush.msrb.mxu2 %v8170_v17 }
 0xe01   : > { %3573 = vmatmul.f32.gmra.mxu2 %v7979_v3  ;;  %v8193_v3 = vld [vmem:[#allocation4 + $0x48] sm:$0xff] }
 0xe02   : > { %4184 = vmatpush.msrb.mxu2 %v8174_v56 }
 0xe04   : > { %4185 = vmatpush.msrb.mxu2 %v8178_v10 }
 0xe05   : > { %3532 = vmatmul.f32.gmra.mxu1 %v7972_v5  ;;  %v8200_v5 = vld [vmem:[#allocation4 + $0x38] sm:$0xff] }
 0xe06   : > { %4186 = vmatpush.msrb.mxu2 %v8181_v35 }
 0xe07   : > { %3494 = vmatmul.f32.gmra.mxu0 %v7986_v7  ;;  %v8204_v7 = vld [vmem:[#allocation4 + $0x30] sm:$0xff] }
 0xe08   : > { %4187 = vmatpush.msrb.mxu2 %v8185_v19 }
 0xe09   : > { %3576 = vmatmul.f32.gmra.mxu2 %v7988_v47  ;;  %v8208_v47 = vld [vmem:[#allocation4 + $0x28] sm:$0xff] }
 0xe0a   : > { %4188 = vmatpush.msrb.mxu2 %v8189_v12 }
 0xe0c   : > { %4189 = vmatpush.msrb.mxu2 %v8193_v3 }
 0xe0d   : > { %3535 = vmatmul.f32.gmra.mxu1 %v7981_v40  ;;  %v8215_v40 = vld [vmem:[#allocation4 + $0x18] sm:$0xff] }
 0xe0e   : > { %4190 = vmatpush.msrb.mxu2 %v8196_v6 }
 0xe0f   : > { %3497 = vmatmul.f32.gmra.mxu0 %v7995_v53  ;;  %v8219_v53 = vld [vmem:[#allocation4 + $0x10] sm:$0xff] }
 0xe10   : > { %4191 = vmatpush.msrb.mxu2 %v8200_v5 }
 0xe11   : > { %3579 = vmatmul.f32.gmra.mxu2 %v7997_v58  ;;  %v8223_v58 = vld [vmem:[#allocation4 + $0x8] sm:$0xff] }
 0xe12   : > { %4192 = vmatpush.msrb.mxu2 %v8204_v7 }
 0xe14   : > { %4193 = vmatpush.msrb.mxu2 %v8208_v47 }
 0xe15   : > { %3538 = vmatmul.f32.gmra.mxu1 %v7990_v29  ;;  %v8915_v29 = vld [vmem:[#allocation20_spill] sm:$0xff] }
 0xe16   : > { %4194 = vmatpush.msrb.mxu2 %v8211_v43 }
 0xe17   : > { %3500 = vmatmul.f32.gmra.mxu0 %v8004_v33  ;;  %v8918_v33 = vld [vmem:[#allocation15_spill] sm:$0xff] }
 0xe18   : > { %4195 = vmatpush.msrb.mxu2 %v8215_v40 }
 0xe19   : > { %3582 = vmatmul.f32.gmra.mxu2 %v8006_v16  ;;  %v8921_v16 = vld [vmem:[#allocation18_spill] sm:$0xff] }
 0xe1a   : > { %4196 = vmatpush.msrb.mxu2 %v8219_v53 }
 0xe1c   : > { %4197 = vmatpush.msrb.mxu2 %v8223_v58 }
 0xe1d   : > { %3541 = vmatmul.f32.gmra.mxu1 %v8915_v29 }
 0xe1e   : > { %4198 = vmatpush.msrb.mxu2 %v8226_v11 }
 0xe1f   : > { %3503 = vmatmul.f32.gmra.mxu0 %v8916_v31 }
 0xe21   : > { %3585 = vmatmul.f32.gmra.mxu2 %v8917_v44 }
 0xe25   : > { %3544 = vmatmul.f32.gmra.mxu1 %v8918_v33 }
 0xe27   : > { %3506 = vmatmul.f32.gmra.mxu0 %v8919_v24 }
 0xe29   : > { %3588 = vmatmul.f32.gmra.mxu2 %v8920_v42 }
 0xe2d   : > { %3547 = vmatmul.f32.gmra.mxu1 %v8921_v16 }
 0xe2f   : > { %3509 = vmatmul.f32.gmra.mxu0 %v8922_v4 }
 0xe31   : > { %3591 = vmatmul.f32.gmra.mxu2 %v8923_v55 }
 0xe35   : > { %3550 = vmatmul.f32.gmra.mxu1 %v8924_v60 }
 0xe3b   : > { %v3302_v61 = vpop.f32.mrf.mxu0 }
 0xe3c   : > { %3315 = vst.msk [vmem:[#allocation4 + $0xc0] sm:$0xff] %vm1178_vm9, %v3302_v61 }
 0xe5b   : > { %v3305_v50 = vpop.f32.mrf.mxu0 }
 0xe5c   : > { %3316 = vst.msk [vmem:[#allocation4 + $0xc8] sm:$0xff] %vm1178_vm9, %v3305_v50  ;;  %v3684_v50 = vld [vmem:[#allocation3 + $0x240] sm:$0xff] }
 0xe63   : > { %v3308_v46 = vpop.f32.mrf.mxu0 }
 0xe64   : > { %3317 = vst.msk [vmem:[#allocation4 + $0xd0] sm:$0xff] %vm1178_vm9, %v3308_v46  ;;  %v3685_v46 = vld [vmem:[#allocation3 + $0x248] sm:$0xff] }
 0xe65   : > { %v6203_v9 = vpack.i.bf16 %v3684_v50, %v3685_v46 }
 0xe6b   : > { %v3311_v52 = vpop.f32.mrf.mxu0 }
 0xe6c   : > { %3318 = vst.msk [vmem:[#allocation4 + $0xd8] sm:$0xff] %vm1178_vm9, %v3311_v52 }
 0xe74   : > { %v3489_v2 = vpop.f32.mrf.mxu0 }
 0xe7a   : > { %v3530_v38 = vpop.f32.mrf.mxu1 }
 0xe7b   : > { %v3531_v14 = vadd.f32 %v3530_v38, %v3489_v2 }
 0xe7c   : > { %v3571_v41 = vpop.f32.mrf.mxu2  ;;  %v3492_v32 = vpop.f32.mrf.mxu0 }
 0xe7d   : > { %v3572_v33 = vadd.f32 %v3571_v41, %v3531_v14 }
 0xe82   : > { %v3533_v15 = vpop.f32.mrf.mxu1 }
 0xe83   : > { %v3534_v16 = vadd.f32 %v3533_v15, %v3492_v32 }
 0xe84   : > { %v3495_v21 = vpop.f32.mrf.mxu0  ;;  %v3574_v59 = vpop.f32.mrf.mxu2 }
 0xe85   : > { %v3575_v52 = vadd.f32 %v3574_v59, %v3534_v16 }
 0xe8a   : > { %v3536_v25 = vpop.f32.mrf.mxu1 }
 0xe8b   : > { %v3537_v20 = vadd.f32 %v3536_v25, %v3495_v21 }
 0xe8c   : > { %v3498_v13 = vpop.f32.mrf.mxu0  ;;  %v3577_v39 = vpop.f32.mrf.mxu2 }
 0xe8d   : > { %v3578_v14 = vadd.f32 %v3577_v39, %v3537_v20  ;;  %v8926_v39 = vld [vmem:[#allocation23_spill] sm:$0xff] }
 0xe92   : > { %v3539_v22 = vpop.f32.mrf.mxu1 }
 0xe93   : > { %v3540_v59 = vadd.f32 %v3539_v22, %v3498_v13  ;;  %v8925_v13 = vld [vmem:[#allocation24_spill] sm:$0xff]  ;;  %v8927_v22 = vld [vmem:[#allocation26_spill] sm:$0xff] }
 0xe94   : > { %v3501_v51 = vpop.f32.mrf.mxu0  ;;  %v3580_v28 = vpop.f32.mrf.mxu2 }
 0xe95   : > { %v3581_v25 = vadd.f32 %v3580_v28, %v3540_v59  ;;  %v8928_v28 = vld [vmem:[#allocation25_spill] sm:$0xff] }
 0xe9a   : > { %v3542_v27 = vpop.f32.mrf.mxu1 }
 0xe9b   : > { %v3543_v29 = vadd.f32 %v3542_v27, %v3501_v51 }
 0xe9c   : > { %v3504_v31 = vpop.f32.mrf.mxu0  ;;  %v3583_v44 = vpop.f32.mrf.mxu2 }
 0xe9d   : > { %v3584_v24 = vadd.f32 %v3583_v44, %v3543_v29 }
 0xe9f   : > { %v3595_v42 = vmax.f32 %v3572_v33, %v3584_v24 }
 0xea1   : > { %v8267_v4 = vmax.f32 %v3595_v42, 0.0 }
 0xea2   : > { %v3545_v55 = vpop.f32.mrf.mxu1 }
 0xea3   : > { %v3546_v60 = vadd.f32 %v3545_v55, %v3504_v31  ;;  %3607 = vrot.lane.b32.xlu0 %v8267_v4, %s6635_s23 }
 0xea4   : > { %v3586_v61 = vpop.f32.mrf.mxu2  ;;  %v3507_v62 = vpop.f32.mrf.mxu0 }
 0xea5   : > { %v3587_v2 = vadd.f32 %v3586_v61, %v3546_v60  ;;  %v3625_v60 = vld [vmem:[%s8777_s8 + $0x10] sm:$0x3]  ;;  %v8308_v61 = vpack.i.bf16 %v8181_v35, %v8178_v10 }
 0xea6   : > { %5350 = vmatpush.msk.msrb.mxu3 %vm787_vm5, %v3625_v60 }
 0xea7   : > { %v3596_v38 = vmax.f32 %v3575_v52, %v3587_v2  ;;  %v8312_v52 = vpack.i.bf16 %v8196_v6, %v8193_v3  ;;  %v8317_v2 = vpack.i.bf16 %v8174_v56, %v8170_v17 }
 0xea8   : > { %3655 = vmatpush.msrb.mxu3 %v8114_v37  ;;  %v8331_v37 = vpack.i.bf16 %v8189_v12, %v8185_v19 }
 0xea9   : > { %v8271_v41 = vmax.f32 %v3596_v38, 0.0 }
 0xeaa   : > { %v3548_v51 = vpop.f32.mrf.mxu1  ;;  %3656 = vmatpush.msrb.mxu3 %v8134_v30  ;;  %v6175_v30 = vpop.permute.xlu2 %6174 }
 0xeab   : > { %v3549_v32 = vadd.f32 %v3548_v51, %v3507_v62  ;;  %3609 = vrot.lane.b32.xlu1 %v8271_v41, %s6635_s23  ;;  %6204 = vrot.lane.b32.xlu0 %v6203_v9, %s6635_s23 }
 0xeac   : > { %v3589_v15 = vpop.f32.mrf.mxu2  ;;  %v3510_v31 = vpop.f32.mrf.mxu0  ;;  %3828 = vmatpush.msra.mxu3 %v8245_v34  ;;  %v6176_v34 = vunpack.i.l.bf16 %v6175_v30 }
 0xead   : > { %v3590_v27 = vadd.f32 %v3589_v15, %v3549_v32 }
 0xeae   : > { %3829 = vmatpush.msra.mxu3 %v8243_v57  ;;  %v6177_v57 = vunpack.i.h.bf16 %v6175_v30  ;;  %3869 = vmatpush.msra.mxu0 %v6176_v34  ;;  %v3804_v34 = vld [vmem:[#allocation8] sm:$0xff] }
 0xeaf   : > { %v3597_v29 = vmax.f32 %v3578_v14, %v3590_v27 }
 0xeb0   : > { %3830 = vmatpush.msra.mxu3 %v8251_v1  ;;  %3870 = vmatpush.msra.mxu0 %v6177_v57 }
 0xeb1   : > { %v8276_v44 = vmax.f32 %v3597_v29, 0.0 }
 0xeb2   : > { %v3551_v33 = vpop.f32.mrf.mxu1  ;;  %3831 = vmatpush.msra.mxu3 %v8249_v18  ;;  %v8341_v18 = vpack.i.bf16 %v8211_v43, %v8208_v47  ;;  %v6190_v1 = vpop.permute.xlu2 %6189 }
 0xeb3   : > { %v3552_v24 = vadd.f32 %v3551_v33, %v3510_v31  ;;  %6209 = vrot.lane.b32.xlu1 %v6203_v9, %s6634_s14  ;;  %3611 = vrot.lane.b32.xlu0 %v8276_v44, %s6635_s23  ;;  %v6180_v47 = vpop.permute.xlu0 %6179 }
 0xeb4   : > { %v3592_v21 = vpop.f32.mrf.mxu2  ;;  %3832 = vmatpush.msra.mxu3 %v8259_v63  ;;  %v6181_v43 = vunpack.i.l.bf16 %v6180_v47  ;;  %v6191_v63 = vunpack.i.l.bf16 %v6190_v1 }
 0xeb5   : > { %v3593_v42 = vadd.f32 %v3592_v21, %v3552_v24 }
 0xeb6   : > { %3833 = vmatpush.msra.mxu3 %v8257_v49  ;;  %v6185_v49 = vpop.permute.xlu1 %6184  ;;  %3910 = vmatpush.msra.mxu1 %v6181_v43 }
 0xeb7   : > { %v3598_v16 = vmax.f32 %v3581_v25, %v3593_v42 }
 0xeb8   : > { %3834 = vmatpush.msra.mxu3 %v3685_v46  ;;  %v6186_v46 = vunpack.i.l.bf16 %v6185_v49 }
 0xeb9   : > { %v8281_v55 = vmax.f32 %v3598_v16, 0.0 }
 0xeba   : > { %3835 = vmatpush.msra.mxu3 %v3684_v50  ;;  %v6187_v50 = vunpack.i.h.bf16 %v6185_v49  ;;  %3871 = vmatpush.msra.mxu0 %v6186_v46 }
 0xebb   : > { %3613 = vrot.lane.b32.xlu2 %v8281_v55, %s6635_s23  ;;  %6219 = vrot.lane.b32.xlu1 %v8925_v13, %s6634_s14 }
 0xebc   : > { %6214 = vrot.lane.b32.xlu0 %v8925_v13, %s6635_s23  ;;  %3836 = vmatpush.msra.mxu3 %v8051_v48  ;;  %v6182_v48 = vunpack.i.h.bf16 %v6180_v47 }
 0xebd   : > { %3872 = vmatpush.msra.mxu0 %v6187_v50 }
 0xebe   : > { %3837 = vmatpush.msra.mxu3 %v8045_v23  ;;  %3911 = vmatpush.msra.mxu1 %v6182_v48  ;;  %v6195_v62 = vpop.permute.xlu1 %6194 }
 0xebf   : > { %v6196_v38 = vunpack.i.l.bf16 %v6195_v62 }
 0xec0   : > { %3838 = vmatpush.msra.mxu3 %v8043_v36  ;;  %v6192_v36 = vunpack.i.h.bf16 %v6190_v1  ;;  %3912 = vmatpush.msra.mxu1 %v6191_v63 }
 0xec1   : > { %3873 = vmatpush.msra.mxu0 %v6196_v38 }
 0xec2   : > { %3839 = vmatpush.msra.mxu3 %v8041_v54  ;;  %v6200_v54 = vpop.permute.xlu2 %6199  ;;  %3913 = vmatpush.msra.mxu1 %v6192_v36  ;;  %v3807_v36 = vld [vmem:[#allocation8 + $0x18] sm:$0xff] }
 0xec3   : > { %6224 = vrot.lane.b32.xlu2 %v8926_v39, %s6635_s23  ;;  %6234 = vrot.lane.b32.xlu1 %v8927_v22, %s6635_s23  ;;  %v6201_v23 = vunpack.i.l.bf16 %v6200_v54 }
 0xec4   : > { %6229 = vrot.lane.b32.xlu0 %v8926_v39, %s6634_s14  ;;  %3840 = vmatpush.msra.mxu3 %v8065_v0  ;;  %v6202_v0 = vunpack.i.h.bf16 %v6200_v54 }
 0xec5   : > { %3914 = vmatpush.msra.mxu1 %v6201_v23  ;;  %v3805_v23 = vld [vmem:[#allocation8 + $0x8] sm:$0xff] }
 0xec6   : > { %3841 = vmatpush.msra.mxu3 %v8063_v8  ;;  %v6197_v8 = vunpack.i.h.bf16 %v6195_v62  ;;  %v3806_v62 = vld [vmem:[#allocation8 + $0x10] sm:$0xff] }
 0xec7   : > { %3915 = vmatpush.msra.mxu1 %v6202_v0  ;;  %v4334_v0 = vld [vmem:[%s8778_s9] sm:$0x3f] }
 0xec8   : > { %3842 = vmatpush.msra.mxu3 %v8079_v45  ;;  %3874 = vmatpush.msra.mxu0 %v6197_v8  ;;  %v8369_v8 = vld [vmem:[#allocation4 + $0xb8] sm:$0xff] }
 0xeca   : > { %3843 = vmatpush.msra.mxu3 %v8077_v26 }
 0xecb   : > { %6239 = vrot.lane.b32.xlu2 %v8927_v22, %s6634_s14  ;;  %6249 = vrot.lane.b32.xlu1 %v8928_v28, %s6634_s14 }
 0xecc   : > { %6244 = vrot.lane.b32.xlu0 %v8928_v28, %s6635_s23 }
 0xed3   : > { %6274 = vrot.lane.b32.xlu2 %v8312_v52, %s6635_s23  ;;  %6259 = vrot.lane.b32.xlu1 %v8308_v61, %s6635_s23 }
 0xed4   : > { %6254 = vrot.lane.b32.xlu0 %v8317_v2, %s6635_s23 }
 0xedb   : > { %6269 = vrot.lane.b32.xlu1 %v8317_v2, %s6634_s14 }
 0xedc   : > { %6264 = vrot.lane.b32.xlu0 %v8331_v37, %s6635_s23 }
 0xee3   : > { %6294 = vrot.lane.b32.xlu1 %v8341_v18, %s6635_s23 }
 0xee4   : > { %6279 = vrot.lane.b32.xlu0 %v8308_v61, %s6634_s14 }
 0xeec   : > { %6289 = vrot.lane.b32.xlu0 %v8331_v37, %s6634_s14 }
 0xf15   : > { %v3608_v9 = vpop.permute.xlu0 %3607  ;;  %v3614_v14 = vpop.permute.xlu2 %3613 }
 0xf16   : > { %v3619_v45 = vmax.f32 %v8267_v4, %v3608_v9  ;;  %v3622_v42 = vmax.f32 %v8281_v55, %v3614_v14  ;;  %v3809_v14 = vld [vmem:[#allocation8 + $0x28] sm:$0xff] }
 0xf18   : > { %5351 = vmatmul.msk.f32.vlgmr.msrb.gmra.mxu3 %vm1132_vm8, %v3619_v45 }
 0xf1d   : > { %v3610_v20 = vpop.permute.xlu1 %3609  ;;  %v6205_v51 = vpop.permute.xlu0 %6204 }
 0xf1e   : > { %v3620_v26 = vmax.f32 %v8271_v41, %v3610_v20  ;;  %v6206_v32 = vunpack.i.l.bf16 %v6205_v51  ;;  %v6207_v15 = vunpack.i.h.bf16 %v6205_v51  ;;  %v6225_v41 = vpop.permute.xlu2 %6224  ;;  %v8372_v20 = vld [vmem:[#allocation4 + $0xb0] sm:$0xff] }
 0xf1f   : > { %v6226_v13 = vunpack.i.l.bf16 %v6225_v41 }
 0xf20   : > { %5352 = vmatmul.msk.f32.gmra.mxu3 %vm1132_vm8, %v3620_v26  ;;  %3875 = vmatpush.msra.mxu0 %v6206_v32  ;;  %v3810_v26 = vld [vmem:[#allocation8 + $0x30] sm:$0xff]  ;;  %v8375_v32 = vld [vmem:[#allocation4 + $0xa8] sm:$0xff] }
 0xf22   : > { %3876 = vmatpush.msra.mxu0 %v6207_v15  ;;  %v3808_v15 = vld [vmem:[#allocation8 + $0x20] sm:$0xff] }
 0xf25   : > { %v6210_v27 = vpop.permute.xlu1 %6209  ;;  %v3612_v59 = vpop.permute.xlu0 %3611 }
 0xf26   : > { %v6212_v29 = vunpack.i.h.bf16 %v6210_v27  ;;  %v6211_v31 = vunpack.i.l.bf16 %v6210_v27  ;;  %v3621_v33 = vmax.f32 %v8276_v44, %v3612_v59  ;;  %v6227_v44 = vunpack.i.h.bf16 %v6225_v41  ;;  %v6240_v1 = vpop.permute.xlu2 %6239  ;;  %v8381_v59 = vld [vmem:[#allocation4 + $0x98] sm:$0xff] }
 0xf27   : > { %v6241_v55 = vunpack.i.l.bf16 %v6240_v1  ;;  %v6242_v48 = vunpack.i.h.bf16 %v6240_v1 }
 0xf28   : > { %3916 = vmatpush.msra.mxu1 %v6211_v31  ;;  %5353 = vmatmul.msk.f32.gmra.mxu3 %vm1132_vm8, %v3621_v33 }
 0xf2a   : > { %3917 = vmatpush.msra.mxu1 %v6212_v29  ;;  %v8378_v29 = vld [vmem:[#allocation4 + $0xa0] sm:$0xff] }
 0xf2d   : > { %v6220_v4 = vpop.permute.xlu1 %6219 }
 0xf2e   : > { %v6222_v24 = vunpack.i.h.bf16 %v6220_v4  ;;  %v6221_v21 = vunpack.i.l.bf16 %v6220_v4  ;;  %v6215_v25 = vpop.permute.xlu0 %6214 }
 0xf2f   : > { %v6216_v16 = vunpack.i.l.bf16 %v6215_v25  ;;  %v6217_v39 = vunpack.i.h.bf16 %v6215_v25  ;;  %v6275_v25 = vpop.permute.xlu2 %6274 }
 0xf30   : > { %3918 = vmatpush.msra.mxu1 %v6221_v21  ;;  %5354 = vmatmul.msk.f32.gmra.mxu3 %vm1132_vm8, %v3622_v42  ;;  %v8384_v21 = vld [vmem:[#allocation4 + $0x90] sm:$0xff] }
 0xf31   : > { %3877 = vmatpush.msra.mxu0 %v6216_v16 }
 0xf32   : > { %3919 = vmatpush.msra.mxu1 %v6222_v24 }
 0xf33   : > { %3878 = vmatpush.msra.mxu0 %v6217_v39  ;;  %v3811_v39 = vld [vmem:[#allocation8 + $0x38] sm:$0xff] }
 0xf35   : > { %v6235_v22 = vpop.permute.xlu1 %6234  ;;  %3879 = vmatpush.msra.mxu0 %v6226_v13  ;;  %v8387_v13 = vld [vmem:[#allocation4 + $0x88] sm:$0xff] }
 0xf36   : > { %v6236_v28 = vunpack.i.l.bf16 %v6235_v22  ;;  %v6230_v60 = vpop.permute.xlu0 %6229  ;;  %v6237_v30 = vunpack.i.h.bf16 %v6235_v22  ;;  %v6276_v22 = vunpack.i.l.bf16 %v6275_v25 }
 0xf37   : > { %v6231_v57 = vunpack.i.l.bf16 %v6230_v60  ;;  %3880 = vmatpush.msra.mxu0 %v6227_v44  ;;  %v6232_v47 = vunpack.i.h.bf16 %v6230_v60  ;;  %v3812_v44 = vld [vmem:[#allocation8 + $0x40] sm:$0xff]  ;;  %v3813_v60 = vld [vmem:[#allocation8 + $0x48] sm:$0xff] }
 0xf38   : > { %3844 = vmatmul.f32.vlgmr.msra.gmra.mxu3 %v3804_v34 }
 0xf39   : > { %3920 = vmatpush.msra.mxu1 %v6231_v57  ;;  %3881 = vmatpush.msra.mxu0 %v6236_v28  ;;  %v8390_v28 = vld [vmem:[#allocation4 + $0x80] sm:$0xff] }
 0xf3b   : > { %3921 = vmatpush.msra.mxu1 %v6232_v47  ;;  %3882 = vmatpush.msra.mxu0 %v6237_v30  ;;  %v6277_v30 = vunpack.i.h.bf16 %v6275_v25  ;;  %v3815_v47 = vld [vmem:[#allocation8 + $0x58] sm:$0xff] }
 0xf3d   : > { %3922 = vmatpush.msra.mxu1 %v6241_v55  ;;  %v6250_v43 = vpop.permute.xlu1 %6249  ;;  %v3814_v55 = vld [vmem:[#allocation8 + $0x50] sm:$0xff] }
 0xf3e   : > { %v6251_v49 = vunpack.i.l.bf16 %v6250_v43  ;;  %v6245_v63 = vpop.permute.xlu0 %6244  ;;  %v6252_v50 = vunpack.i.h.bf16 %v6250_v43 }
 0xf3f   : > { %v6246_v46 = vunpack.i.l.bf16 %v6245_v63  ;;  %3923 = vmatpush.msra.mxu1 %v6242_v48  ;;  %v6247_v54 = vunpack.i.h.bf16 %v6245_v63  ;;  %v3816_v48 = vld [vmem:[#allocation8 + $0x60] sm:$0xff]  ;;  %v3819_v63 = vld [vmem:[#allocation8 + $0x78] sm:$0xff] }
 0xf40   : > { %3847 = vmatmul.f32.gmra.mxu3 %v3807_v36  ;;  %v3825_v36 = vld [vmem:[#allocation8 + $0xa8] sm:$0xff] }
 0xf41   : > { %3883 = vmatpush.msra.mxu0 %v6246_v46  ;;  %3924 = vmatpush.msra.mxu1 %v6251_v49  ;;  %v3817_v49 = vld [vmem:[#allocation8 + $0x68] sm:$0xff]  ;;  %v3824_v46 = vld [vmem:[#allocation8 + $0xa0] sm:$0xff] }
 0xf43   : > { %3884 = vmatpush.msra.mxu0 %v6247_v54  ;;  %3925 = vmatpush.msra.mxu1 %v6252_v50  ;;  %v3822_v50 = vld [vmem:[#allocation8 + $0x90] sm:$0xff]  ;;  %v3827_v54 = vld [vmem:[#allocation8 + $0xb8] sm:$0xff] }
 0xf44   : > { %3885 = vmatmul.f32.vlgmr.msra.gmra.mxu0 %v3805_v23  ;;  %3926 = vmatmul.f32.vlgmr.msra.gmra.mxu1 %v3806_v62 }
 0xf45   : > { %5360 = vmatpush.msk.msrb.mxu1 %vm4348_vm10, %v4334_v0  ;;  %v6260_v38 = vpop.permute.xlu1 %6259 }
 0xf46   : > { %v6255_v9 = vpop.permute.xlu0 %6254  ;;  %v6261_v27 = vunpack.i.l.bf16 %v6260_v38  ;;  %v6262_v31 = vunpack.i.h.bf16 %v6260_v38 }
 0xf47   : > { %4539 = vmatpush.msra.mxu1 %v8369_v8  ;;  %v6256_v45 = vunpack.i.l.bf16 %v6255_v9  ;;  %v6257_v51 = vunpack.i.h.bf16 %v6255_v9 }
 0xf48   : > { %3850 = vmatmul.f32.gmra.mxu3 %v3810_v26 }
 0xf49   : > { %4540 = vmatpush.msra.mxu1 %v8372_v20  ;;  %4224 = vmatpush.msrb.mxu3 %v6256_v45 }
 0xf4b   : > { %4541 = vmatpush.msra.mxu1 %v8375_v32  ;;  %4225 = vmatpush.msrb.mxu3 %v6257_v51 }
 0xf4c   : > { %3888 = vmatmul.f32.gmra.mxu0 %v3808_v15  ;;  %3929 = vmatmul.f32.gmra.mxu1 %v3809_v14 }
 0xf4d   : > { %4542 = vmatpush.msra.mxu1 %v8378_v29  ;;  %4226 = vmatpush.msrb.mxu3 %v6261_v27  ;;  %v6270_v33 = vpop.permute.xlu1 %6269 }
 0xf4e   : > { %v6271_v4 = vunpack.i.l.bf16 %v6270_v33  ;;  %v6265_v41 = vpop.permute.xlu0 %6264  ;;  %v6272_v42 = vunpack.i.h.bf16 %v6270_v33 }
 0xf4f   : > { %4543 = vmatpush.msra.mxu1 %v8381_v59  ;;  %v6266_v24 = vunpack.i.l.bf16 %v6265_v41  ;;  %4227 = vmatpush.msrb.mxu3 %v6262_v31  ;;  %v6267_v16 = vunpack.i.h.bf16 %v6265_v41 }
 0xf50   : > { %4265 = vmatpush.msrb.mxu0 %v6271_v4  ;;  %3853 = vmatmul.f32.gmra.mxu3 %v3813_v60 }
 0xf51   : > { %4544 = vmatpush.msra.mxu1 %v8384_v21  ;;  %4228 = vmatpush.msrb.mxu3 %v6266_v24 }
 0xf52   : > { %4266 = vmatpush.msrb.mxu0 %v6272_v42 }
 0xf53   : > { %4545 = vmatpush.msra.mxu1 %v8387_v13  ;;  %4229 = vmatpush.msrb.mxu3 %v6267_v16 }
 0xf54   : > { %3891 = vmatmul.f32.gmra.mxu0 %v3811_v39  ;;  %3932 = vmatmul.f32.gmra.mxu1 %v3812_v44 }
 0xf55   : > { %4546 = vmatpush.msra.mxu1 %v8390_v28  ;;  %4230 = vmatpush.msrb.mxu3 %v6276_v22 }
 0xf56   : > { %v6280_v57 = vpop.permute.xlu0 %6279 }
 0xf57   : > { %4547 = vmatpush.msra.mxu1 %v8170_v17  ;;  %v6281_v34 = vunpack.i.l.bf16 %v6280_v57  ;;  %4231 = vmatpush.msrb.mxu3 %v6277_v30  ;;  %v6282_v1 = vunpack.i.h.bf16 %v6280_v57 }
 0xf58   : > { %3856 = vmatmul.f32.gmra.mxu3 %v3816_v48 }
 0xf59   : > { %4548 = vmatpush.msra.mxu1 %v8174_v56  ;;  %4267 = vmatpush.msrb.mxu0 %v6281_v34 }
 0xf5b   : > { %4549 = vmatpush.msra.mxu1 %v8178_v10  ;;  %4268 = vmatpush.msrb.mxu0 %v6282_v1  ;;  %v3818_v10 = vld [vmem:[#allocation8 + $0x70] sm:$0xff] }
 0xf5c   : > { %3894 = vmatmul.f32.gmra.mxu0 %v3814_v55  ;;  %3935 = vmatmul.f32.gmra.mxu1 %v3815_v47 }
 0xf5d   : > { %4550 = vmatpush.msra.mxu1 %v8181_v35  ;;  %v3820_v35 = vld [vmem:[#allocation8 + $0x80] sm:$0xff] }
 0xf5e   : > { %v6290_v17 = vpop.permute.xlu0 %6289 }
 0xf5f   : > { %4551 = vmatpush.msra.mxu1 %v8185_v19  ;;  %v6291_v43 = vunpack.i.l.bf16 %v6290_v17  ;;  %v6292_v56 = vunpack.i.h.bf16 %v6290_v17  ;;  %v3821_v19 = vld [vmem:[#allocation8 + $0x88] sm:$0xff] }
 0xf60   : > { %3859 = vmatmul.f32.gmra.mxu3 %v3819_v63 }
 0xf61   : > { %4552 = vmatpush.msra.mxu1 %v8189_v12  ;;  %4269 = vmatpush.msrb.mxu0 %v6291_v43  ;;  %v3823_v12 = vld [vmem:[#allocation8 + $0x98] sm:$0xff] }
 0xf63   : > { %4553 = vmatpush.msra.mxu1 %v8193_v3  ;;  %4270 = vmatpush.msrb.mxu0 %v6292_v56  ;;  %v3826_v3 = vld [vmem:[#allocation8 + $0xb0] sm:$0xff] }
 0xf64   : > { %3897 = vmatmul.f32.gmra.mxu0 %v3817_v49  ;;  %3938 = vmatmul.f32.gmra.mxu1 %v3818_v10 }
 0xf65   : > { %4554 = vmatpush.msra.mxu1 %v8196_v6 }
 0xf68   : > { %3862 = vmatmul.f32.gmra.mxu3 %v3822_v50 }
 0xf6c   : > { %3900 = vmatmul.f32.gmra.mxu0 %v3820_v35  ;;  %3941 = vmatmul.f32.gmra.mxu1 %v3821_v19 }
 0xf70   : > { %3865 = vmatmul.f32.gmra.mxu3 %v3825_v36  ;;  %v6283_v36 = vpack.i.bf16 %v8204_v7, %v8200_v5  ;;  %v6313_v5 = vpack.i.bf16 %v8226_v11, %v8223_v58  ;;  %v8428_v7 = vpack.i.bf16 %v8372_v20, %v8369_v8  ;;  %v8450_v58 = vpack.i.bf16 %v8390_v28, %v8387_v13 }
 0xf72   : > { %8929 = vst [vmem:[#allocation20_spill] sm:$0xff] %v8428_v7 }
 0xf73   : > { %8932 = vst [vmem:[#allocation15_spill] sm:$0xff] %v8450_v58 }
 0xf74   : > { %3903 = vmatmul.f32.gmra.mxu0 %v3823_v12  ;;  %3944 = vmatmul.f32.gmra.mxu1 %v3824_v46 }
 0xf7c   : > { %3906 = vmatmul.f32.gmra.mxu0 %v3826_v3  ;;  %3947 = vmatmul.f32.gmra.mxu1 %v3827_v54 }
 0xf9b   : > { %v3658_v6 = vpop.f32.mrf.mxu3 }
 0xf9c   : > { %3671 = vst.msk [vmem:[#allocation4 + $0xe0] sm:$0xff] %vm1178_vm9, %v3658_v6 }
 0xfa3   : > { %v3661_v23 = vpop.f32.mrf.mxu3 }
 0xfa4   : > { %3672 = vst.msk [vmem:[#allocation4 + $0xe8] sm:$0xff] %vm1178_vm9, %v3661_v23 }
 0xfab   : > { %v3664_v0 = vpop.f32.mrf.mxu3 }
 0xfac   : > { %3673 = vst.msk [vmem:[#allocation4 + $0xf0] sm:$0xff] %vm1178_vm9, %v3664_v0 }
 0xfb3   : > { %v3667_v62 = vpop.f32.mrf.mxu3 }
 0xfb4   : > { %3674 = vst.msk [vmem:[#allocation4 + $0xf8] sm:$0xff] %vm1178_vm9, %v3667_v62 }
 0xfbb   : > { %v3845_v38 = vpop.f32.mrf.mxu3 }
 0xfc1   : > { %v3886_v9 = vpop.f32.mrf.mxu0  ;;  %v3927_v45 = vpop.f32.mrf.mxu1 }
 0xfc2   : > { %v3887_v24 = vadd.f32 %v3886_v9, %v3845_v38 }
 0xfc3   : > { %v3848_v26 = vpop.f32.mrf.mxu3 }
 0xfc4   : > { %v3928_v44 = vadd.f32 %v3927_v45, %v3887_v24 }
 0xfc9   : > { %v3889_v51 = vpop.f32.mrf.mxu0  ;;  %v3930_v15 = vpop.f32.mrf.mxu1 }
 0xfca   : > { %v3890_v30 = vadd.f32 %v3889_v51, %v3848_v26  ;;  %v6303_v26 = vpack.i.bf16 %v8219_v53, %v8215_v40  ;;  %v8436_v40 = vpack.i.bf16 %v8378_v29, %v8375_v32  ;;  %v8440_v53 = vpack.i.bf16 %v8384_v21, %v8381_v59 }
 0xfcb   : > { %v3851_v14 = vpop.f32.mrf.mxu3 }
 0xfcc   : > { %v3931_v48 = vadd.f32 %v3930_v15, %v3890_v30  ;;  %8930 = vst [vmem:[#allocation21_spill] sm:$0xff] %v8436_v40 }
 0xfcd   : > { %8931 = vst [vmem:[#allocation19_spill] sm:$0xff] %v8440_v53 }
 0xfd1   : > { %v3892_v27 = vpop.f32.mrf.mxu0  ;;  %v3933_v31 = vpop.f32.mrf.mxu1 }
 0xfd2   : > { %v3893_v56 = vadd.f32 %v3892_v27, %v3851_v14 }
 0xfd3   : > { %v3854_v33 = vpop.f32.mrf.mxu3 }
 0xfd4   : > { %v3934_v50 = vadd.f32 %v3933_v31, %v3893_v56 }
 0xfd9   : > { %v3895_v4 = vpop.f32.mrf.mxu0  ;;  %v3936_v41 = vpop.f32.mrf.mxu1 }
 0xfda   : > { %v3896_v3 = vadd.f32 %v3895_v4, %v3854_v33  ;;  %v6295_v33 = vpop.permute.xlu1 %6294 }
 0xfdb   : > { %v3857_v25 = vpop.f32.mrf.mxu3  ;;  %v6297_v24 = vunpack.i.h.bf16 %v6295_v33 }
 0xfdc   : > { %v3937_v38 = vadd.f32 %v3936_v41, %v3896_v3  ;;  %v6296_v41 = vunpack.i.l.bf16 %v6295_v33  ;;  %v8489_v33 = vld [vmem:[#allocation4 + $0xf0] sm:$0xff] }
 0xfe1   : > { %v3898_v42 = vpop.f32.mrf.mxu0  ;;  %v3939_v39 = vpop.f32.mrf.mxu1 }
 0xfe2   : > { %v3899_v16 = vadd.f32 %v3898_v42, %v3857_v25 }
 0xfe3   : > { %v3860_v34 = vpop.f32.mrf.mxu3 }
 0xfe4   : > { %v3940_v22 = vadd.f32 %v3939_v39, %v3899_v16 }
 0xfe6   : > { %v3951_v60 = vmax.f32 %v3928_v44, %v3940_v22 }
 0xfe8   : > { %v3955_v57 = vmax.f32 %v3951_v60, 0.0 }
 0xfe9   : > { %v3901_v1 = vpop.f32.mrf.mxu0  ;;  %v3942_v47 = vpop.f32.mrf.mxu1 }
 0xfea   : > { %v3902_v55 = vadd.f32 %v3901_v1, %v3860_v34  ;;  %3963 = vrot.lane.b32.xlu2 %v3955_v57, %s6635_s23 }
 0xfeb   : > { %v3863_v10 = vpop.f32.mrf.mxu3 }
 0xfec   : > { %v3943_v17 = vadd.f32 %v3942_v47, %v3902_v55 }
 0xfee   : > { %v3952_v43 = vmax.f32 %v3931_v48, %v3943_v17 }
 0xff0   : > { %v3956_v49 = vmax.f32 %v3952_v43, 0.0 }
 0xff1   : > { %v3904_v63 = vpop.f32.mrf.mxu0  ;;  %v3945_v19 = vpop.f32.mrf.mxu1 }
 0xff2   : > { %v3905_v35 = vadd.f32 %v3904_v63, %v3863_v10  ;;  %3965 = vrot.lane.b32.xlu2 %v3956_v49, %s6635_s23  ;;  %v8467_v63 = vld [vmem:[#allocation10] sm:$0xff] }
 0xff3   : > { %v3866_v6 = vpop.f32.mrf.mxu3 }
 0xff4   : > { %v3946_v12 = vadd.f32 %v3945_v19, %v3905_v35 }
 0xff6   : > { %v3953_v46 = vmax.f32 %v3934_v50, %v3946_v12  ;;  %v8469_v50 = vld [vmem:[#allocation10 + $0x8] sm:$0xff] }
 0xff8   : > { %v8409_v54 = vmax.f32 %v3953_v46, 0.0 }
 0xff9   : > { %v3907_v23 = vpop.f32.mrf.mxu0  ;;  %v3948_v62 = vpop.f32.mrf.mxu1 }
 0xffa   : > { %v3908_v0 = vadd.f32 %v3907_v23, %v3866_v6  ;;  %3967 = vrot.lane.b32.xlu1 %v8409_v54, %s6635_s23  ;;  %6284 = vrot.lane.b32.xlu2 %v6283_v36, %s6635_s23 }
 0xffc   : > { %v3949_v9 = vadd.f32 %v3948_v62, %v3908_v0 }
 0xffe   : > { %v3954_v45 = vmax.f32 %v3937_v38, %v3949_v9 }
0x1000   : > { %v3958_v51 = vmax.f32 %v3954_v45, 0.0 }
0x1002   : > { %3969 = vrot.lane.b32.xlu0 %v3958_v51, %s6635_s23  ;;  %6304 = vrot.lane.b32.xlu1 %v6303_v26, %s6635_s23 }
0x1003   : > { %6299 = vrot.lane.b32.xlu2 %v8312_v52, %s6634_s14 }
0x100a   : > { %6314 = vrot.lane.b32.xlu0 %v6313_v5, %s6635_s23  ;;  %6319 = vrot.lane.b32.xlu1 %v8341_v18, %s6634_s14 }
0x100b   : > { %6309 = vrot.lane.b32.xlu2 %v6283_v36, %s6634_s14 }
0x1012   : > { %6329 = vrot.lane.b32.xlu0 %v6313_v5, %s6634_s14  ;;  %6334 = vrot.lane.b32.xlu1 %v8428_v7, %s6635_s23  ;;  %v8475_v5 = vld [vmem:[#allocation10 + $0x18] sm:$0xff] }
0x1013   : > { %6324 = vrot.lane.b32.xlu2 %v6303_v26, %s6634_s14  ;;  %v8473_v26 = vld [vmem:[#allocation10 + $0x20] sm:$0xff] }
0x101a   : > { %6354 = vrot.lane.b32.xlu0 %v8440_v53, %s6635_s23  ;;  %6344 = vrot.lane.b32.xlu1 %v8436_v40, %s6635_s23 }
0x101b   : > { %6339 = vrot.lane.b32.xlu2 %v8428_v7, %s6634_s14 }
0x1022   : > { %6364 = vrot.lane.b32.xlu0 %v8450_v58, %s6635_s23  ;;  %6359 = vrot.lane.b32.xlu1 %v8440_v53, %s6634_s14 }
0x1023   : > { %6349 = vrot.lane.b32.xlu2 %v8436_v40, %s6634_s14 }
0x102a   : > { %6369 = vrot.lane.b32.xlu1 %v8450_v58, %s6634_s14 }
0x102b   : > { %6374 = vrot.lane.b32.xlu2 %v8317_v2, %s6635_s23 }
0x1044   : > { %v3964_v11 = vpop.permute.xlu2 %3963 }
0x1045   : > { %v3975_v18 = vmax.f32 %v3955_v57, %v3964_v11  ;;  %v8477_v11 = vld [vmem:[#allocation10 + $0x10] sm:$0xff] }
0x1047   : > { %5356 = vmatmul.msk.f32.vlgmr.msra.gmra.mxu2 %vm1132_vm8, %v3975_v18  ;;  %v4690_v18 = vld [vmem:[%s8778_s9] sm:$0x3f] }
0x104c   : > { %v3966_v15 = vpop.permute.xlu2 %3965 }
0x104d   : > { %v3976_v14 = vmax.f32 %v3956_v49, %v3966_v15  ;;  %v8486_v15 = vld [vmem:[#allocation4 + $0xf8] sm:$0xff] }
0x104f   : > { %5357 = vmatmul.msk.f32.gmra.mxu2 %vm1132_vm8, %v3976_v14 }
0x1054   : > { %v6285_v27 = vpop.permute.xlu2 %6284 }
0x1055   : > { %v6286_v31 = vunpack.i.l.bf16 %v6285_v27  ;;  %v6287_v4 = vunpack.i.h.bf16 %v6285_v27 }
0x1057   : > { %4232 = vmatpush.msrb.mxu3 %v6286_v31 }
0x1059   : > { %4233 = vmatpush.msrb.mxu3 %v6287_v4 }
0x105b   : > { %4234 = vmatpush.msrb.mxu3 %v6296_v41  ;;  %v8492_v41 = vld [vmem:[#allocation10 + $0x38] sm:$0xff] }
0x105d   : > { %v6300_v25 = vpop.permute.xlu2 %6299  ;;  %4235 = vmatpush.msrb.mxu3 %v6297_v24  ;;  %v8494_v24 = vld [vmem:[#allocation4 + $0xe8] sm:$0xff] }
0x105e   : > { %v6301_v42 = vunpack.i.l.bf16 %v6300_v25  ;;  %v6302_v16 = vunpack.i.h.bf16 %v6300_v25  ;;  %v8496_v25 = vld [vmem:[#allocation10 + $0x30] sm:$0xff] }
0x1060   : > { %4271 = vmatpush.msrb.mxu0 %v6301_v42  ;;  %v8499_v42 = vld [vmem:[#allocation10 + $0x28] sm:$0xff] }
0x1062   : > { %4272 = vmatpush.msrb.mxu0 %v6302_v16 }
0x1065   : > { %v6310_v39 = vpop.permute.xlu2 %6309 }
0x1066   : > { %v6311_v44 = vunpack.i.l.bf16 %v6310_v39  ;;  %v6312_v22 = vunpack.i.h.bf16 %v6310_v39  ;;  %v8501_v39 = vld [vmem:[#allocation4 + $0xe0] sm:$0xff] }
0x1068   : > { %4273 = vmatpush.msrb.mxu0 %v6311_v44 }
0x106a   : > { %4274 = vmatpush.msrb.mxu0 %v6312_v22  ;;  %v8507_v22 = vld [vmem:[#allocation4 + $0xd8] sm:$0xff] }
0x106c   : > { %v3968_v60 = vpop.permute.xlu1 %3967 }
0x106d   : > { %v3977_v30 = vmax.f32 %v8409_v54, %v3968_v60  ;;  %v6325_v57 = vpop.permute.xlu2 %6324 }
0x106e   : > { %v6326_v12 = vunpack.i.l.bf16 %v6325_v57  ;;  %v6327_v3 = vunpack.i.h.bf16 %v6325_v57 }
0x106f   : > { %5358 = vmatmul.msk.f32.gmra.mxu2 %vm1132_vm8, %v3977_v30 }
0x1074   : > { %v3970_v34 = vpop.permute.xlu0 %3969  ;;  %v6305_v1 = vpop.permute.xlu1 %6304 }
0x1075   : > { %v3978_v55 = vmax.f32 %v3958_v51, %v3970_v34  ;;  %v6306_v47 = vunpack.i.l.bf16 %v6305_v1  ;;  %v6307_v48 = vunpack.i.h.bf16 %v6305_v1  ;;  %v6340_v17 = vpop.permute.xlu2 %6339  ;;  %v8510_v1 = vld [vmem:[#allocation4 + $0xd0] sm:$0xff] }
0x1076   : > { %v6341_v46 = vunpack.i.l.bf16 %v6340_v17  ;;  %v6342_v54 = vunpack.i.h.bf16 %v6340_v17 }
0x1077   : > { %5359 = vmatmul.msk.f32.gmra.mxu2 %vm1132_vm8, %v3978_v55  ;;  %4236 = vmatpush.msrb.mxu3 %v6306_v47 }
0x1079   : > { %4237 = vmatpush.msrb.mxu3 %v6307_v48  ;;  %v8513_v48 = vld [vmem:[#allocation10 + $0x50] sm:$0xff] }
0x107c   : > { %v6315_v43 = vpop.permute.xlu0 %6314  ;;  %v6320_v56 = vpop.permute.xlu1 %6319 }
0x107d   : > { %v6316_v49 = vunpack.i.l.bf16 %v6315_v43  ;;  %v6321_v10 = vunpack.i.l.bf16 %v6320_v56  ;;  %v6317_v35 = vunpack.i.h.bf16 %v6315_v43  ;;  %v6322_v19 = vunpack.i.h.bf16 %v6320_v56  ;;  %v6350_v36 = vpop.permute.xlu2 %6349  ;;  %v8515_v43 = vld [vmem:[#allocation4 + $0xc8] sm:$0xff] }
0x107e   : > { %v6351_v0 = vunpack.i.l.bf16 %v6350_v36  ;;  %v6352_v9 = vunpack.i.h.bf16 %v6350_v36  ;;  %v8517_v56 = vld [vmem:[#allocation10 + $0x48] sm:$0xff] }
0x107f   : > { %4238 = vmatpush.msrb.mxu3 %v6316_v49  ;;  %4275 = vmatpush.msrb.mxu0 %v6321_v10  ;;  %v8520_v49 = vld [vmem:[#allocation10 + $0x40] sm:$0xff] }
0x1080   : > { %4199 = vmatmul.f32.vlgmr.msrb.gmra.mxu2 %v8467_v63 }
0x1081   : > { %4239 = vmatpush.msrb.mxu3 %v6317_v35  ;;  %4276 = vmatpush.msrb.mxu0 %v6322_v19  ;;  %v8522_v35 = vld [vmem:[#allocation4 + $0xc0] sm:$0xff] }
0x1082   : > { %4240 = vmatmul.f32.vlgmr.msrb.gmra.mxu3 %v8469_v50 }
0x1083   : > { %4621 = vmatpush.msra.mxu3 %v6341_v46  ;;  %4277 = vmatpush.msrb.mxu0 %v6326_v12 }
0x1084   : > { %v6330_v6 = vpop.permute.xlu0 %6329  ;;  %v6335_v23 = vpop.permute.xlu1 %6334 }
0x1085   : > { %v6331_v62 = vunpack.i.l.bf16 %v6330_v6  ;;  %v6336_v38 = vunpack.i.l.bf16 %v6335_v23  ;;  %4622 = vmatpush.msra.mxu3 %v6342_v54  ;;  %4278 = vmatpush.msrb.mxu0 %v6327_v3  ;;  %v6332_v45 = vunpack.i.h.bf16 %v6330_v6  ;;  %v6337_v51 = vunpack.i.h.bf16 %v6335_v23  ;;  %v6375_v55 = vpop.permute.xlu2 %6374  ;;  %v8530_v3 = vld [vmem:[#allocation10 + $0x68] sm:$0xff]  ;;  %v8532_v54 = vld [vmem:[#allocation10 + $0x60] sm:$0xff]  ;;  %v8535_v6 = vld [vmem:[#allocation10 + $0x58] sm:$0xff] }
0x1086   : > { %v6376_v10 = vunpack.i.l.bf16 %v6375_v55  ;;  %v6377_v19 = vunpack.i.h.bf16 %v6375_v55  ;;  %v8565_v23 = vld [vmem:[#allocation10 + $0xa8] sm:$0xff] }
0x1087   : > { %4623 = vmatpush.msra.mxu3 %v6351_v0  ;;  %4279 = vmatpush.msrb.mxu0 %v6331_v62  ;;  %8934 = vst [vmem:[#allocation14_spill] sm:$0xff] %v8565_v23  ;;  %v8572_v0 = vld [vmem:[#allocation10 + $0xb8] sm:$0xff] }
0x1088   : > { %4580 = vmatpush.msra.mxu2 %v6336_v38  ;;  %8935 = vst [vmem:[#allocation18_spill] sm:$0xff] %v8572_v0 }
0x1089   : > { %4624 = vmatpush.msra.mxu3 %v6352_v9  ;;  %4280 = vmatpush.msrb.mxu0 %v6332_v45 }
0x108a   : > { %4581 = vmatpush.msra.mxu2 %v6337_v51  ;;  %4243 = vmatmul.f32.gmra.mxu3 %v8473_v26 }
0x108b   : > { %4202 = vmatmul.f32.gmra.mxu2 %v8475_v5  ;;  %4281 = vmatmul.f32.vlgmr.msrb.gmra.mxu0 %v8477_v11 }
0x108c   : > { %5365 = vmatpush.msk.msra.mxu0 %vm4348_vm10, %v4690_v18  ;;  %v6355_v14 = vpop.permute.xlu0 %6354  ;;  %v6345_v27 = vpop.permute.xlu1 %6344 }
0x108d   : > { %v6346_v31 = vunpack.i.l.bf16 %v6345_v27  ;;  %v6347_v4 = vunpack.i.h.bf16 %v6345_v27  ;;  %v6356_v16 = vunpack.i.l.bf16 %v6355_v14  ;;  %v6357_v44 = vunpack.i.h.bf16 %v6355_v14 }
0x108e   : > { %4893 = vmatpush.msrb.mxu0 %v8486_v15 }
0x108f   : > { %4582 = vmatpush.msra.mxu2 %v6346_v31 }
0x1090   : > { %4894 = vmatpush.msrb.mxu0 %v8489_v33 }
0x1091   : > { %4583 = vmatpush.msra.mxu2 %v6347_v4 }
0x1092   : > { %4895 = vmatpush.msrb.mxu0 %v8494_v24  ;;  %4246 = vmatmul.f32.gmra.mxu3 %v8492_v41 }
0x1093   : > { %4205 = vmatmul.f32.gmra.mxu2 %v8496_v25  ;;  %4284 = vmatmul.f32.gmra.mxu0 %v8499_v42 }
0x1094   : > { %4896 = vmatpush.msrb.mxu0 %v8501_v39  ;;  %4584 = vmatpush.msra.mxu2 %v6356_v16  ;;  %v6365_v60 = vpop.permute.xlu0 %6364  ;;  %v6360_v30 = vpop.permute.xlu1 %6359 }
0x1095   : > { %v6366_v57 = vunpack.i.l.bf16 %v6365_v60  ;;  %v6361_v34 = vunpack.i.l.bf16 %v6360_v30  ;;  %v6362_v47 = vunpack.i.h.bf16 %v6360_v30  ;;  %v6367_v17 = vunpack.i.h.bf16 %v6365_v60 }
0x1096   : > { %4897 = vmatpush.msrb.mxu0 %v8507_v22  ;;  %4585 = vmatpush.msra.mxu2 %v6357_v44 }
0x1097   : > { %4625 = vmatpush.msra.mxu3 %v6361_v34 }
0x1098   : > { %4898 = vmatpush.msrb.mxu0 %v8510_v1  ;;  %4586 = vmatpush.msra.mxu2 %v6366_v57 }
0x1099   : > { %4626 = vmatpush.msra.mxu3 %v6362_v47 }
0x109a   : > { %4899 = vmatpush.msrb.mxu0 %v8515_v43  ;;  %4587 = vmatpush.msra.mxu2 %v6367_v17 }
0x109b   : > { %4249 = vmatmul.f32.gmra.mxu3 %v8513_v48  ;;  %4208 = vmatmul.f32.gmra.mxu2 %v8517_v56 }
0x109c   : > { %4900 = vmatpush.msrb.mxu0 %v8522_v35  ;;  %4588 = vmatpush.msra.mxu2 %v6376_v10  ;;  %v6370_v12 = vpop.permute.xlu1 %6369 }
0x109d   : > { %4287 = vmatmul.f32.gmra.mxu0 %v8520_v49  ;;  %v6371_v46 = vunpack.i.l.bf16 %v6370_v12  ;;  %v6372_v36 = vunpack.i.h.bf16 %v6370_v12 }
0x109e   : > { %4901 = vmatpush.msrb.mxu0 %v8369_v8  ;;  %4589 = vmatpush.msra.mxu2 %v6377_v19  ;;  %v8543_v8 = vld [vmem:[#allocation10 + $0x80] sm:$0xff] }
0x109f   : > { %4627 = vmatpush.msra.mxu3 %v6371_v46 }
0x10a0   : > { %4902 = vmatpush.msrb.mxu0 %v8372_v20  ;;  %v8545_v20 = vld [vmem:[#allocation10 + $0x78] sm:$0xff] }
0x10a1   : > { %4628 = vmatpush.msra.mxu3 %v6372_v36 }
0x10a2   : > { %4903 = vmatpush.msrb.mxu0 %v8375_v32  ;;  %v8548_v32 = vld [vmem:[#allocation10 + $0x70] sm:$0xff] }
0x10a3   : > { %4252 = vmatmul.f32.gmra.mxu3 %v8530_v3  ;;  %4211 = vmatmul.f32.gmra.mxu2 %v8532_v54 }
0x10a4   : > { %4904 = vmatpush.msrb.mxu0 %v8378_v29  ;;  %v8554_v29 = vld [vmem:[#allocation10 + $0x98] sm:$0xff] }
0x10a5   : > { %4290 = vmatmul.f32.gmra.mxu0 %v8535_v6 }
0x10a6   : > { %4905 = vmatpush.msrb.mxu0 %v8381_v59  ;;  %v8556_v59 = vld [vmem:[#allocation10 + $0x90] sm:$0xff] }
0x10a8   : > { %4906 = vmatpush.msrb.mxu0 %v8384_v21  ;;  %v8558_v21 = vld [vmem:[#allocation10 + $0x88] sm:$0xff] }
0x10aa   : > { %4907 = vmatpush.msrb.mxu0 %v8387_v13  ;;  %v8563_v13 = vld [vmem:[#allocation10 + $0xb0] sm:$0xff] }
0x10ab   : > { %4255 = vmatmul.f32.gmra.mxu3 %v8543_v8  ;;  %4214 = vmatmul.f32.gmra.mxu2 %v8545_v20  ;;  %8933 = vst [vmem:[#allocation13_spill] sm:$0xff] %v8563_v13 }
0x10ac   : > { %4908 = vmatpush.msrb.mxu0 %v8390_v28  ;;  %v8567_v28 = vld [vmem:[#allocation10 + $0xa0] sm:$0xff] }
0x10ad   : > { %4293 = vmatmul.f32.gmra.mxu0 %v8548_v32 }
0x10b3   : > { %4258 = vmatmul.f32.gmra.mxu3 %v8554_v29  ;;  %4217 = vmatmul.f32.gmra.mxu2 %v8556_v59 }
0x10b5   : > { %4296 = vmatmul.f32.gmra.mxu0 %v8558_v21 }
0x10bb   : > { %4261 = vmatmul.f32.gmra.mxu3 %v8563_v13  ;;  %4220 = vmatmul.f32.gmra.mxu2 %v8565_v23 }
0x10bd   : > { %4299 = vmatmul.f32.gmra.mxu0 %v8567_v28 }
0x10c5   : > { %4302 = vmatmul.f32.gmra.mxu0 %v8572_v0 }
0x10ca   : > { %v4014_v62 = vpop.f32.mrf.mxu2 }
0x10d2   : > { %v4017_v38 = vpop.f32.mrf.mxu2 }
0x10f2   : > { %v4020_v9 = vpop.f32.mrf.mxu2 }
0x10fa   : > { %v4023_v45 = vpop.f32.mrf.mxu2 }
0x1103   : > { %v4200_v51 = vpop.f32.mrf.mxu2 }
0x1105   : > { %v4241_v18 = vpop.f32.mrf.mxu3 }
0x1106   : > { %v4242_v47 = vadd.f32 %v4241_v18, %v4200_v51 }
0x1108   : > { %v4282_v14 = vpop.f32.mrf.mxu0 }
0x1109   : > { %v4283_v12 = vadd.f32 %v4282_v14, %v4242_v47 }
0x110d   : > { %v4244_v27 = vpop.f32.mrf.mxu3 }
0x110e   : > { %v4203_v31 = vpop.f32.mrf.mxu2 }
0x110f   : > { %v4245_v38 = vadd.f32 %v4244_v27, %v4203_v31 }
0x1110   : > { %v4285_v4 = vpop.f32.mrf.mxu0 }
0x1111   : > { %v4286_v40 = vadd.f32 %v4285_v4, %v4245_v38 }
0x1115   : > { %v4247_v16 = vpop.f32.mrf.mxu3 }
0x1116   : > { %v4206_v44 = vpop.f32.mrf.mxu2 }
0x1117   : > { %v4248_v0 = vadd.f32 %v4247_v16, %v4206_v44 }
0x111a   : > { %v4288_v60 = vpop.f32.mrf.mxu0 }
0x111b   : > { %v4289_v27 = vadd.f32 %v4288_v60, %v4248_v0 }
0x111e   : > { %v4250_v30 = vpop.f32.mrf.mxu3  ;;  %v4209_v57 = vpop.f32.mrf.mxu2 }
0x1122   : > { %v4291_v34 = vpop.f32.mrf.mxu0 }
0x1126   : > { %v4253_v55 = vpop.f32.mrf.mxu3  ;;  %v4212_v17 = vpop.f32.mrf.mxu2 }
0x1127   : > { %v4254_v10 = vadd.f32 %v4253_v55, %v4212_v17 }
0x112a   : > { %v4294_v19 = vpop.f32.mrf.mxu0 }
0x112b   : > { %v4295_v46 = vadd.f32 %v4294_v19, %v4254_v10  ;;  %v4251_v10 = vadd.f32 %v4250_v30, %v4209_v57 }
0x112d   : > { %v4306_v36 = vmax.f32 %v4283_v12, %v4295_v46 }
0x112e   : > { %v4256_v62 = vpop.f32.mrf.mxu3  ;;  %v4215_v45 = vpop.f32.mrf.mxu2 }
0x112f   : > { %v4310_v9 = vmax.f32 %v4306_v36, 0.0  ;;  %v4257_v58 = vadd.f32 %v4256_v62, %v4215_v45 }
0x1131   : > { %4318 = vrot.lane.b32.xlu0 %v4310_v9, %s6635_s23 }
0x1132   : > { %v4297_v53 = vpop.f32.mrf.mxu0 }
0x1133   : > { %v4298_v7 = vadd.f32 %v4297_v53, %v4257_v58 }
0x1135   : > { %v4307_v13 = vmax.f32 %v4286_v40, %v4298_v7  ;;  %v4292_v40 = vadd.f32 %v4291_v34, %v4251_v10 }
0x1136   : > { %v4259_v23 = vpop.f32.mrf.mxu3  ;;  %v4218_v18 = vpop.f32.mrf.mxu2 }
0x1137   : > { %v4311_v51 = vmax.f32 %v4307_v13, 0.0  ;;  %v4260_v55 = vadd.f32 %v4259_v23, %v4218_v18  ;;  %v6413_v23 = vpack.i.bf16 %v8489_v33, %v8486_v15  ;;  %v6448_v15 = vpack.i.bf16 %v8522_v35, %v8515_v43 }
0x1139   : > { %4320 = vrot.lane.b32.xlu2 %v4311_v51, %s6635_s23  ;;  %6379 = vrot.lane.b32.xlu0 %v8317_v2, %s6634_s14 }
0x113a   : > { %v4300_v14 = vpop.f32.mrf.mxu0 }
0x113b   : > { %v4301_v31 = vadd.f32 %v4300_v14, %v4260_v55 }
0x113d   : > { %v4308_v47 = vmax.f32 %v4289_v27, %v4301_v31 }
0x113e   : > { %v4262_v17 = vpop.f32.mrf.mxu3  ;;  %v4221_v4 = vpop.f32.mrf.mxu2 }
0x113f   : > { %v4312_v19 = vmax.f32 %v4308_v47, 0.0  ;;  %v4263_v53 = vadd.f32 %v4262_v17, %v4221_v4 }
0x1141   : > { %4322 = vrot.lane.b32.xlu1 %v4312_v19, %s6635_s23  ;;  %6384 = vrot.lane.b32.xlu2 %v8308_v61, %s6635_s23 }
0x1142   : > { %6389 = vrot.lane.b32.xlu0 %v8308_v61, %s6634_s14  ;;  %v4303_v7 = vpop.f32.mrf.mxu0  ;;  %v6428_v61 = vpack.i.bf16 %v8501_v39, %v8494_v24 }
0x1143   : > { %v4304_v2 = vadd.f32 %v4303_v7, %v4263_v53 }
0x1145   : > { %v4309_v58 = vmax.f32 %v4292_v40, %v4304_v2 }
0x1147   : > { %v8584_v13 = vmax.f32 %v4309_v58, 0.0 }
0x1149   : > { %6394 = vrot.lane.b32.xlu1 %v8331_v37, %s6635_s23  ;;  %6399 = vrot.lane.b32.xlu2 %v8331_v37, %s6634_s14  ;;  %v6438_v37 = vpack.i.bf16 %v8510_v1, %v8507_v22 }
0x114a   : > { %4324 = vrot.lane.b32.xlu0 %v8584_v13, %s6635_s23 }
0x1151   : > { %6404 = vrot.lane.b32.xlu1 %v8312_v52, %s6635_s23  ;;  %6409 = vrot.lane.b32.xlu2 %v8312_v52, %s6634_s14 }
0x1152   : > { %6414 = vrot.lane.b32.xlu0 %v6413_v23, %s6634_s14 }
0x1159   : > { %6429 = vrot.lane.b32.xlu1 %v6428_v61, %s6635_s23  ;;  %6419 = vrot.lane.b32.xlu2 %v6413_v23, %s6635_s23 }
0x115a   : > { %6424 = vrot.lane.b32.xlu0 %v6428_v61, %s6634_s14 }
0x1161   : > { %6439 = vrot.lane.b32.xlu1 %v6438_v37, %s6635_s23  ;;  %6434 = vrot.lane.b32.xlu2 %v6438_v37, %s6634_s14 }
0x1162   : > { %6449 = vrot.lane.b32.xlu0 %v6448_v15, %s6635_s23 }
0x1169   : > { %6444 = vrot.lane.b32.xlu2 %v6448_v15, %s6634_s14 }
0x1193   : > { %v4321_v52 = vpop.permute.xlu2 %4320 }
0x1194   : > { %v4331_v35 = vmax.f32 %v4311_v51, %v4321_v52 }
0x119b   : > { %v6385_v33 = vpop.permute.xlu2 %6384 }
0x119c   : > { %v6386_v24 = vunpack.i.l.bf16 %v6385_v33  ;;  %v6387_v39 = vunpack.i.h.bf16 %v6385_v33 }
0x119e   : > { %4590 = vmatpush.msra.mxu2 %v6386_v24 }
0x11a0   : > { %4591 = vmatpush.msra.mxu2 %v6387_v39 }
0x11a3   : > { %v6400_v0 = vpop.permute.xlu2 %6399  ;;  %v4319_v16 = vpop.permute.xlu0 %4318 }
0x11a4   : > { %v4330_v22 = vmax.f32 %v4310_v9, %v4319_v16  ;;  %v6401_v9 = vunpack.i.l.bf16 %v6400_v0  ;;  %v6402_v45 = vunpack.i.h.bf16 %v6400_v0 }
0x11a6   : > { %5361 = vmatmul.msk.f32.vlgmr.msrb.gmra.mxu1 %vm4335_vm11, %v4330_v22 }
0x11ab   : > { %v6410_v1 = vpop.permute.xlu2 %6409  ;;  %v6380_v43 = vpop.permute.xlu0 %6379 }
0x11ac   : > { %v6381_v44 = vunpack.i.l.bf16 %v6380_v43  ;;  %v6382_v60 = vunpack.i.h.bf16 %v6380_v43  ;;  %v6411_v14 = vunpack.i.l.bf16 %v6410_v1  ;;  %v6412_v47 = vunpack.i.h.bf16 %v6410_v1 }
0x11ae   : > { %5362 = vmatmul.msk.f32.gmra.mxu1 %vm4335_vm11, %v4331_v35  ;;  %4629 = vmatpush.msra.mxu3 %v6381_v44  ;;  %v8936_v44 = vld [vmem:[#allocation18_spill] sm:$0xff] }
0x11b0   : > { %4630 = vmatpush.msra.mxu3 %v6382_v60  ;;  %v8937_v60 = vld [vmem:[#allocation14_spill] sm:$0xff] }
0x11b3   : > { %v4323_v30 = vpop.permute.xlu1 %4322  ;;  %v6420_v57 = vpop.permute.xlu2 %6419 }
0x11b4   : > { %v4332_v34 = vmax.f32 %v4312_v19, %v4323_v30  ;;  %v6421_v12 = vunpack.i.l.bf16 %v6420_v57  ;;  %v6390_v46 = vpop.permute.xlu0 %6389  ;;  %v6422_v62 = vunpack.i.h.bf16 %v6420_v57  ;;  %v8938_v30 = vld [vmem:[#allocation13_spill] sm:$0xff] }
0x11b5   : > { %v6391_v36 = vunpack.i.l.bf16 %v6390_v46  ;;  %v6392_v38 = vunpack.i.h.bf16 %v6390_v46 }
0x11b6   : > { %5363 = vmatmul.msk.f32.gmra.mxu1 %vm4335_vm11, %v4332_v34 }
0x11b7   : > { %4631 = vmatpush.msra.mxu3 %v6391_v36  ;;  %4934 = vmatpush.msrb.mxu1 %v6421_v12 }
0x11b9   : > { %4632 = vmatpush.msra.mxu3 %v6392_v38  ;;  %4935 = vmatpush.msrb.mxu1 %v6422_v62 }
0x11bb   : > { %4633 = vmatpush.msra.mxu3 %v6401_v9  ;;  %v6395_v51 = vpop.permute.xlu1 %6394  ;;  %v6435_v53 = vpop.permute.xlu2 %6434 }
0x11bc   : > { %v6396_v18 = vunpack.i.l.bf16 %v6395_v51  ;;  %v4325_v55 = vpop.permute.xlu0 %4324  ;;  %v6397_v31 = vunpack.i.h.bf16 %v6395_v51  ;;  %v6436_v15 = vunpack.i.l.bf16 %v6435_v53  ;;  %v6437_v33 = vunpack.i.h.bf16 %v6435_v53 }
0x11bd   : > { %v4333_v27 = vmax.f32 %v8584_v13, %v4325_v55  ;;  %4634 = vmatpush.msra.mxu3 %v6402_v45 }
0x11be   : > { %4592 = vmatpush.msra.mxu2 %v6396_v18 }
0x11bf   : > { %5364 = vmatmul.msk.f32.gmra.mxu1 %vm4335_vm11, %v4333_v27  ;;  %4635 = vmatpush.msra.mxu3 %v6411_v14 }
0x11c0   : > { %4593 = vmatpush.msra.mxu2 %v6397_v31 }
0x11c1   : > { %4636 = vmatpush.msra.mxu3 %v6412_v47 }
0x11c2   : > { %4637 = vmatmul.f32.vlgmr.msra.gmra.mxu3 %v8477_v11 }
0x11c3   : > { %v6405_v17 = vpop.permute.xlu1 %6404  ;;  %v6445_v52 = vpop.permute.xlu2 %6444 }
0x11c4   : > { %v6406_v10 = vunpack.i.l.bf16 %v6405_v17  ;;  %v6415_v19 = vpop.permute.xlu0 %6414  ;;  %v6407_v4 = vunpack.i.h.bf16 %v6405_v17  ;;  %v6446_v0 = vunpack.i.l.bf16 %v6445_v52  ;;  %v6447_v1 = vunpack.i.h.bf16 %v6445_v52 }
0x11c5   : > { %v6416_v7 = vunpack.i.l.bf16 %v6415_v19  ;;  %v6417_v40 = vunpack.i.h.bf16 %v6415_v19 }
0x11c6   : > { %4594 = vmatpush.msra.mxu2 %v6406_v10 }
0x11c7   : > { %4555 = vmatmul.f32.vlgmr.msra.gmra.mxu1 %v8467_v63 }
0x11c8   : > { %4595 = vmatpush.msra.mxu2 %v6407_v4 }
0x11c9   : > { %4596 = vmatmul.f32.vlgmr.msra.gmra.mxu2 %v8469_v50 }
0x11ca   : > { %4975 = vmatpush.msrb.mxu2 %v6416_v7  ;;  %4640 = vmatmul.f32.gmra.mxu3 %v8499_v42 }
0x11cb   : > { %v6430_v2 = vpop.permute.xlu1 %6429 }
0x11cc   : > { %v6431_v58 = vunpack.i.l.bf16 %v6430_v2  ;;  %v6425_v13 = vpop.permute.xlu0 %6424  ;;  %4976 = vmatpush.msrb.mxu2 %v6417_v40  ;;  %v6432_v61 = vunpack.i.h.bf16 %v6430_v2 }
0x11cd   : > { %v6426_v23 = vunpack.i.l.bf16 %v6425_v13  ;;  %v6427_v37 = vunpack.i.h.bf16 %v6425_v13 }
0x11ce   : > { %4936 = vmatpush.msrb.mxu1 %v6431_v58 }
0x11cf   : > { %4977 = vmatpush.msrb.mxu2 %v6426_v23  ;;  %4558 = vmatmul.f32.gmra.mxu1 %v8475_v5 }
0x11d0   : > { %4937 = vmatpush.msrb.mxu1 %v6432_v61 }
0x11d1   : > { %4978 = vmatpush.msrb.mxu2 %v6427_v37 }
0x11d2   : > { %4599 = vmatmul.f32.gmra.mxu2 %v8473_v26  ;;  %4643 = vmatmul.f32.gmra.mxu3 %v8520_v49 }
0x11d3   : > { %4979 = vmatpush.msrb.mxu2 %v6436_v15  ;;  %v6440_v24 = vpop.permute.xlu1 %6439 }
0x11d4   : > { %v6441_v39 = vunpack.i.l.bf16 %v6440_v24  ;;  %v6450_v16 = vpop.permute.xlu0 %6449  ;;  %v6442_v22 = vunpack.i.h.bf16 %v6440_v24 }
0x11d5   : > { %4980 = vmatpush.msrb.mxu2 %v6437_v33  ;;  %v6451_v43 = vunpack.i.l.bf16 %v6450_v16  ;;  %v6452_v35 = vunpack.i.h.bf16 %v6450_v16 }
0x11d6   : > { %4938 = vmatpush.msrb.mxu1 %v6441_v39 }
0x11d7   : > { %4981 = vmatpush.msrb.mxu2 %v6446_v0  ;;  %4561 = vmatmul.f32.gmra.mxu1 %v8496_v25 }
0x11d8   : > { %4939 = vmatpush.msrb.mxu1 %v6442_v22 }
0x11d9   : > { %4982 = vmatpush.msrb.mxu2 %v6447_v1 }
0x11da   : > { %4602 = vmatmul.f32.gmra.mxu2 %v8492_v41  ;;  %4940 = vmatpush.msrb.mxu1 %v6451_v43 }
0x11db   : > { %4646 = vmatmul.f32.gmra.mxu3 %v8535_v6 }
0x11dc   : > { %4941 = vmatpush.msrb.mxu1 %v6452_v35  ;;  %v8939_v35 = vld [vmem:[#allocation20_spill] sm:$0xff] }
0x11df   : > { %4564 = vmatmul.f32.gmra.mxu1 %v8517_v56 }
0x11e2   : > { %4605 = vmatmul.f32.gmra.mxu2 %v8513_v48 }
0x11e3   : > { %4649 = vmatmul.f32.gmra.mxu3 %v8548_v32 }
0x11e7   : > { %4567 = vmatmul.f32.gmra.mxu1 %v8532_v54 }
0x11ea   : > { %4608 = vmatmul.f32.gmra.mxu2 %v8530_v3 }
0x11eb   : > { %4652 = vmatmul.f32.gmra.mxu3 %v8558_v21 }
0x11ef   : > { %4570 = vmatmul.f32.gmra.mxu1 %v8545_v20 }
0x11f2   : > { %4611 = vmatmul.f32.gmra.mxu2 %v8543_v8 }
0x11f3   : > { %4655 = vmatmul.f32.gmra.mxu3 %v8567_v28 }
0x11f7   : > { %4573 = vmatmul.f32.gmra.mxu1 %v8556_v59 }
0x11fa   : > { %4614 = vmatmul.f32.gmra.mxu2 %v8554_v29 }
0x11fb   : > { %4658 = vmatmul.f32.gmra.mxu3 %v8936_v44 }
0x11ff   : > { %4576 = vmatmul.f32.gmra.mxu1 %v8937_v60 }
0x1202   : > { %4617 = vmatmul.f32.gmra.mxu2 %v8938_v30 }
0x1223   : > { %v4369_v57 = vpop.f32.mrf.mxu1 }
0x1224   : > { %4382 = vst.msk [vmem:[#allocation5] sm:$0xff] %vm4381_vm12, %v4369_v57 }
0x122b   : > { %v4372_v34 = vpop.f32.mrf.mxu1 }
0x122c   : > { %4383 = vst.msk [vmem:[#allocation5 + $0x8] sm:$0xff] %vm4381_vm12, %v4372_v34 }
0x1233   : > { %v4375_v12 = vpop.f32.mrf.mxu1 }
0x1234   : > { %4384 = vst.msk [vmem:[#allocation5 + $0x10] sm:$0xff] %vm4381_vm12, %v4375_v12 }
0x123c   : > { %v4378_v46 = vpop.f32.mrf.mxu1 }
0x123d   : > { %4385 = vst.msk [vmem:[#allocation5 + $0x18] sm:$0xff] %vm4381_vm12, %v4378_v46 }
0x1244   : > { %v4556_v36 = vpop.f32.mrf.mxu1 }
0x1245   : > { %v4638_v62 = vpop.f32.mrf.mxu3 }
0x124c   : > { %v4597_v38 = vpop.f32.mrf.mxu2  ;;  %v4559_v9 = vpop.f32.mrf.mxu1 }
0x124d   : > { %v4641_v45 = vpop.f32.mrf.mxu3  ;;  %v4598_v19 = vadd.f32 %v4597_v38, %v4556_v36 }
0x124f   : > { %v4639_v40 = vadd.f32 %v4638_v62, %v4598_v19 }
0x1254   : > { %v4562_v51 = vpop.f32.mrf.mxu1 }
0x1255   : > { %v4600_v18 = vpop.f32.mrf.mxu2  ;;  %v4644_v55 = vpop.f32.mrf.mxu3 }
0x1256   : > { %v4601_v23 = vadd.f32 %v4600_v18, %v4559_v9 }
0x1258   : > { %v4642_v52 = vadd.f32 %v4641_v45, %v4601_v23 }
0x125c   : > { %v4565_v14 = vpop.f32.mrf.mxu1 }
0x125d   : > { %v4603_v27 = vpop.f32.mrf.mxu2 }
0x125e   : > { %v4647_v31 = vpop.f32.mrf.mxu3  ;;  %v4604_v16 = vadd.f32 %v4603_v27, %v4562_v51  ;;  %v8940_v51 = vld [vmem:[#allocation21_spill] sm:$0xff] }
0x1260   : > { %v4645_v57 = vadd.f32 %v4644_v55, %v4604_v16 }
0x1264   : > { %v4568_v17 = vpop.f32.mrf.mxu1 }
0x1265   : > { %v4606_v47 = vpop.f32.mrf.mxu2 }
0x1266   : > { %v4650_v10 = vpop.f32.mrf.mxu3  ;;  %v4607_v36 = vadd.f32 %v4606_v47, %v4565_v14  ;;  %v8941_v14 = vld [vmem:[#allocation19_spill] sm:$0xff] }
0x1267   : > { %v8942_v47 = vld [vmem:[#allocation15_spill] sm:$0xff] }
0x1268   : > { %v4648_v18 = vadd.f32 %v4647_v31, %v4607_v36 }
0x126c   : > { %v4571_v7 = vpop.f32.mrf.mxu1 }
0x126d   : > { %v4609_v4 = vpop.f32.mrf.mxu2 }
0x126e   : > { %v4610_v53 = vadd.f32 %v4609_v4, %v4568_v17  ;;  %v4653_v58 = vpop.f32.mrf.mxu3 }
0x1270   : > { %v4651_v2 = vadd.f32 %v4650_v10, %v4610_v53 }
0x1272   : > { %v4662_v13 = vmax.f32 %v4639_v40, %v4651_v2 }
0x1274   : > { %v4666_v61 = vmax.f32 %v4662_v13, 0.0  ;;  %v4574_v24 = vpop.f32.mrf.mxu1 }
0x1275   : > { %v4612_v37 = vpop.f32.mrf.mxu2 }
0x1276   : > { %v4613_v15 = vadd.f32 %v4612_v37, %v4571_v7  ;;  %4674 = vrot.lane.b32.xlu1 %v4666_v61, %s6635_s23  ;;  %v4656_v0 = vpop.f32.mrf.mxu3 }
0x1278   : > { %v4654_v33 = vadd.f32 %v4653_v58, %v4613_v15 }
0x127a   : > { %v4663_v39 = vmax.f32 %v4642_v52, %v4654_v33 }
0x127c   : > { %v4667_v22 = vmax.f32 %v4663_v39, 0.0  ;;  %v4577_v46 = vpop.f32.mrf.mxu1 }
0x127d   : > { %v4615_v1 = vpop.f32.mrf.mxu2 }
0x127e   : > { %v4616_v43 = vadd.f32 %v4615_v1, %v4574_v24  ;;  %4676 = vrot.lane.b32.xlu0 %v4667_v22, %s6635_s23  ;;  %6454 = vrot.lane.b32.xlu1 %v8939_v35, %s6634_s14  ;;  %v4659_v9 = vpop.f32.mrf.mxu3 }
0x1280   : > { %v4657_v34 = vadd.f32 %v4656_v0, %v4616_v43 }
0x1282   : > { %v4664_v12 = vmax.f32 %v4645_v57, %v4657_v34 }
0x1284   : > { %v4668_v62 = vmax.f32 %v4664_v12, 0.0 }
0x1285   : > { %v4618_v38 = vpop.f32.mrf.mxu2 }
0x1286   : > { %v4619_v45 = vadd.f32 %v4618_v38, %v4577_v46  ;;  %4678 = vrot.lane.b32.xlu2 %v4668_v62, %s6635_s23  ;;  %6459 = vrot.lane.b32.xlu0 %v8939_v35, %s6635_s23 }
0x1287   : > { %6464 = vrot.lane.b32.xlu1 %v8940_v51, %s6634_s14 }
0x1288   : > { %v4660_v27 = vadd.f32 %v4659_v9, %v4619_v45 }
0x128a   : > { %v4665_v17 = vmax.f32 %v4648_v18, %v4660_v27 }
0x128c   : > { %v4669_v55 = vmax.f32 %v4665_v17, 0.0 }
0x128e   : > { %6469 = vrot.lane.b32.xlu2 %v8940_v51, %s6635_s23  ;;  %6474 = vrot.lane.b32.xlu0 %v8941_v14, %s6634_s14 }
0x128f   : > { %4680 = vrot.lane.b32.xlu1 %v4669_v55, %s6635_s23 }
0x1296   : > { %6479 = vrot.lane.b32.xlu2 %v8941_v14, %s6635_s23  ;;  %6484 = vrot.lane.b32.xlu0 %v8942_v47, %s6634_s14 }
0x1297   : > { %6489 = vrot.lane.b32.xlu1 %v8942_v47, %s6635_s23 }
0x12e0   : > { %v4679_v19 = vpop.permute.xlu2 %4678 }
0x12e1   : > { %v4688_v23 = vmax.f32 %v4668_v62, %v4679_v19 }
0x12e8   : > { %v4675_v31 = vpop.permute.xlu1 %4674  ;;  %v6470_v2 = vpop.permute.xlu2 %6469 }
0x12e9   : > { %v4686_v10 = vmax.f32 %v4666_v61, %v4675_v31  ;;  %v6471_v24 = vunpack.i.l.bf16 %v6470_v2  ;;  %v6472_v0 = vunpack.i.h.bf16 %v6470_v2 }
0x12eb   : > { %5366 = vmatmul.msk.f32.vlgmr.msra.gmra.mxu0 %vm4335_vm11, %v4686_v10 }
0x12f0   : > { %v4677_v4 = vpop.permute.xlu0 %4676  ;;  %v6455_v7 = vpop.permute.xlu1 %6454 }
0x12f1   : > { %v4687_v53 = vmax.f32 %v4667_v22, %v4677_v4  ;;  %v6456_v40 = vunpack.i.l.bf16 %v6455_v7  ;;  %v6457_v58 = vunpack.i.h.bf16 %v6455_v7  ;;  %v6480_v39 = vpop.permute.xlu2 %6479 }
0x12f2   : > { %v6481_v22 = vunpack.i.l.bf16 %v6480_v39  ;;  %v6482_v57 = vunpack.i.h.bf16 %v6480_v39 }
0x12f3   : > { %5367 = vmatmul.msk.f32.gmra.mxu0 %vm4335_vm11, %v4687_v53  ;;  %4983 = vmatpush.msrb.mxu2 %v6456_v40 }
0x12f5   : > { %4984 = vmatpush.msrb.mxu2 %v6457_v58 }
0x12f8   : > { %v6460_v13 = vpop.permute.xlu0 %6459 }
0x12f9   : > { %v6461_v37 = vunpack.i.l.bf16 %v6460_v13  ;;  %v6465_v15 = vpop.permute.xlu1 %6464  ;;  %v6462_v33 = vunpack.i.h.bf16 %v6460_v13 }
0x12fa   : > { %v6466_v52 = vunpack.i.l.bf16 %v6465_v15  ;;  %v6467_v61 = vunpack.i.h.bf16 %v6465_v15 }
0x12fb   : > { %5368 = vmatmul.msk.f32.gmra.mxu0 %vm4335_vm11, %v4688_v23  ;;  %4942 = vmatpush.msrb.mxu1 %v6461_v37 }
0x12fc   : > { %4985 = vmatpush.msrb.mxu2 %v6466_v52 }
0x12fd   : > { %4943 = vmatpush.msrb.mxu1 %v6462_v33 }
0x12fe   : > { %4986 = vmatpush.msrb.mxu2 %v6467_v61 }
0x12ff   : > { %4944 = vmatpush.msrb.mxu1 %v6471_v24 }
0x1300   : > { %v6475_v16 = vpop.permute.xlu0 %6474 }
0x1301   : > { %v6476_v1 = vunpack.i.l.bf16 %v6475_v16  ;;  %v4681_v43 = vpop.permute.xlu1 %4680  ;;  %4945 = vmatpush.msrb.mxu1 %v6472_v0  ;;  %v6477_v34 = vunpack.i.h.bf16 %v6475_v16 }
0x1302   : > { %v4689_v35 = vmax.f32 %v4669_v55, %v4681_v43 }
0x1303   : > { %4946 = vmatpush.msrb.mxu1 %v6481_v22  ;;  %4987 = vmatpush.msrb.mxu2 %v6476_v1 }
0x1304   : > { %5369 = vmatmul.msk.f32.gmra.mxu0 %vm4335_vm11, %v4689_v35 }
0x1305   : > { %4947 = vmatpush.msrb.mxu1 %v6482_v57  ;;  %4988 = vmatpush.msrb.mxu2 %v6477_v34 }
0x1308   : > { %v6485_v12 = vpop.permute.xlu0 %6484 }
0x1309   : > { %v6486_v46 = vunpack.i.l.bf16 %v6485_v12  ;;  %v6490_v36 = vpop.permute.xlu1 %6489  ;;  %v6487_v38 = vunpack.i.h.bf16 %v6485_v12 }
0x130a   : > { %v6491_v62 = vunpack.i.l.bf16 %v6490_v36  ;;  %v6492_v9 = vunpack.i.h.bf16 %v6490_v36 }
0x130b   : > { %4989 = vmatpush.msrb.mxu2 %v6486_v46 }
0x130c   : > { %4948 = vmatpush.msrb.mxu1 %v6491_v62  ;;  %4909 = vmatmul.f32.vlgmr.msrb.gmra.mxu0 %v8467_v63 }
0x130d   : > { %4990 = vmatpush.msrb.mxu2 %v6487_v38  ;;  %v5095_v38 = vld [vmem:[#allocation5 + $0x8] sm:$0xff] }
0x130e   : > { %4949 = vmatpush.msrb.mxu1 %v6492_v9  ;;  %4991 = vmatmul.f32.vlgmr.msrb.gmra.mxu2 %v8477_v11  ;;  %v5107_v9 = vld [vmem:[%s8774_s5 + $0x8] sm:$0xff] }
0x130f   : > { %4950 = vmatmul.f32.vlgmr.msrb.gmra.mxu1 %v8469_v50 }
0x1314   : > { %4912 = vmatmul.f32.gmra.mxu0 %v8475_v5 }
0x1316   : > { %4994 = vmatmul.f32.gmra.mxu2 %v8499_v42 }
0x1317   : > { %4953 = vmatmul.f32.gmra.mxu1 %v8473_v26 }
0x131c   : > { %4915 = vmatmul.f32.gmra.mxu0 %v8496_v25 }
0x131e   : > { %4997 = vmatmul.f32.gmra.mxu2 %v8520_v49 }
0x131f   : > { %4956 = vmatmul.f32.gmra.mxu1 %v8492_v41 }
0x1324   : > { %4918 = vmatmul.f32.gmra.mxu0 %v8517_v56 }
0x1326   : > { %5000 = vmatmul.f32.gmra.mxu2 %v8535_v6 }
0x1327   : > { %4959 = vmatmul.f32.gmra.mxu1 %v8513_v48 }
0x132c   : > { %4921 = vmatmul.f32.gmra.mxu0 %v8532_v54 }
0x132e   : > { %5003 = vmatmul.f32.gmra.mxu2 %v8548_v32 }
0x132f   : > { %4962 = vmatmul.f32.gmra.mxu1 %v8530_v3 }
0x1334   : > { %4924 = vmatmul.f32.gmra.mxu0 %v8545_v20 }
0x1336   : > { %5006 = vmatmul.f32.gmra.mxu2 %v8558_v21 }
0x1337   : > { %4965 = vmatmul.f32.gmra.mxu1 %v8543_v8 }
0x133c   : > { %4927 = vmatmul.f32.gmra.mxu0 %v8556_v59 }
0x133e   : > { %5009 = vmatmul.f32.gmra.mxu2 %v8567_v28  ;;  %v5044_v28 = vld [vmem:[%s8778_s9] sm:$0x3f] }
0x133f   : > { %4968 = vmatmul.f32.gmra.mxu1 %v8554_v29  ;;  %5370 = vmatpush.msk.msrb.mxu3 %vm4348_vm10, %v5044_v28 }
0x1344   : > { %4930 = vmatmul.f32.gmra.mxu0 %v8937_v60 }
0x1346   : > { %5012 = vmatmul.f32.gmra.mxu2 %v8936_v44 }
0x1347   : > { %4971 = vmatmul.f32.gmra.mxu1 %v8938_v30 }
0x1368   : > { %v4723_v63 = vpop.f32.mrf.mxu0 }
0x1369   : > { %4736 = vst.msk [vmem:[#allocation5 + $0x20] sm:$0xff] %vm4381_vm12, %v4723_v63  ;;  %v5106_v63 = vld [vmem:[%s8774_s5] sm:$0xff] }
0x1370   : > { %v4726_v50 = vpop.f32.mrf.mxu0 }
0x1371   : > { %4737 = vst.msk [vmem:[#allocation5 + $0x28] sm:$0xff] %vm4381_vm12, %v4726_v50 }
0x1378   : > { %v4729_v26 = vpop.f32.mrf.mxu0 }
0x1379   : > { %4738 = vst.msk [vmem:[#allocation5 + $0x30] sm:$0xff] %vm4381_vm12, %v4729_v26  ;;  %v5094_v26 = vld [vmem:[#allocation5] sm:$0xff] }
0x1380   : > { %v5100_v28 = vld [vmem:[#allocation5 + $0x30] sm:$0xff] }
0x1381   : > { %v4732_v5 = vpop.f32.mrf.mxu0 }
0x1382   : > { %4739 = vst.msk [vmem:[#allocation5 + $0x38] sm:$0xff] %vm4381_vm12, %v4732_v5  ;;  %v5096_v5 = vld [vmem:[#allocation5 + $0x10] sm:$0xff] }
0x1389   : > { %v4910_v11 = vpop.f32.mrf.mxu0 }
0x138c   : > { %v4951_v41 = vpop.f32.mrf.mxu1 }
0x138d   : > { %v4952_v59 = vadd.f32 %v4951_v41, %v4910_v11  ;;  %v5108_v11 = vld [vmem:[%s8774_s5 + $0x10] sm:$0xff]  ;;  %v5119_v41 = vmul.f32 %v5107_v9, %v5095_v38 }
0x1391   : > { %v4992_v25 = vpop.f32.mrf.mxu2  ;;  %v4913_v42 = vpop.f32.mrf.mxu0 }
0x1392   : > { %v4993_v30 = vadd.f32 %v4992_v25, %v4952_v59  ;;  %v5097_v25 = vld [vmem:[#allocation5 + $0x18] sm:$0xff] }
0x1394   : > { %v4954_v48 = vpop.f32.mrf.mxu1 }
0x1395   : > { %v4955_v27 = vadd.f32 %v4954_v48, %v4913_v42  ;;  %v5109_v42 = vld [vmem:[%s8774_s5 + $0x18] sm:$0xff]  ;;  %v5118_v48 = vmul.f32 %v5106_v63, %v5094_v26 }
0x1399   : > { %v4995_v56 = vpop.f32.mrf.mxu2  ;;  %v4916_v49 = vpop.f32.mrf.mxu0 }
0x139a   : > { %v4996_v31 = vadd.f32 %v4995_v56, %v4955_v27  ;;  %v5120_v56 = vmul.f32 %v5108_v11, %v5096_v5 }
0x139c   : > { %v4957_v3 = vpop.f32.mrf.mxu1  ;;  %v5133_v59 = vsel %vm4381_vm12, %v5120_v56, 0.0 }
0x139d   : > { %v4958_v53 = vadd.f32 %v4957_v3, %v4916_v49  ;;  %v5098_v49 = vld [vmem:[#allocation5 + $0x20] sm:$0xff]  ;;  %v5110_v3 = vld [vmem:[%s8774_s5 + $0x20] sm:$0xff] }
0x13a1   : > { %v4998_v54 = vpop.f32.mrf.mxu2  ;;  %v4919_v6 = vpop.f32.mrf.mxu0 }
0x13a2   : > { %v4999_v58 = vadd.f32 %v4998_v54, %v4958_v53  ;;  %v5121_v54 = vmul.f32 %v5109_v42, %v5097_v25  ;;  %v5115_v53 = vld [vmem:[%s8774_s5 + $0x48] sm:$0xff] }
0x13a4   : > { %v4960_v8 = vpop.f32.mrf.mxu1 }
0x13a5   : > { %v4961_v52 = vadd.f32 %v4960_v8, %v4919_v6  ;;  %v5131_v6 = vsel %vm4381_vm12, %v5119_v41, 0.0  ;;  %v5099_v8 = vld [vmem:[#allocation5 + $0x28] sm:$0xff] }
0x13a9   : > { %v5001_v20 = vpop.f32.mrf.mxu2  ;;  %v4922_v32 = vpop.f32.mrf.mxu0 }
0x13aa   : > { %v5002_v39 = vadd.f32 %v5001_v20, %v4961_v52  ;;  %v5111_v20 = vld [vmem:[%s8774_s5 + $0x28] sm:$0xff] }
0x13ac   : > { %v4963_v29 = vpop.f32.mrf.mxu1 }
0x13ad   : > { %v4964_v21 = vadd.f32 %v4963_v29, %v4922_v32  ;;  %v5122_v32 = vmul.f32 %v5110_v3, %v5098_v49  ;;  %v5130_v29 = vsel %vm4381_vm12, %v5118_v48, 0.0 }
0x13b1   : > { %v5004_v44 = vpop.f32.mrf.mxu2  ;;  %v4925_v60 = vpop.f32.mrf.mxu0 }
0x13b2   : > { %v5005_v45 = vadd.f32 %v5004_v44, %v4964_v21  ;;  %v5112_v44 = vld [vmem:[%s8774_s5 + $0x30] sm:$0xff] }
0x13b4   : > { %v5016_v51 = vmax.f32 %v4993_v30, %v5005_v45  ;;  %v4966_v18 = vpop.f32.mrf.mxu1  ;;  %v5123_v30 = vmul.f32 %v5111_v20, %v5099_v8  ;;  %v5135_v45 = vsel %vm4381_vm12, %v5121_v54, 0.0 }
0x13b5   : > { %v4967_v55 = vadd.f32 %v4966_v18, %v4925_v60  ;;  %v5132_v60 = vadd.f32 %v5131_v6, %v5130_v29  ;;  %v5113_v18 = vld [vmem:[%s8774_s5 + $0x38] sm:$0xff] }
0x13b6   : > { %v5020_v17 = vmax.f32 %v5016_v51, 0.0  ;;  %v5101_v51 = vld [vmem:[#allocation5 + $0x38] sm:$0xff] }
0x13b7   : > { %v5134_v27 = vadd.f32 %v5133_v59, %v5132_v60 }
0x13b8   : > { %5028 = vrot.lane.b32.xlu2 %v5020_v17, %s6635_s23 }
0x13b9   : > { %v5007_v14 = vpop.f32.mrf.mxu2  ;;  %v4928_v47 = vpop.f32.mrf.mxu0 }
0x13ba   : > { %v5008_v10 = vadd.f32 %v5007_v14, %v4967_v55  ;;  %v5137_v55 = vsel %vm4381_vm12, %v5122_v32, 0.0 }
0x13bc   : > { %v5017_v19 = vmax.f32 %v4996_v31, %v5008_v10  ;;  %v4969_v4 = vpop.f32.mrf.mxu1  ;;  %v5136_v31 = vadd.f32 %v5135_v45, %v5134_v27  ;;  %v5125_v10 = vmul.f32 %v5113_v18, %v5101_v51 }
0x13bd   : > { %v4970_v40 = vadd.f32 %v4969_v4, %v4928_v47  ;;  %v5114_v47 = vld [vmem:[%s8774_s5 + $0x40] sm:$0xff] }
0x13be   : > { %v5021_v7 = vmax.f32 %v5017_v19, 0.0  ;;  %v5139_v19 = vsel %vm4381_vm12, %v5123_v30, 0.0  ;;  %v5143_v52 = vsel %vm4381_vm12, %v5125_v10, 0.0 }
0x13c0   : > { %5030 = vrot.lane.b32.xlu0 %v5021_v7, %s6635_s23 }
0x13c1   : > { %v5010_v2 = vpop.f32.mrf.mxu2  ;;  %v4931_v23 = vpop.f32.mrf.mxu0 }
0x13c2   : > { %v5011_v13 = vadd.f32 %v5010_v2, %v4970_v40 }
0x13c4   : > { %v5018_v37 = vmax.f32 %v4999_v58, %v5011_v13  ;;  %v4972_v15 = vpop.f32.mrf.mxu1 }
0x13c5   : > { %v4973_v61 = vadd.f32 %v4972_v15, %v4931_v23  ;;  %v5116_v23 = vld [vmem:[%s8774_s5 + $0x50] sm:$0xff] }
0x13c6   : > { %v5022_v33 = vmax.f32 %v5018_v37, 0.0 }
0x13c8   : > { %5032 = vrot.lane.b32.xlu1 %v5022_v33, %s6635_s23 }
0x13c9   : > { %v5013_v24 = vpop.f32.mrf.mxu2 }
0x13ca   : > { %v5014_v0 = vadd.f32 %v5013_v24, %v4973_v61 }
0x13cc   : > { %v5019_v16 = vmax.f32 %v5002_v39, %v5014_v0 }
0x13ce   : > { %v5023_v22 = vmax.f32 %v5019_v16, 0.0  ;;  %v5117_v16 = vld [vmem:[%s8774_s5 + $0x58] sm:$0xff] }
0x13d0   : > { %5034 = vrot.lane.b32.xlu2 %v5023_v22, %s6635_s23 }
0x1412   : > { %v5029_v1 = vpop.permute.xlu2 %5028 }
0x1413   : > { %v5040_v43 = vmax.f32 %v5020_v17, %v5029_v1  ;;  %v5124_v17 = vmul.f32 %v5112_v44, %v5100_v28 }
0x1415   : > { %5371 = vmatmul.msk.f32.vlgmr.msrb.gmra.mxu3 %vm4335_vm11, %v5040_v43  ;;  %v5141_v2 = vsel %vm4381_vm12, %v5124_v17, 0.0 }
0x142a   : > { %v5035_v46 = vpop.permute.xlu2 %5034 }
0x142b   : > { %v5043_v36 = vmax.f32 %v5023_v22, %v5035_v46 }
0x1432   : > { %v5031_v35 = vpop.permute.xlu0 %5030 }
0x1433   : > { %v5041_v57 = vmax.f32 %v5021_v7, %v5031_v35  ;;  %v5138_v7 = vadd.f32 %v5137_v55, %v5136_v31 }
0x1435   : > { %5372 = vmatmul.msk.f32.gmra.mxu3 %vm4335_vm11, %v5041_v57  ;;  %v5140_v37 = vadd.f32 %v5139_v19, %v5138_v7 }
0x143a   : > { %v5033_v34 = vpop.permute.xlu1 %5032 }
0x143b   : > { %v5042_v12 = vmax.f32 %v5022_v33, %v5033_v34  ;;  %v5142_v33 = vadd.f32 %v5141_v2, %v5140_v37 }
0x143d   : > { %5373 = vmatmul.msk.f32.gmra.mxu3 %vm4335_vm11, %v5042_v12  ;;  %v5144_v39 = vadd.f32 %v5143_v52, %v5142_v33 }
0x1445   : > { %5374 = vmatmul.msk.f32.gmra.mxu3 %vm4335_vm11, %v5043_v36 }
0x1498   : > { %v5077_v62 = vpop.f32.mrf.mxu3 }
0x1499   : > { %5090 = vst.msk [vmem:[#allocation5 + $0x40] sm:$0xff] %vm4381_vm12, %v5077_v62 }
0x14a0   : > { %v5102_v14 = vld [vmem:[#allocation5 + $0x40] sm:$0xff] }
0x14a1   : > { %v5126_v40 = vmul.f32 %v5114_v47, %v5102_v14 }
0x14a3   : > { %v5145_v24 = vsel %vm4381_vm12, %v5126_v40, 0.0 }
0x14a4   : > { %v5146_v22 = vadd.f32 %v5145_v24, %v5144_v39 }
0x14b8   : > { %v5080_v50 = vpop.f32.mrf.mxu3 }
0x14b9   : > { %5091 = vst.msk [vmem:[#allocation5 + $0x48] sm:$0xff] %vm4381_vm12, %v5080_v50 }
0x14c0   : > { %v5083_v21 = vpop.f32.mrf.mxu3  ;;  %v5103_v4 = vld [vmem:[#allocation5 + $0x48] sm:$0xff] }
0x14c1   : > { %5092 = vst.msk [vmem:[#allocation5 + $0x50] sm:$0xff] %vm4381_vm12, %v5083_v21  ;;  %v5127_v15 = vmul.f32 %v5115_v53, %v5103_v4 }
0x14c3   : > { %v5147_v0 = vsel %vm4381_vm12, %v5127_v15, 0.0 }
0x14c4   : > { %v5148_v35 = vadd.f32 %v5147_v0, %v5146_v22 }
0x14c8   : > { %v5086_v58 = vpop.f32.mrf.mxu3  ;;  %v5104_v13 = vld [vmem:[#allocation5 + $0x50] sm:$0xff] }
0x14c9   : > { %5093 = vst.msk [vmem:[#allocation5 + $0x58] sm:$0xff] %vm4381_vm12, %v5086_v58  ;;  %v5128_v61 = vmul.f32 %v5116_v23, %v5104_v13 }
0x14cb   : > { %v5149_v1 = vsel %vm4381_vm12, %v5128_v61, 0.0 }
0x14cc   : > { %v5150_v34 = vadd.f32 %v5149_v1, %v5148_v35 }
0x14d0   : > { %v5105_v43 = vld [vmem:[#allocation5 + $0x58] sm:$0xff] }
0x14d1   : > { %v5129_v57 = vmul.f32 %v5117_v16, %v5105_v43 }
0x14d3   : > { %v5151_v12 = vsel %vm4381_vm12, %v5129_v57, 0.0 }
0x14d4   : > { %v5152_v46 = vadd.f32 %v5151_v12, %v5150_v34 }
0x14d6   : > { %5153 = vadd.xlane.f32.xlu0 %v5152_v46 }
0x1549   : > { %v5154_v36 = vpop.xlane.xlu0 %5153 }
0x154a   : > { %v5155_v62 = vrot.slane %v5154_v36, 4 }
0x154c   : > { %v5156_v38 = vadd.f32 %v5155_v62, %v5154_v36 }
0x154e   : > { %v5157_v9 = vrot.slane %v5156_v38, 2 }
0x1550   : > { %v5158_v63 = vadd.f32 %v5157_v9, %v5156_v38 }
0x1552   : > { %v5159_v50 = vrot.slane %v5158_v63, 1 }
0x1554   : > { %v5160_v26 = vadd.f32 %v5159_v50, %v5158_v63 }
0x1556   : > { %5422 = vpush %v5160_v26 }
0x1587   : > { %s5423_s24 = spop %5422 }
0x1588   : > { %v5162_v5 = vstv %s5423_s24 }
0x1589   : > { %v5375_v11 = vmul.f32 -1.442695, %v5162_v5 }
0x158b   : > { %6493 = vpow2.f32 %v5375_v11 }
0x1591   : > { %v6494_v41 = vpop.eup %6493 }
0x1592   : > { %v5166_v25 = vadd.f32 1.0, %v6494_v41 }
0x1594   : > { %6495 = vrcp.f32 %v5166_v25  ;;  %v5178_v49 = vand.u32 2147483648, %v5166_v25  ;;  %v5176_v54 = vand.u32 2147483647, %v5166_v25  ;;  %vm5172_vm14 = vweird.f32 %v5166_v25 }
0x1596   : > { %v5179_v8 = vor.u32 1.1754944e-38, %v5178_v49  ;;  %vm5177_vm1 = vcmp.eq.f32.partialorder %v5176_v54, 8.507059e+37 }
0x159a   : > { %v6496_v42 = vpop.eup %6495 }
0x159b   : > { %v5168_v48 = vmul.f32 %v6496_v42, %v5166_v25  ;;  %vm5173_vm13 = vweird.f32 %v6496_v42 }
0x159c   : > { %vm5174_vm15 = vmor %vm5172_vm14, %vm5173_vm13 }
0x159d   : > { %v5169_v56 = vsub.f32 1.0, %v5168_v48 }
0x159f   : > { %v5170_v3 = vmul.f32 %v6496_v42, %v5169_v56 }
0x15a1   : > { %v5171_v6 = vadd.f32 %v6496_v42, %v5170_v3 }
0x15a3   : > { %v5175_v20 = vsel %vm5174_vm15, %v6496_v42, %v5171_v6 }
0x15a4   : > { %v5180_v32 = vsel %vm5177_vm1, %v5179_v8, %v5175_v20 }
0x15a5   : > { %5183 = vst.msk [vmem:[%s405_s21] sm:$0x1] %vm5182_vm0, %v5180_v32 }
0x15a6 PF: > { %s22_s13 = sadd.s32 1, %s6609_s13  }
0x15a7   : > { %p19_p9 = scmp.ge.s32.totalorder %s22_s13, 4  }
0x15a9   :  { %21 = sbr.rel (!%p19_p9) target bundleno = 2 (0x2), region = 163 }
0x15ae   :  { %5201 = vsyncpa [#allocation7], 1 }
0x15af   :  { %5203 = vsyncpa [#allocation7 + $0x1], 1 }
0x15b0   :  { %5204 = vsyncpa [#allocation9], 1 }

</bundles_post_ra>
